<compile_context>
chip_gen: v7x
topology: tpu7x:2x2x1
jax: 0.10.0
libtpu: 0.0.40
codegen_flags: <defaults>
</compile_context>

<pallas_src>
import jax
import jax.numpy as jnp
from jax.experimental import pallas as pl
from jax.experimental.pallas import tpu as pltpu


def _round_up(x, m):
    return (x + m - 1) // m * m


def _pad_axis(a, axis, size):
    pad = size - a.shape[axis]
    if pad == 0:
        return a
    cfg = [(0, 0)] * a.ndim
    cfg[axis] = (0, pad)
    return jnp.pad(a, cfg)


# -----------------------------------------------------------------------------
# Fused kernel: per (batch, row-tile) -> upsample x1 (convT k2 s2), merge with
# x2, 3x3 conv + bias + ReLU.  Everything is W-parity packed: within the conv
# slab, lanes [0:kc] are even output columns and [kc:2*kc] odd output columns.
# -----------------------------------------------------------------------------
def _up_block_kernel(x1m_ref, x1t_ref, x1b_ref,          # x1 tile + 1-row halos
                     x2m_ref, x2t_ref, x2b_ref,          # x2 tile + 1-row halos (packed)
                     wt4_ref, bt4_ref, wme_ref, wed_ref, bc_ref,   # weights / biases
                     o_ref,                               # packed output tile
                     scr_ref):                            # conv-input slab scratch
    f32 = jnp.float32
    t = pl.program_id(1)
    num_t = pl.num_programs(1)

    _, th1, w, cin_p = x1m_ref.shape
    th = 2 * th1                           # output rows per tile
    x2w = x2m_ref.shape[3] // 2            # per-parity x2 lane width in HBM
    kc = wme_ref.shape[1]                  # conv K per column-parity group
    gw = wt4_ref.shape[1] // 4             # convT output group width
    co_n = bc_ref.shape[1]                 # padded conv output channels
    fused = (gw == kc)                     # x2 and x1-up share one lane group
    cdt = x2m_ref.dtype

    # ---- ConvTranspose2d(k=2, s=2): ONE MXU matmul over the tile's x1 rows plus
    #      the +/-1-row halos (merged per perf review).  Result lanes per x1 row:
    #      [a=0 | a=1] x [even col | odd col] x gw, with the cout real channels at
    #      their final lane offset inside each group.
    x1s = jnp.concatenate([x1t_ref[0], x1m_ref[0], x1b_ref[0]], axis=0)
    x1s = x1s.reshape((th1 + 2) * w, cin_p)
    ym = jnp.dot(x1s, wt4_ref[...], preferred_element_type=f32) + bt4_ref[...]
    ym = ym.astype(cdt)
    ym_r = ym.reshape(th1 + 2, w, 4 * gw)
    up_a0 = ym_r[1:th1 + 1, :, :2 * gw]    # upsampled even output rows of the tile
    up_a1 = ym_r[1:th1 + 1, :, 2 * gw:]    # upsampled odd output rows
    up_mid = jnp.stack([up_a0, up_a1], axis=1).reshape(th, w, 2 * gw)
    up_top = ym_r[0, :, 2 * gw:]           # output row t*th - 1   (row parity 1)
    up_bot = ym_r[th1 + 1, :, :2 * gw]     # output row (t+1)*th   (row parity 0)

    # ---- Assemble the conv input slab (rows [t*th-1 .. t*th+th], channels
    #      [x2 | x1-up] per column parity) directly into the VMEM scratch.
    x2m = x2m_ref[0]
    x2t = x2t_ref[0, 0]
    x2b = x2b_ref[0, 0]
    if fused:
        # x2 lanes of `up` and up-lanes of `x2` are zero by construction -> add.
        scr_ref[1:th + 1] = up_mid + x2m
        row_top = up_top + x2t
        row_bot = up_bot + x2b
        scr_ref[0] = jnp.where(t > 0, row_top, jnp.zeros_like(row_top))
        scr_ref[th + 1] = jnp.where(t < num_t - 1, row_bot, jnp.zeros_like(row_bot))
    else:
        c2s = x2w                          # 128-aligned split point inside each group
        scr_ref[1:th + 1, :, 0:c2s] = x2m[:, :, :c2s]
        scr_ref[1:th + 1, :, kc:kc + c2s] = x2m[:, :, c2s:]
        scr_ref[1:th + 1, :, c2s:kc] = up_mid[:, :, :gw]
        scr_ref[1:th + 1, :, kc + c2s:] = up_mid[:, :, gw:]
        x2t = jnp.where(t > 0, x2t, jnp.zeros_like(x2t))
        x2b = jnp.where(t < num_t - 1, x2b, jnp.zeros_like(x2b))
        ut = jnp.where(t > 0, up_top, jnp.zeros_like(up_top))
        ub = jnp.where(t < num_t - 1, up_bot, jnp.zeros_like(up_bot))
        scr_ref[0, :, 0:c2s] = x2t[:, :c2s]
        scr_ref[0, :, kc:kc + c2s] = x2t[:, c2s:]
        scr_ref[0, :, c2s:kc] = ut[:, :gw]
        scr_ref[0, :, kc + c2s:] = ut[:, gw:]
        scr_ref[th + 1, :, 0:c2s] = x2b[:, :c2s]
        scr_ref[th + 1, :, kc:kc + c2s] = x2b[:, c2s:]
        scr_ref[th + 1, :, c2s:kc] = ub[:, :gw]
        scr_ref[th + 1, :, kc + c2s:] = ub[:, gw:]

    # ---- 3x3 conv + bias + ReLU, column-parity packed, f32 MXU accumulation.
    slab = scr_ref[...]                               # (th+2, w, 2*kc)
    m2 = (th + 2) * w
    m = th * w
    e_flat = slab[:, :, :kc].reshape(m2, kc)          # even output columns
    o_flat = slab[:, :, kc:].reshape(m2, kc)          # odd output columns
    zcol = jnp.zeros((th + 2, 1, kc), cdt)
    # +/-1 column taps (zero past the image edge), built once per step.
    # TODO(synk): switch to pltpu.roll (XLU) once packed-dtype sublane rotation is
    # verified on all target generations; the slice+concat below always lowers.
    o_left = jnp.concatenate([zcol, slab[:, :w - 1, kc:]], axis=1).reshape(m2, kc)
    e_right = jnp.concatenate([slab[:, 1:, :kc], zcol], axis=1).reshape(m2, kc)

    acc_e = jnp.zeros((m, co_n), f32)
    acc_o = jnp.zeros((m, co_n), f32)
    for dy in range(3):
        lo = dy * w
        e_d = e_flat[lo:lo + m]
        o_d = o_flat[lo:lo + m]
        ol_d = o_left[lo:lo + m]
        er_d = e_right[lo:lo + m]
        # shared-LHS taps with N = 2*co_n (fills 256-wide MXU on v6e/v7x)
        r_e = jnp.dot(e_d, wme_ref[dy, :, :2 * co_n], preferred_element_type=f32)
        r_o = jnp.dot(o_d, wme_ref[dy, :, 2 * co_n:], preferred_element_type=f32)
        acc_e = (acc_e + r_e[:, :co_n] + r_o[:, :co_n]
                 + jnp.dot(ol_d, wed_ref[dy, :, :co_n], preferred_element_type=f32))
        acc_o = (acc_o + r_e[:, co_n:] + r_o[:, co_n:]
                 + jnp.dot(er_d, wed_ref[dy, :, co_n:], preferred_element_type=f32))

    bcv = bc_ref[...]
    out_e = jnp.maximum(acc_e + bcv, 0.0).astype(o_ref.dtype)
    out_o = jnp.maximum(acc_o + bcv, 0.0).astype(o_ref.dtype)
    # lane-dense, parity-packed output, stored per half (no final concat)
    o_ref[0, :, :, :co_n] = out_e.reshape(th, w, co_n)
    o_ref[0, :, :, co_n:] = out_o.reshape(th, w, co_n)


# -----------------------------------------------------------------------------
# Row-tile chooser: largest even divisor of 2*H whose real per-step footprint
# (double-buffered inputs/output, scratch, f32 temporaries) fits the budget, then
# shrunk if needed so the grid has >= 2 steps (megacore / pipeline overlap).
# -----------------------------------------------------------------------------
def _pick_tile_rows(n, ho, w, cin_p, x2w, kc, gw, co_n, cdt_bytes, out_bytes, budget):
    divs = sorted([d for d in range(2, ho + 1, 2) if ho % d == 0], reverse=True)

    def step_bytes(th):
        th1 = th // 2
        b = 0
        b += 2 * (th1 + 2) * w * cin_p * cdt_bytes            # x1 (+halos), 2 buffers
        b += 2 * (th + 2) * w * 2 * x2w * cdt_bytes           # x2 (+halos), 2 buffers
        b += 2 * th * w * 2 * co_n * out_bytes                # output, 2 buffers
        b += (th + 2) * w * 2 * kc * cdt_bytes                # slab scratch
        b += (th1 + 2) * w * 4 * gw * (4 + cdt_bytes)         # convT result f32 + cast
        b += th * w * 2 * gw * cdt_bytes                      # row-interleaved up part
        b += 2 * (th + 2) * w * kc * cdt_bytes                # shifted column slabs
        b += (2 * th * w * co_n + 2 * th * w * 2 * co_n) * 4  # accumulators + dots
        return b

    th = divs[-1]
    for d in divs:
        if step_bytes(d) <= budget:
            th = d
            break
    if n * (ho // th) < 2:
        for d in divs:
            if d < th and n * (ho // d) >= 2:
                th = d
                break
    return th


# -----------------------------------------------------------------------------
# Wrapper: NCHW in / NCHW out (matching the PyTorch module).
# -----------------------------------------------------------------------------
def up_block_forward(x1_nchw, x2_nchw, params, *, tile_rows=None,
                     compute_dtype=jnp.bfloat16, out_dtype=jnp.bfloat16,
                     vmem_budget_bytes=12 * 1024 * 1024):
    wt = params["convt_w"]   # (Cin, Cout, 2, 2)   torch ConvTranspose2d layout
    bt = params["convt_b"]   # (Cout,)
    wc = params["conv_w"]    # (Cout, C2 + Cout, 3, 3)  torch Conv2d layout
    bc = params["conv_b"]    # (Cout,)

    n, cin, h, w = x1_nchw.shape
    cout = wt.shape[1]
    c2 = x2_nchw.shape[1]
    ho, wo = 2 * h, 2 * w
    assert wt.shape == (cin, cout, 2, 2)
    assert wc.shape == (cout, c2 + cout, 3, 3)
    assert x2_nchw.shape == (n, c2, ho, wo)
    assert c2 > 0
    # TODO(synk): support widths that are not multiples of 8 (needs a masked edge
    # column tile); realistic UNet feature maps satisfy this.
    assert w % 8 == 0, "input width must be a multiple of 8"

    cin_p = _round_up(cin, 128)
    co_n = _round_up(cout, 128)
    fused = (c2 + cout) <= 128             # pack x2 + x1-up into one 128-lane group
    if fused:
        kc = 128
        gw = kc                            # convT output group width (x2 lanes zero)
        x2w = kc                           # per-parity x2 lane width in HBM
        k_off = c2                         # lane offset of x1-up inside the group
    else:
        x2w = _round_up(c2, 128)
        gw = _round_up(cout, 128)
        kc = x2w + gw
        k_off = 0

    cdt_bytes = jnp.dtype(compute_dtype).itemsize
    out_bytes = jnp.dtype(out_dtype).itemsize

    # Activations: NCHW -> NHWC, pad channels, cast, parity-pack W for x2.
    # TODO(synk): in a full UNet keep activations NHWC / parity-packed end-to-end so
    # these wrapper transposes (extra HBM passes) disappear.
    x1 = jnp.transpose(x1_nchw, (0, 2, 3, 1))
    x1 = _pad_axis(x1, 3, cin_p).astype(compute_dtype)
    x2 = jnp.transpose(x2_nchw, (0, 2, 3, 1))
    x2 = _pad_axis(x2, 3, x2w).astype(compute_dtype)
    x2p = x2.reshape(n, ho, w, 2 * x2w)

    # ConvTranspose2d weight -> (cin_p, 4*gw): column groups ordered (a, b), cout
    # real channels at lane offset k_off inside each group (rest zero).
    wt_t = jnp.transpose(wt, (0, 2, 3, 1))                     # (cin, 2, 2, cout)
    wt_t = jnp.pad(wt_t, ((0, cin_p - cin), (0, 0), (0, 0),
                          (k_off, gw - k_off - cout)))
    wt4 = wt_t.reshape(cin_p, 4 * gw).astype(compute_dtype)
    btg = jnp.pad(bt, (k_off, gw - k_off - cout))
    bt4 = jnp.tile(btg, 4).reshape(1, 4 * gw).astype(jnp.float32)

    # Conv2d weight: K layout = slab layout ([x2 | x1-up] per parity); pre-merge
    # taps that share an LHS along N for 2*co_n-wide MXU matmuls.
    wchw = jnp.transpose(wc, (2, 3, 1, 0))                     # (3, 3, c2+cout, cout)
    if fused:
        wk = jnp.pad(wchw, ((0, 0), (0, 0), (0, kc - (c2 + cout)),
                            (0, co_n - cout)))
    else:
        w_x2 = jnp.pad(wchw[:, :, :c2, :],
                       ((0, 0), (0, 0), (0, x2w - c2), (0, co_n - cout)))
        w_up = jnp.pad(wchw[:, :, c2:, :],
                       ((0, 0), (0, 0), (0, gw - cout), (0, co_n - cout)))
        wk = jnp.concatenate([w_x2, w_up], axis=2)             # (3, 3, kc, co_n)
    wk = wk.astype(compute_dtype)
    w0, w1, w2 = wk[:, 0], wk[:, 1], wk[:, 2]                  # (3, kc, co_n) each
    wme = jnp.concatenate([w1, w0, w2, w1], axis=-1)           # (3, kc, 4*co_n)
    wed = jnp.concatenate([w0, w2], axis=-1)                   # (3, kc, 2*co_n)
    bcp = jnp.pad(bc, (0, co_n - cout)).reshape(1, co_n).astype(jnp.float32)

    # Row-tile selection with a real footprint estimate.
    fixed = ((cin_p * 4 * gw + 3 * kc * 6 * co_n) * cdt_bytes * 2
             + (4 * gw + co_n) * 4 * 2)
    if tile_rows is None:
        tile_rows = _pick_tile_rows(
            n, ho, w, cin_p, x2w, kc, gw, co_n, cdt_bytes, out_bytes,
            max(vmem_budget_bytes - fixed, 1 << 20))
    th = int(tile_rows)
    assert th % 2 == 0 and ho % th == 0, "tile_rows must be an even divisor of 2*H"
    th1 = th // 2
    num_t = ho // th

    out_packed = pl.pallas_call(
        _up_block_kernel,
        out_shape=jax.ShapeDtypeStruct((n, ho, w, 2 * co_n), out_dtype),
        grid=(n, num_t),
        in_specs=[
            # x1 rows for this tile + clamped 1-row top/bottom halos
            pl.BlockSpec((1, th1, w, cin_p), lambda i, j: (i, j, 0, 0)),
            pl.BlockSpec((1, 1, w, cin_p),
                         lambda i, j: (i, jnp.maximum(j * th1 - 1, 0), 0, 0)),
            pl.BlockSpec((1, 1, w, cin_p),
                         lambda i, j: (i, jnp.minimum((j + 1) * th1, h - 1), 0, 0)),
            # x2 (W-parity packed) rows for this tile + halos
            pl.BlockSpec((1, th, w, 2 * x2w), lambda i, j: (i, j, 0, 0)),
            pl.BlockSpec((1, 1, w, 2 * x2w),
                         lambda i, j: (i, jnp.maximum(j * th - 1, 0), 0, 0)),
            pl.BlockSpec((1, 1, w, 2 * x2w),
                         lambda i, j: (i, jnp.minimum((j + 1) * th, ho - 1), 0, 0)),
            # weights / biases: constant index maps -> VMEM resident across the grid.
            # TODO(synk): pipeline_mode=pl.Buffered(1) here would drop their second
            # buffer (VMEM headroom on v7x) once verified on all jax versions.
            pl.BlockSpec((cin_p, 4 * gw), lambda i, j: (0, 0)),
            pl.BlockSpec((1, 4 * gw), lambda i, j: (0, 0)),
            pl.BlockSpec((3, kc, 4 * co_n), lambda i, j: (0, 0, 0)),
            pl.BlockSpec((3, kc, 2 * co_n), lambda i, j: (0, 0, 0)),
            pl.BlockSpec((1, co_n), lambda i, j: (0, 0)),
        ],
        out_specs=pl.BlockSpec((1, th, w, 2 * co_n), lambda i, j: (i, j, 0, 0)),
        scratch_shapes=[pltpu.VMEM((th + 2, w, 2 * kc), compute_dtype)],
        compiler_params=pltpu.CompilerParams(
            dimension_semantics=("parallel", "parallel"),
            vmem_limit_bytes=32 * 1024 * 1024),
    )(x1, x1, x1, x2p, x2p, x2p, wt4, bt4, wme, wed, bcp)

    # Free reshape back to NHWC, drop channel padding, back to NCHW.
    out = out_packed.reshape(n, ho, wo, co_n)[:, :, :, :cout]
    return jnp.transpose(out, (0, 3, 1, 2))


# -----------------------------------------------------------------------------
# Pure-JAX reference (NCHW).  `round_fn` mirrors the kernel's bf16 operand
# rounding so the comparison is tight.
# -----------------------------------------------------------------------------
def up_block_reference(x1, x2, params, round_fn=None):
    if round_fn is None:
        round_fn = lambda a: a
    wt, bt = params["convt_w"], params["convt_b"]
    wc, bc = params["conv_w"], params["conv_b"]
    n, cin, h, w = x1.shape
    cout = wt.shape[1]

    y = jnp.einsum('ncij,cokl->noikjl', round_fn(x1), round_fn(wt))
    y = y.reshape(n, cout, 2 * h, 2 * w) + bt[None, :, None, None]
    y = round_fn(y)   # the kernel feeds the upsampled rows to the MXU in bf16

    xcat = jnp.concatenate([round_fn(x2), y], axis=1)
    out = jax.lax.conv_general_dilated(
        xcat, round_fn(wc), window_strides=(1, 1), padding=((1, 1), (1, 1)),
        dimension_numbers=('NCHW', 'OIHW', 'NCHW'))
    out = out + bc[None, :, None, None]
    return jnp.maximum(out, 0.0)


if __name__ == "__main__":
    def run_case(n, cin, cout, h, w, tile_rows, key, out_dtype, wscale, atol):
        k1, k2, k3, k4, k5, k6 = jax.random.split(key, 6)
        c2 = cin - cout   # channels of the skip connection x2
        x1 = jax.random.normal(k1, (n, cin, h, w), jnp.float32)
        x2 = jax.random.normal(k2, (n, c2, 2 * h, 2 * w), jnp.float32)
        params = {
            "convt_w": jax.random.normal(k3, (cin, cout, 2, 2), jnp.float32) * wscale,
            "convt_b": jax.random.normal(k4, (cout,), jnp.float32) * wscale,
            "conv_w": jax.random.normal(k5, (cout, cin, 3, 3), jnp.float32) * wscale,
            "conv_b": jax.random.normal(k6, (cout,), jnp.float32) * wscale,
        }
        out = jax.block_until_ready(
            up_block_forward(x1, x2, params, tile_rows=tile_rows,
                             out_dtype=out_dtype))
        assert out.shape == (n, cout, 2 * h, 2 * w), out.shape
        out = out.astype(jnp.float32)

        bf = lambda a: a.astype(jnp.bfloat16).astype(jnp.float32)
        ref = up_block_reference(x1, x2, params, round_fn=bf)
        if out_dtype == jnp.bfloat16:
            ref = bf(ref)
        err = float(jnp.max(jnp.abs(out - ref)))
        assert err < atol, (err, atol)
        return err

    key = jax.random.PRNGKey(0)
    ka, kb, kc_ = jax.random.split(key, 3)
    # fused-channel path (c2 + cout <= 128), 2 row tiles, f32 output, tight check
    run_case(n=2, cin=8, cout=4, h=8, w=8, tile_rows=8, key=ka,
             out_dtype=jnp.float32, wscale=0.1, atol=1e-2)
    # fused-channel path, auto tile selection (forces >= 2 grid steps), bf16 output
    run_case(n=1, cin=16, cout=8, h=4, w=8, tile_rows=None, key=kb,
             out_dtype=jnp.bfloat16, wscale=0.1, atol=6e-2)
    # wide-channel path (c2 + cout > 128 -> separate 128-lane groups), bf16 output
    run_case(n=1, cin=192, cout=64, h=4, w=8, tile_rows=4, key=kc_,
             out_dtype=jnp.bfloat16, wscale=0.03, atol=6e-2)
    print("KERNEL_OK")
</pallas_src>

<mosaic_0001>
module attributes {stable_mosaic.version = 11 : i64} {
  func.func @_up_block_kernel(%arg0: i32, %arg1: i32, %arg2: memref<1x4x8x128xbf16, #tpu.memory_space<vmem>>, %arg3: memref<1x1x8x128xbf16, #tpu.memory_space<vmem>>, %arg4: memref<1x1x8x128xbf16, #tpu.memory_space<vmem>>, %arg5: memref<1x8x8x256xbf16, #tpu.memory_space<vmem>>, %arg6: memref<1x1x8x256xbf16, #tpu.memory_space<vmem>>, %arg7: memref<1x1x8x256xbf16, #tpu.memory_space<vmem>>, %arg8: memref<128x512xbf16, #tpu.memory_space<vmem>>, %arg9: memref<1x512xf32, #tpu.memory_space<vmem>>, %arg10: memref<3x128x512xbf16, #tpu.memory_space<vmem>>, %arg11: memref<3x128x256xbf16, #tpu.memory_space<vmem>>, %arg12: memref<1x128xf32, #tpu.memory_space<vmem>>, %arg13: memref<1x8x8x256xf32, #tpu.memory_space<vmem>>, %arg14: memref<10x8x256xbf16, #tpu.memory_space<vmem>>) attributes {dimension_semantics = [#tpu.dimension_semantics<parallel>, #tpu.dimension_semantics<parallel>], iteration_bounds = array<i64: 2, 2>, scalar_prefetch = 0 : i64, scratch_operands = 1 : i64, tpu.core_type = #tpu.core_type<tc>, window_params = [{transform_indices = @transform_0, window_bounds = array<i64: 1, 4, 8, 128>}, {transform_indices = @transform_1, window_bounds = array<i64: 1, 1, 8, 128>}, {transform_indices = @transform_2, window_bounds = array<i64: 1, 1, 8, 128>}, {transform_indices = @transform_3, window_bounds = array<i64: 1, 8, 8, 256>}, {transform_indices = @transform_4, window_bounds = array<i64: 1, 1, 8, 256>}, {transform_indices = @transform_5, window_bounds = array<i64: 1, 1, 8, 256>}, {pipeline_mode = #tpu.pipeline_mode<synchronous>, transform_indices = @transform_6, window_bounds = array<i64: 128, 512>}, {pipeline_mode = #tpu.pipeline_mode<synchronous>, transform_indices = @transform_7, window_bounds = array<i64: 1, 512>}, {pipeline_mode = #tpu.pipeline_mode<synchronous>, transform_indices = @transform_8, window_bounds = array<i64: 3, 128, 512>}, {pipeline_mode = #tpu.pipeline_mode<synchronous>, transform_indices = @transform_9, window_bounds = array<i64: 3, 128, 256>}, {pipeline_mode = #tpu.pipeline_mode<synchronous>, transform_indices = @transform_10, window_bounds = array<i64: 1, 128>}, {transform_indices = @transform_11, window_bounds = array<i64: 1, 8, 8, 256>}]} {
    %c0 = arith.constant 0 : index
    %c0_0 = arith.constant 0 : index
    %c0_1 = arith.constant 0 : index
    %c0_2 = arith.constant 0 : index
    %0 = vector.load %arg3[%c0, %c0_0, %c0_1, %c0_2] : memref<1x1x8x128xbf16, #tpu.memory_space<vmem>>, vector<1x1x8x128xbf16>
    %1 = vector.shape_cast %0 : vector<1x1x8x128xbf16> to vector<1x8x128xbf16>
    %c0_3 = arith.constant 0 : index
    %c0_4 = arith.constant 0 : index
    %c0_5 = arith.constant 0 : index
    %c0_6 = arith.constant 0 : index
    %2 = vector.load %arg2[%c0_3, %c0_4, %c0_5, %c0_6] : memref<1x4x8x128xbf16, #tpu.memory_space<vmem>>, vector<1x4x8x128xbf16>
    %3 = vector.shape_cast %2 : vector<1x4x8x128xbf16> to vector<4x8x128xbf16>
    %c0_7 = arith.constant 0 : index
    %c0_8 = arith.constant 0 : index
    %c0_9 = arith.constant 0 : index
    %c0_10 = arith.constant 0 : index
    %4 = vector.load %arg4[%c0_7, %c0_8, %c0_9, %c0_10] : memref<1x1x8x128xbf16, #tpu.memory_space<vmem>>, vector<1x1x8x128xbf16>
    %5 = vector.shape_cast %4 : vector<1x1x8x128xbf16> to vector<1x8x128xbf16>
    %6 = tpu.concatenate %1, %3, %5 in 0 : vector<1x8x128xbf16>, vector<4x8x128xbf16>, vector<1x8x128xbf16> -> vector<6x8x128xbf16>
    %7 = vector.shape_cast %6 : vector<6x8x128xbf16> to vector<48x128xbf16>
    %c0_11 = arith.constant 0 : index
    %c0_12 = arith.constant 0 : index
    %8 = vector.load %arg8[%c0_11, %c0_12] : memref<128x512xbf16, #tpu.memory_space<vmem>>, vector<128x512xbf16>
    %cst = arith.constant dense<0.000000e+00> : vector<48x512xf32>
    %9 = tpu.matmul %7, %8, %cst {dimension_numbers = #tpu.dot_dimension_numbers<[1], [0], [0], [1], [0, 0, 1, 1], [], []>} : vector<48x128xbf16>, vector<128x512xbf16>, vector<48x512xf32> -> vector<48x512xf32>
    %c0_13 = arith.constant 0 : index
    %c0_14 = arith.constant 0 : index
    %10 = vector.load %arg9[%c0_13, %c0_14] : memref<1x512xf32, #tpu.memory_space<vmem>>, vector<1x512xf32>
    %11 = vector.broadcast %10 : vector<1x512xf32> to vector<48x512xf32>
    %12 = arith.addf %9, %11 : vector<48x512xf32>
    %13 = arith.truncf %12 : vector<48x512xf32> to vector<48x512xbf16>
    %14 = vector.shape_cast %13 : vector<48x512xbf16> to vector<6x8x512xbf16>
    %15 = vector.extract_strided_slice %14 {offsets = [1, 0, 0], sizes = [4, 8, 256], strides = [1, 1, 1]} : vector<6x8x512xbf16> to vector<4x8x256xbf16>
    %16 = vector.extract_strided_slice %14 {offsets = [1, 0, 256], sizes = [4, 8, 256], strides = [1, 1, 1]} : vector<6x8x512xbf16> to vector<4x8x256xbf16>
    %17 = vector.shape_cast %15 : vector<4x8x256xbf16> to vector<4x1x8x256xbf16>
    %18 = vector.shape_cast %16 : vector<4x8x256xbf16> to vector<4x1x8x256xbf16>
    %19 = tpu.concatenate %17, %18 in 1 : vector<4x1x8x256xbf16>, vector<4x1x8x256xbf16> -> vector<4x2x8x256xbf16>
    %20 = vector.shape_cast %19 : vector<4x2x8x256xbf16> to vector<8x8x256xbf16>
    %21 = vector.extract_strided_slice %14 {offsets = [0, 0, 256], sizes = [1, 8, 256], strides = [1, 1, 1]} : vector<6x8x512xbf16> to vector<1x8x256xbf16>
    %22 = vector.shape_cast %21 : vector<1x8x256xbf16> to vector<8x256xbf16>
    %23 = vector.extract_strided_slice %14 {offsets = [5, 0, 0], sizes = [1, 8, 256], strides = [1, 1, 1]} : vector<6x8x512xbf16> to vector<1x8x256xbf16>
    %24 = vector.shape_cast %23 : vector<1x8x256xbf16> to vector<8x256xbf16>
    %c0_15 = arith.constant 0 : index
    %c0_16 = arith.constant 0 : index
    %c0_17 = arith.constant 0 : index
    %c0_18 = arith.constant 0 : index
    %25 = vector.load %arg5[%c0_15, %c0_16, %c0_17, %c0_18] : memref<1x8x8x256xbf16, #tpu.memory_space<vmem>>, vector<1x8x8x256xbf16>
    %26 = vector.shape_cast %25 : vector<1x8x8x256xbf16> to vector<8x8x256xbf16>
    %c0_19 = arith.constant 0 : index
    %c0_20 = arith.constant 0 : index
    %c0_21 = arith.constant 0 : index
    %c0_22 = arith.constant 0 : index
    %27 = vector.load %arg6[%c0_19, %c0_20, %c0_21, %c0_22] : memref<1x1x8x256xbf16, #tpu.memory_space<vmem>>, vector<1x1x8x256xbf16>
    %28 = vector.shape_cast %27 : vector<1x1x8x256xbf16> to vector<8x256xbf16>
    %c0_23 = arith.constant 0 : index
    %c0_24 = arith.constant 0 : index
    %c0_25 = arith.constant 0 : index
    %c0_26 = arith.constant 0 : index
    %29 = vector.load %arg7[%c0_23, %c0_24, %c0_25, %c0_26] : memref<1x1x8x256xbf16, #tpu.memory_space<vmem>>, vector<1x1x8x256xbf16>
    %30 = vector.shape_cast %29 : vector<1x1x8x256xbf16> to vector<8x256xbf16>
    %31 = arith.addf %20, %26 : vector<8x8x256xbf16>
    %c1 = arith.constant 1 : index
    %c0_27 = arith.constant 0 : index
    %c0_28 = arith.constant 0 : index
    %32 = vector.load %arg14[%c1, %c0_27, %c0_28] : memref<10x8x256xbf16, #tpu.memory_space<vmem>>, vector<8x8x256xbf16>
    tpu.vector_store %arg14[%c1, %c0_27, %c0_28], %31 {strides = array<i32>} : memref<10x8x256xbf16, #tpu.memory_space<vmem>>, vector<8x8x256xbf16>,
    %33 = arith.addf %22, %28 : vector<8x256xbf16>
    %34 = arith.addf %24, %30 : vector<8x256xbf16>
    %c0_i32 = arith.constant 0 : i32
    %35 = arith.cmpi sgt, %arg1, %c0_i32 : i32
    %cst_29 = arith.constant 0.000000e+00 : bf16
    %36 = vector.broadcast %cst_29 : bf16 to vector<8x256xbf16>
    %37 = arith.select %35, %33, %36 : vector<8x256xbf16>
    %c0_30 = arith.constant 0 : index
    %c0_31 = arith.constant 0 : index
    %c0_32 = arith.constant 0 : index
    %38 = vector.load %arg14[%c0_30, %c0_31, %c0_32] : memref<10x8x256xbf16, #tpu.memory_space<vmem>>, vector<1x8x256xbf16>
    %39 = vector.shape_cast %38 : vector<1x8x256xbf16> to vector<8x256xbf16>
    %40 = vector.shape_cast %37 : vector<8x256xbf16> to vector<1x8x256xbf16>
    tpu.vector_store %arg14[%c0_30, %c0_31, %c0_32], %40 {strides = array<i32>} : memref<10x8x256xbf16, #tpu.memory_space<vmem>>, vector<1x8x256xbf16>,
    %c1_i32 = arith.constant 1 : i32
    %41 = arith.cmpi slt, %arg1, %c1_i32 : i32
    %cst_33 = arith.constant 0.000000e+00 : bf16
    %42 = vector.broadcast %cst_33 : bf16 to vector<8x256xbf16>
    %43 = arith.select %41, %34, %42 : vector<8x256xbf16>
    %c9 = arith.constant 9 : index
    %c0_34 = arith.constant 0 : index
    %c0_35 = arith.constant 0 : index
    %44 = vector.load %arg14[%c9, %c0_34, %c0_35] : memref<10x8x256xbf16, #tpu.memory_space<vmem>>, vector<1x8x256xbf16>
    %45 = vector.shape_cast %44 : vector<1x8x256xbf16> to vector<8x256xbf16>
    %46 = vector.shape_cast %43 : vector<8x256xbf16> to vector<1x8x256xbf16>
    tpu.vector_store %arg14[%c9, %c0_34, %c0_35], %46 {strides = array<i32>} : memref<10x8x256xbf16, #tpu.memory_space<vmem>>, vector<1x8x256xbf16>,
    %c0_36 = arith.constant 0 : index
    %c0_37 = arith.constant 0 : index
    %c0_38 = arith.constant 0 : index
    %47 = vector.load %arg14[%c0_36, %c0_37, %c0_38] : memref<10x8x256xbf16, #tpu.memory_space<vmem>>, vector<10x8x256xbf16>
    %48 = vector.extract_strided_slice %47 {offsets = [0, 0, 0], sizes = [10, 8, 128], strides = [1, 1, 1]} : vector<10x8x256xbf16> to vector<10x8x128xbf16>
    %49 = vector.shape_cast %48 : vector<10x8x128xbf16> to vector<80x128xbf16>
    %50 = vector.extract_strided_slice %47 {offsets = [0, 0, 128], sizes = [10, 8, 128], strides = [1, 1, 1]} : vector<10x8x256xbf16> to vector<10x8x128xbf16>
    %51 = vector.shape_cast %50 : vector<10x8x128xbf16> to vector<80x128xbf16>
    %cst_39 = arith.constant 0.000000e+00 : bf16
    %52 = vector.broadcast %cst_39 : bf16 to vector<10x1x128xbf16>
    %53 = vector.extract_strided_slice %47 {offsets = [0, 0, 128], sizes = [10, 7, 128], strides = [1, 1, 1]} : vector<10x8x256xbf16> to vector<10x7x128xbf16>
    %54 = tpu.concatenate %52, %53 in 1 : vector<10x1x128xbf16>, vector<10x7x128xbf16> -> vector<10x8x128xbf16>
    %55 = vector.shape_cast %54 : vector<10x8x128xbf16> to vector<80x128xbf16>
    %56 = vector.extract_strided_slice %47 {offsets = [0, 1, 0], sizes = [10, 7, 128], strides = [1, 1, 1]} : vector<10x8x256xbf16> to vector<10x7x128xbf16>
    %57 = tpu.concatenate %56, %52 in 1 : vector<10x7x128xbf16>, vector<10x1x128xbf16> -> vector<10x8x128xbf16>
    %58 = vector.shape_cast %57 : vector<10x8x128xbf16> to vector<80x128xbf16>
    %cst_40 = arith.constant 0.000000e+00 : f32
    %59 = vector.broadcast %cst_40 : f32 to vector<64x128xf32>
    %cst_41 = arith.constant 0.000000e+00 : f32
    %60 = vector.broadcast %cst_41 : f32 to vector<64x128xf32>
    %61 = vector.extract_strided_slice %49 {offsets = [0, 0], sizes = [64, 128], strides = [1, 1]} : vector<80x128xbf16> to vector<64x128xbf16>
    %62 = vector.extract_strided_slice %51 {offsets = [0, 0], sizes = [64, 128], strides = [1, 1]} : vector<80x128xbf16> to vector<64x128xbf16>
    %63 = vector.extract_strided_slice %55 {offsets = [0, 0], sizes = [64, 128], strides = [1, 1]} : vector<80x128xbf16> to vector<64x128xbf16>
    %64 = vector.extract_strided_slice %58 {offsets = [0, 0], sizes = [64, 128], strides = [1, 1]} : vector<80x128xbf16> to vector<64x128xbf16>
    %c0_42 = arith.constant 0 : index
    %c0_43 = arith.constant 0 : index
    %c0_44 = arith.constant 0 : index
    %65 = vector.load %arg10[%c0_42, %c0_43, %c0_44] : memref<3x128x512xbf16, #tpu.memory_space<vmem>>, vector<1x128x256xbf16>
    %66 = vector.shape_cast %65 : vector<1x128x256xbf16> to vector<128x256xbf16>
    %cst_45 = arith.constant dense<0.000000e+00> : vector<64x256xf32>
    %67 = tpu.matmul %61, %66, %cst_45 {dimension_numbers = #tpu.dot_dimension_numbers<[1], [0], [0], [1], [0, 0, 1, 1], [], []>} : vector<64x128xbf16>, vector<128x256xbf16>, vector<64x256xf32> -> vector<64x256xf32>
    %c0_46 = arith.constant 0 : index
    %c0_47 = arith.constant 0 : index
    %c256 = arith.constant 256 : index
    %68 = vector.load %arg10[%c0_46, %c0_47, %c256] : memref<3x128x512xbf16, #tpu.memory_space<vmem>>, vector<1x128x256xbf16>
    %69 = vector.shape_cast %68 : vector<1x128x256xbf16> to vector<128x256xbf16>
    %cst_48 = arith.constant dense<0.000000e+00> : vector<64x256xf32>
    %70 = tpu.matmul %62, %69, %cst_48 {dimension_numbers = #tpu.dot_dimension_numbers<[1], [0], [0], [1], [0, 0, 1, 1], [], []>} : vector<64x128xbf16>, vector<128x256xbf16>, vector<64x256xf32> -> vector<64x256xf32>
    %71 = vector.extract_strided_slice %67 {offsets = [0, 0], sizes = [64, 128], strides = [1, 1]} : vector<64x256xf32> to vector<64x128xf32>
    %72 = arith.addf %59, %71 : vector<64x128xf32>
    %73 = vector.extract_strided_slice %70 {offsets = [0, 0], sizes = [64, 128], strides = [1, 1]} : vector<64x256xf32> to vector<64x128xf32>
    %74 = arith.addf %72, %73 : vector<64x128xf32>
    %c0_49 = arith.constant 0 : index
    %c0_50 = arith.constant 0 : index
    %c0_51 = arith.constant 0 : index
    %75 = vector.load %arg11[%c0_49, %c0_50, %c0_51] : memref<3x128x256xbf16, #tpu.memory_space<vmem>>, vector<1x128x128xbf16>
    %76 = vector.shape_cast %75 : vector<1x128x128xbf16> to vector<128x128xbf16>
    %cst_52 = arith.constant dense<0.000000e+00> : vector<64x128xf32>
    %77 = tpu.matmul %63, %76, %cst_52 {dimension_numbers = #tpu.dot_dimension_numbers<[1], [0], [0], [1], [0, 0, 1, 1], [], []>} : vector<64x128xbf16>, vector<128x128xbf16>, vector<64x128xf32> -> vector<64x128xf32>
    %78 = arith.addf %74, %77 : vector<64x128xf32>
    %79 = vector.extract_strided_slice %67 {offsets = [0, 128], sizes = [64, 128], strides = [1, 1]} : vector<64x256xf32> to vector<64x128xf32>
    %80 = arith.addf %60, %79 : vector<64x128xf32>
    %81 = vector.extract_strided_slice %70 {offsets = [0, 128], sizes = [64, 128], strides = [1, 1]} : vector<64x256xf32> to vector<64x128xf32>
    %82 = arith.addf %80, %81 : vector<64x128xf32>
    %c0_53 = arith.constant 0 : index
    %c0_54 = arith.constant 0 : index
    %c128 = arith.constant 128 : index
    %83 = vector.load %arg11[%c0_53, %c0_54, %c128] : memref<3x128x256xbf16, #tpu.memory_space<vmem>>, vector<1x128x128xbf16>
    %84 = vector.shape_cast %83 : vector<1x128x128xbf16> to vector<128x128xbf16>
    %cst_55 = arith.constant dense<0.000000e+00> : vector<64x128xf32>
    %85 = tpu.matmul %64, %84, %cst_55 {dimension_numbers = #tpu.dot_dimension_numbers<[1], [0], [0], [1], [0, 0, 1, 1], [], []>} : vector<64x128xbf16>, vector<128x128xbf16>, vector<64x128xf32> -> vector<64x128xf32>
    %86 = arith.addf %82, %85 : vector<64x128xf32>
    %87 = vector.extract_strided_slice %49 {offsets = [8, 0], sizes = [64, 128], strides = [1, 1]} : vector<80x128xbf16> to vector<64x128xbf16>
    %88 = vector.extract_strided_slice %51 {offsets = [8, 0], sizes = [64, 128], strides = [1, 1]} : vector<80x128xbf16> to vector<64x128xbf16>
    %89 = vector.extract_strided_slice %55 {offsets = [8, 0], sizes = [64, 128], strides = [1, 1]} : vector<80x128xbf16> to vector<64x128xbf16>
    %90 = vector.extract_strided_slice %58 {offsets = [8, 0], sizes = [64, 128], strides = [1, 1]} : vector<80x128xbf16> to vector<64x128xbf16>
    %c1_56 = arith.constant 1 : index
    %c0_57 = arith.constant 0 : index
    %c0_58 = arith.constant 0 : index
    %91 = vector.load %arg10[%c1_56, %c0_57, %c0_58] : memref<3x128x512xbf16, #tpu.memory_space<vmem>>, vector<1x128x256xbf16>
    %92 = vector.shape_cast %91 : vector<1x128x256xbf16> to vector<128x256xbf16>
    %cst_59 = arith.constant dense<0.000000e+00> : vector<64x256xf32>
    %93 = tpu.matmul %87, %92, %cst_59 {dimension_numbers = #tpu.dot_dimension_numbers<[1], [0], [0], [1], [0, 0, 1, 1], [], []>} : vector<64x128xbf16>, vector<128x256xbf16>, vector<64x256xf32> -> vector<64x256xf32>
    %c1_60 = arith.constant 1 : index
    %c0_61 = arith.constant 0 : index
    %c256_62 = arith.constant 256 : index
    %94 = vector.load %arg10[%c1_60, %c0_61, %c256_62] : memref<3x128x512xbf16, #tpu.memory_space<vmem>>, vector<1x128x256xbf16>
    %95 = vector.shape_cast %94 : vector<1x128x256xbf16> to vector<128x256xbf16>
    %cst_63 = arith.constant dense<0.000000e+00> : vector<64x256xf32>
    %96 = tpu.matmul %88, %95, %cst_63 {dimension_numbers = #tpu.dot_dimension_numbers<[1], [0], [0], [1], [0, 0, 1, 1], [], []>} : vector<64x128xbf16>, vector<128x256xbf16>, vector<64x256xf32> -> vector<64x256xf32>
    %97 = vector.extract_strided_slice %93 {offsets = [0, 0], sizes = [64, 128], strides = [1, 1]} : vector<64x256xf32> to vector<64x128xf32>
    %98 = arith.addf %78, %97 : vector<64x128xf32>
    %99 = vector.extract_strided_slice %96 {offsets = [0, 0], sizes = [64, 128], strides = [1, 1]} : vector<64x256xf32> to vector<64x128xf32>
    %100 = arith.addf %98, %99 : vector<64x128xf32>
    %c1_64 = arith.constant 1 : index
    %c0_65 = arith.constant 0 : index
    %c0_66 = arith.constant 0 : index
    %101 = vector.load %arg11[%c1_64, %c0_65, %c0_66] : memref<3x128x256xbf16, #tpu.memory_space<vmem>>, vector<1x128x128xbf16>
    %102 = vector.shape_cast %101 : vector<1x128x128xbf16> to vector<128x128xbf16>
    %cst_67 = arith.constant dense<0.000000e+00> : vector<64x128xf32>
    %103 = tpu.matmul %89, %102, %cst_67 {dimension_numbers = #tpu.dot_dimension_numbers<[1], [0], [0], [1], [0, 0, 1, 1], [], []>} : vector<64x128xbf16>, vector<128x128xbf16>, vector<64x128xf32> -> vector<64x128xf32>
    %104 = arith.addf %100, %103 : vector<64x128xf32>
    %105 = vector.extract_strided_slice %93 {offsets = [0, 128], sizes = [64, 128], strides = [1, 1]} : vector<64x256xf32> to vector<64x128xf32>
    %106 = arith.addf %86, %105 : vector<64x128xf32>
    %107 = vector.extract_strided_slice %96 {offsets = [0, 128], sizes = [64, 128], strides = [1, 1]} : vector<64x256xf32> to vector<64x128xf32>
    %108 = arith.addf %106, %107 : vector<64x128xf32>
    %c1_68 = arith.constant 1 : index
    %c0_69 = arith.constant 0 : index
    %c128_70 = arith.constant 128 : index
    %109 = vector.load %arg11[%c1_68, %c0_69, %c128_70] : memref<3x128x256xbf16, #tpu.memory_space<vmem>>, vector<1x128x128xbf16>
    %110 = vector.shape_cast %109 : vector<1x128x128xbf16> to vector<128x128xbf16>
    %cst_71 = arith.constant dense<0.000000e+00> : vector<64x128xf32>
    %111 = tpu.matmul %90, %110, %cst_71 {dimension_numbers = #tpu.dot_dimension_numbers<[1], [0], [0], [1], [0, 0, 1, 1], [], []>} : vector<64x128xbf16>, vector<128x128xbf16>, vector<64x128xf32> -> vector<64x128xf32>
    %112 = arith.addf %108, %111 : vector<64x128xf32>
    %113 = vector.extract_strided_slice %49 {offsets = [16, 0], sizes = [64, 128], strides = [1, 1]} : vector<80x128xbf16> to vector<64x128xbf16>
    %114 = vector.extract_strided_slice %51 {offsets = [16, 0], sizes = [64, 128], strides = [1, 1]} : vector<80x128xbf16> to vector<64x128xbf16>
    %115 = vector.extract_strided_slice %55 {offsets = [16, 0], sizes = [64, 128], strides = [1, 1]} : vector<80x128xbf16> to vector<64x128xbf16>
    %116 = vector.extract_strided_slice %58 {offsets = [16, 0], sizes = [64, 128], strides = [1, 1]} : vector<80x128xbf16> to vector<64x128xbf16>
    %c2 = arith.constant 2 : index
    %c0_72 = arith.constant 0 : index
    %c0_73 = arith.constant 0 : index
    %117 = vector.load %arg10[%c2, %c0_72, %c0_73] : memref<3x128x512xbf16, #tpu.memory_space<vmem>>, vector<1x128x256xbf16>
    %118 = vector.shape_cast %117 : vector<1x128x256xbf16> to vector<128x256xbf16>
    %cst_74 = arith.constant dense<0.000000e+00> : vector<64x256xf32>
    %119 = tpu.matmul %113, %118, %cst_74 {dimension_numbers = #tpu.dot_dimension_numbers<[1], [0], [0], [1], [0, 0, 1, 1], [], []>} : vector<64x128xbf16>, vector<128x256xbf16>, vector<64x256xf32> -> vector<64x256xf32>
    %c2_75 = arith.constant 2 : index
    %c0_76 = arith.constant 0 : index
    %c256_77 = arith.constant 256 : index
    %120 = vector.load %arg10[%c2_75, %c0_76, %c256_77] : memref<3x128x512xbf16, #tpu.memory_space<vmem>>, vector<1x128x256xbf16>
    %121 = vector.shape_cast %120 : vector<1x128x256xbf16> to vector<128x256xbf16>
    %cst_78 = arith.constant dense<0.000000e+00> : vector<64x256xf32>
    %122 = tpu.matmul %114, %121, %cst_78 {dimension_numbers = #tpu.dot_dimension_numbers<[1], [0], [0], [1], [0, 0, 1, 1], [], []>} : vector<64x128xbf16>, vector<128x256xbf16>, vector<64x256xf32> -> vector<64x256xf32>
    %123 = vector.extract_strided_slice %119 {offsets = [0, 0], sizes = [64, 128], strides = [1, 1]} : vector<64x256xf32> to vector<64x128xf32>
    %124 = arith.addf %104, %123 : vector<64x128xf32>
    %125 = vector.extract_strided_slice %122 {offsets = [0, 0], sizes = [64, 128], strides = [1, 1]} : vector<64x256xf32> to vector<64x128xf32>
    %126 = arith.addf %124, %125 : vector<64x128xf32>
    %c2_79 = arith.constant 2 : index
    %c0_80 = arith.constant 0 : index
    %c0_81 = arith.constant 0 : index
    %127 = vector.load %arg11[%c2_79, %c0_80, %c0_81] : memref<3x128x256xbf16, #tpu.memory_space<vmem>>, vector<1x128x128xbf16>
    %128 = vector.shape_cast %127 : vector<1x128x128xbf16> to vector<128x128xbf16>
    %cst_82 = arith.constant dense<0.000000e+00> : vector<64x128xf32>
    %129 = tpu.matmul %115, %128, %cst_82 {dimension_numbers = #tpu.dot_dimension_numbers<[1], [0], [0], [1], [0, 0, 1, 1], [], []>} : vector<64x128xbf16>, vector<128x128xbf16>, vector<64x128xf32> -> vector<64x128xf32>
    %130 = arith.addf %126, %129 : vector<64x128xf32>
    %131 = vector.extract_strided_slice %119 {offsets = [0, 128], sizes = [64, 128], strides = [1, 1]} : vector<64x256xf32> to vector<64x128xf32>
    %132 = arith.addf %112, %131 : vector<64x128xf32>
    %133 = vector.extract_strided_slice %122 {offsets = [0, 128], sizes = [64, 128], strides = [1, 1]} : vector<64x256xf32> to vector<64x128xf32>
    %134 = arith.addf %132, %133 : vector<64x128xf32>
    %c2_83 = arith.constant 2 : index
    %c0_84 = arith.constant 0 : index
    %c128_85 = arith.constant 128 : index
    %135 = vector.load %arg11[%c2_83, %c0_84, %c128_85] : memref<3x128x256xbf16, #tpu.memory_space<vmem>>, vector<1x128x128xbf16>
    %136 = vector.shape_cast %135 : vector<1x128x128xbf16> to vector<128x128xbf16>
    %cst_86 = arith.constant dense<0.000000e+00> : vector<64x128xf32>
    %137 = tpu.matmul %116, %136, %cst_86 {dimension_numbers = #tpu.dot_dimension_numbers<[1], [0], [0], [1], [0, 0, 1, 1], [], []>} : vector<64x128xbf16>, vector<128x128xbf16>, vector<64x128xf32> -> vector<64x128xf32>
    %138 = arith.addf %134, %137 : vector<64x128xf32>
    %c0_87 = arith.constant 0 : index
    %c0_88 = arith.constant 0 : index
    %139 = vector.load %arg12[%c0_87, %c0_88] : memref<1x128xf32, #tpu.memory_space<vmem>>, vector<1x128xf32>
    %140 = vector.broadcast %139 : vector<1x128xf32> to vector<64x128xf32>
    %141 = arith.addf %130, %140 : vector<64x128xf32>
    %cst_89 = arith.constant 0.000000e+00 : f32
    %142 = vector.broadcast %cst_89 : f32 to vector<64x128xf32>
    %143 = arith.maximumf %141, %142 : vector<64x128xf32>
    %144 = vector.broadcast %139 : vector<1x128xf32> to vector<64x128xf32>
    %145 = arith.addf %138, %144 : vector<64x128xf32>
    %cst_90 = arith.constant 0.000000e+00 : f32
    %146 = vector.broadcast %cst_90 : f32 to vector<64x128xf32>
    %147 = arith.maximumf %145, %146 : vector<64x128xf32>
    %148 = vector.shape_cast %143 : vector<64x128xf32> to vector<8x8x128xf32>
    %c0_91 = arith.constant 0 : index
    %c0_92 = arith.constant 0 : index
    %c0_93 = arith.constant 0 : index
    %c0_94 = arith.constant 0 : index
    %149 = vector.load %arg13[%c0_91, %c0_92, %c0_93, %c0_94] : memref<1x8x8x256xf32, #tpu.memory_space<vmem>>, vector<1x8x8x128xf32>
    %150 = vector.shape_cast %149 : vector<1x8x8x128xf32> to vector<8x8x128xf32>
    %151 = vector.shape_cast %148 : vector<8x8x128xf32> to vector<1x8x8x128xf32>
    tpu.vector_store %arg13[%c0_91, %c0_92, %c0_93, %c0_94], %151 {strides = array<i32>} : memref<1x8x8x256xf32, #tpu.memory_space<vmem>>, vector<1x8x8x128xf32>,
    %152 = vector.shape_cast %147 : vector<64x128xf32> to vector<8x8x128xf32>
    %c0_95 = arith.constant 0 : index
    %c0_96 = arith.constant 0 : index
    %c0_97 = arith.constant 0 : index
    %c128_98 = arith.constant 128 : index
    %153 = vector.load %arg13[%c0_95, %c0_96, %c0_97, %c128_98] : memref<1x8x8x256xf32, #tpu.memory_space<vmem>>, vector<1x8x8x128xf32>
    %154 = vector.shape_cast %153 : vector<1x8x8x128xf32> to vector<8x8x128xf32>
    %155 = vector.shape_cast %152 : vector<8x8x128xf32> to vector<1x8x8x128xf32>
    tpu.vector_store %arg13[%c0_95, %c0_96, %c0_97, %c128_98], %155 {strides = array<i32>} : memref<1x8x8x256xf32, #tpu.memory_space<vmem>>, vector<1x8x8x128xf32>,
    return
  }
  func.func @transform_0(%arg0: i32, %arg1: i32) -> (i32, i32, i32, i32) {
    %c0_i32 = arith.constant 0 : i32
    %c0_i32_0 = arith.constant 0 : i32
    %c0_i32_1 = arith.constant 0 : i32
    return %arg0, %arg1, %c0_i32, %c0_i32_0 : i32, i32, i32, i32
  }
  func.func @transform_1(%arg0: i32, %arg1: i32) -> (i32, i32, i32, i32) {
    %c4_i32 = arith.constant 4 : i32
    %0 = arith.muli %arg1, %c4_i32 : i32
    %c1_i32 = arith.constant 1 : i32
    %1 = arith.subi %0, %c1_i32 : i32
    %c0_i32 = arith.constant 0 : i32
    %2 = arith.maxsi %1, %c0_i32 : i32
    %c0_i32_0 = arith.constant 0 : i32
    %c0_i32_1 = arith.constant 0 : i32
    %c0_i32_2 = arith.constant 0 : i32
    return %arg0, %2, %c0_i32_0, %c0_i32_1 : i32, i32, i32, i32
  }
  func.func @transform_2(%arg0: i32, %arg1: i32) -> (i32, i32, i32, i32) {
    %c1_i32 = arith.constant 1 : i32
    %0 = arith.addi %arg1, %c1_i32 : i32
    %c4_i32 = arith.constant 4 : i32
    %1 = arith.muli %0, %c4_i32 : i32
    %c7_i32 = arith.constant 7 : i32
    %2 = arith.minsi %1, %c7_i32 : i32
    %c0_i32 = arith.constant 0 : i32
    %c0_i32_0 = arith.constant 0 : i32
    %c0_i32_1 = arith.constant 0 : i32
    return %arg0, %2, %c0_i32, %c0_i32_0 : i32, i32, i32, i32
  }
  func.func @transform_3(%arg0: i32, %arg1: i32) -> (i32, i32, i32, i32) {
    %c0_i32 = arith.constant 0 : i32
    %c0_i32_0 = arith.constant 0 : i32
    %c0_i32_1 = arith.constant 0 : i32
    return %arg0, %arg1, %c0_i32, %c0_i32_0 : i32, i32, i32, i32
  }
  func.func @transform_4(%arg0: i32, %arg1: i32) -> (i32, i32, i32, i32) {
    %c8_i32 = arith.constant 8 : i32
    %0 = arith.muli %arg1, %c8_i32 : i32
    %c1_i32 = arith.constant 1 : i32
    %1 = arith.subi %0, %c1_i32 : i32
    %c0_i32 = arith.constant 0 : i32
    %2 = arith.maxsi %1, %c0_i32 : i32
    %c0_i32_0 = arith.constant 0 : i32
    %c0_i32_1 = arith.constant 0 : i32
    %c0_i32_2 = arith.constant 0 : i32
    return %arg0, %2, %c0_i32_0, %c0_i32_1 : i32, i32, i32, i32
  }
  func.func @transform_5(%arg0: i32, %arg1: i32) -> (i32, i32, i32, i32) {
    %c1_i32 = arith.constant 1 : i32
    %0 = arith.addi %arg1, %c1_i32 : i32
    %c8_i32 = arith.constant 8 : i32
    %1 = arith.muli %0, %c8_i32 : i32
    %c15_i32 = arith.constant 15 : i32
    %2 = arith.minsi %1, %c15_i32 : i32
    %c0_i32 = arith.constant 0 : i32
    %c0_i32_0 = arith.constant 0 : i32
    %c0_i32_1 = arith.constant 0 : i32
    return %arg0, %2, %c0_i32, %c0_i32_0 : i32, i32, i32, i32
  }
  func.func @transform_6(%arg0: i32, %arg1: i32) -> (i32, i32) {
    %c0_i32 = arith.constant 0 : i32
    %c0_i32_0 = arith.constant 0 : i32
    %c0_i32_1 = arith.constant 0 : i32
    return %c0_i32, %c0_i32_0 : i32, i32
  }
  func.func @transform_7(%arg0: i32, %arg1: i32) -> (i32, i32) {
    %c0_i32 = arith.constant 0 : i32
    %c0_i32_0 = arith.constant 0 : i32
    %c0_i32_1 = arith.constant 0 : i32
    return %c0_i32, %c0_i32_0 : i32, i32
  }
  func.func @transform_8(%arg0: i32, %arg1: i32) -> (i32, i32, i32) {
    %c0_i32 = arith.constant 0 : i32
    %c0_i32_0 = arith.constant 0 : i32
    %c0_i32_1 = arith.constant 0 : i32
    %c0_i32_2 = arith.constant 0 : i32
    return %c0_i32, %c0_i32_0, %c0_i32_1 : i32, i32, i32
  }
  func.func @transform_9(%arg0: i32, %arg1: i32) -> (i32, i32, i32) {
    %c0_i32 = arith.constant 0 : i32
    %c0_i32_0 = arith.constant 0 : i32
    %c0_i32_1 = arith.constant 0 : i32
    %c0_i32_2 = arith.constant 0 : i32
    return %c0_i32, %c0_i32_0, %c0_i32_1 : i32, i32, i32
  }
  func.func @transform_10(%arg0: i32, %arg1: i32) -> (i32, i32) {
    %c0_i32 = arith.constant 0 : i32
    %c0_i32_0 = arith.constant 0 : i32
    %c0_i32_1 = arith.constant 0 : i32
    return %c0_i32, %c0_i32_0 : i32, i32
  }
  func.func @transform_11(%arg0: i32, %arg1: i32) -> (i32, i32, i32, i32) {
    %c0_i32 = arith.constant 0 : i32
    %c0_i32_0 = arith.constant 0 : i32
    %c0_i32_1 = arith.constant 0 : i32
    return %arg0, %arg1, %c0_i32, %c0_i32_0 : i32, i32, i32, i32
  }
}

</mosaic_0001>

<bundles_post_ra>
// kernel: tpu_custom_call.1
= control target key start
LH: loop header
LB: loop body
LE: loop exit
PB: predicated region body
PF: predicated region fallthrough
CT: control target
= control target key end

     0   :  { %s6725_s0 = inlined_call_operand.hbm [shape: bf16[2,8,8,128], index: 0, kind: input, shape index: {}]   ;;  %s6726_s1 = inlined_call_operand.hbm [shape: bf16[2,8,8,128], index: 1, kind: input, shape index: {}]   ;;  %s6727_s2 = inlined_call_operand.hbm [shape: bf16[2,8,8,128], index: 2, kind: input, shape index: {}]   ;;  %s6728_s3 = inlined_call_operand.hbm [shape: bf16[2,16,8,256], index: 3, kind: input, shape index: {}]   ;;  %s6729_s4 = inlined_call_operand.hbm [shape: bf16[2,16,8,256], index: 4, kind: input, shape index: {}]   ;;  %s6730_s5 = inlined_call_operand.hbm [shape: bf16[2,16,8,256], index: 5, kind: input, shape index: {}]   ;;  %s6731_s6 = inlined_call_operand.hbm [shape: bf16[128,512], index: 6, kind: input, shape index: {}]   ;;  %s6732_s7 = inlined_call_operand.vmem [shape: f32[1,512], index: 7, kind: input, shape index: {}]   ;;  %s6733_s8 = inlined_call_operand.hbm [shape: bf16[3,128,512], index: 8, kind: input, shape index: {}]   ;;  %s6734_s9 = inlined_call_operand.hbm [shape: bf16[3,128,256], index: 9, kind: input, shape index: {}]   ;;  %s6735_s10 = inlined_call_operand.vmem [shape: f32[1,128], index: 10, kind: input, shape index: {}]   ;;  %s6736_s11 = inlined_call_operand.hbm [shape: f32[2,16,8,256], index: 11, kind: output, shape index: {}]  }
   0x1   :  { %6786 = sst [smem:[#allocation56_spill]] %s6725_s0 }
   0x2   :  { %6787 = sst [smem:[#allocation57_spill]] %s6726_s1 }
   0x3   :  { %6788 = sst [smem:[#allocation58_spill]] %s6727_s2 }
   0x4   :  { %6789 = sst [smem:[#allocation59_spill]] %s6728_s3 }
   0x5   :  { %6790 = sst [smem:[#allocation60_spill]] %s6729_s4 }
   0x6   :  { %6791 = sst [smem:[#allocation61_spill]] %s6730_s5 }
   0x7   :  { %6792 = sst [smem:[#allocation62_spill]] %s6731_s6 }
   0x8   :  { %6793 = sst [smem:[#allocation63_spill]] %s6732_s7 }
   0x9   :  { %6794 = sst [smem:[#allocation64_spill]] %s6733_s8 }
   0xa   :  { %6795 = sst [smem:[#allocation65_spill]] %s6734_s9 }
   0xb   :  { %6796 = sst [smem:[#allocation66_spill]] %s6735_s10 }
   0xc   :  { %6797 = sst [smem:[#allocation67_spill]] %s6736_s11 }
   0xd   :  { %16 = vsyncpa [#allocation4], 0 }
   0xe   :  { %18 = vsyncpa [#allocation4 + $0x1], 0 }
   0xf   :  { %19 = vsyncpa [#allocation7], 0 }
  0x10   :  { %21 = vsyncpa [#allocation7 + $0x1], 0 }
  0x11   :  { %22 = vsyncpa [#allocation10], 0 }
  0x12   :  { %24 = vsyncpa [#allocation10 + $0x1], 0 }
  0x13   :  { %25 = vsyncpa [#allocation13], 0 }
  0x14   :  { %27 = vsyncpa [#allocation13 + $0x1], 0 }
  0x15   :  { %28 = vsyncpa [#allocation16], 0 }
  0x16   :  { %29 = vsyncpa [#allocation5], 0 }
  0x17   :  { %31 = vsyncpa [#allocation5 + $0x1], 0  ;;  %s5450_s17 = smov 0   ;;  %s5452_s18 = smov 0  }
  0x18   :  { %s5454_s19 = smov 0   ;;  %s5456_s20 = smov 0  }
  0x19   :  { %s5458_s21 = smov 0   ;;  %s5460_s22 = smov 0  }
  0x1a   :  { %s5462_s23 = smov 0   ;;  %s5464_s24 = smov 0  }
  0x1b   :  { %s5466_s25 = smov 0   ;;  %s5468_s26 = smov 0  }
  0x1c   :  { %s5470_s27 = smov 0   ;;  %s5472_s28 = smov 0  }
  0x1d   :  { %s5474_s29 = smov 0   ;;  %s5476_s30 = smov 0  }
  0x1e   :  { %s5478_s12 = smov 0   ;;  %s5480_s13 = smov 0  }
  0x1f   :  { %s5482_s14 = smov 0   ;;  %s5484_s15 = smov 0  }
  0x20   :  { %s5486_s16 = smov 0   ;;  %s5488_s11 = smov 0  }
  0x21 LB: > { %6798 = sst [smem:[#allocation28_spill]] %s5293_s17  ;;  %s5551_s10 = sadd.s32 4294967295, %s5369_s11   ;;  %s5369_s11 = sphi %s5488_s11, %s37_s11   ;;  %s5365_s16 = sphi %s5486_s16, %s6947_s16   ;;  %s5361_s15 = sphi %s5484_s15, %s6945_s15   ;;  %s5357_s14 = sphi %s5482_s14, %s6944_s14   ;;  %s5353_s13 = sphi %s5480_s13, %s6943_s13   ;;  %s5349_s12 = sphi %s5478_s12, %s6942_s12   ;;  %s5345_s30 = sphi %s5476_s30, %s6953_s30   ;;  %s5341_s29 = sphi %s5474_s29, %s6952_s29   ;;  %s5337_s28 = sphi %s5472_s28, %s6951_s28   ;;  %s5333_s27 = sphi %s5470_s27, %s6939_s27   ;;  %s5329_s26 = sphi %s5468_s26, %s6938_s26   ;;  %s5325_s25 = sphi %s5466_s25, %s6950_s25   ;;  %s5321_s24 = sphi %s5464_s24, %s6937_s24   ;;  %s5317_s23 = sphi %s5462_s23, %s6936_s23   ;;  %s5313_s22 = sphi %s5460_s22, %s6949_s22   ;;  %s5309_s21 = sphi %s5458_s21, %s6935_s21   ;;  %s5305_s20 = sphi %s5456_s20, %s6934_s20   ;;  %s5301_s19 = sphi %s5454_s19, %s6946_s19   ;;  %s5297_s18 = sphi %s5452_s18, %s6933_s18   ;;  %s5293_s17 = sphi %s5450_s17, %s6932_s17  }
  0x22   : > { %6799 = sst [smem:[#allocation29_spill]] %s5297_s18  ;;  %p3849_p0 = scmp.ge.s32.totalorder %s5369_s11, 1 }
  0x23   : > { %6800 = sst [smem:[#allocation30_spill]] %s5301_s19  ;;  %p6746_p1 = scmp.eq.s32.totalorder %s5551_s10, 0 }
  0x24   : > { %6801 = sst [smem:[#allocation31_spill]] %s5305_s20  ;;  %p387_p2 = scmp.lt.s32.totalorder %s5369_s11, 5 }
  0x25   : > { %6802 = sst [smem:[#allocation32_spill]] %s5309_s21  ;;  %s5372_s17 = smov [#allocation15]  }
  0x26   : > { %6803 = sst [smem:[#allocation33_spill]] %s5313_s22  ;;  %p5556_p3 = pnand %p3849_p0, %p387_p2 }
  0x27   : > { %6804 = sst [smem:[#allocation34_spill]] %s5317_s23  ;;  %s415_s19 = sshll.u32 %s5372_s17, 4  ;;  %s5568_s19 = int_to_ptr.vmem [resolvable:$true] %s415_s19 }
  0x28   : > { %6805 = sst [smem:[#allocation35_spill]] %s5321_s24  ;;  %p4429_p4 = pneg %p5556_p3 }
  0x29   : > { %6806 = sst [smem:[#allocation36_spill]] %s5325_s25  ;;  %s6817_s6 = sld [smem:[#allocation62_spill]] }
  0x2a   : > { %6807 = sst [smem:[#allocation37_spill]] %s5333_s27  ;;  %p5564_p5 = pnand %p4429_p4, %p6746_p1 }
  0x2b   : > { %6808 = sst [smem:[#allocation38_spill]] %s5337_s28 }
  0x2c   : > { %6809 = sst [smem:[#allocation39_spill]] %s5349_s12  ;;  %p5578_p7 = pneg %p5564_p5 }
  0x2d   : > { %6810 = sst [smem:[#allocation40_spill]] %s5353_s13 }
  0x2e   : > { %6811 = sst [smem:[#allocation41_spill]] %s5357_s14  ;;  %s5371_s14 = smov [#allocation14]  }
  0x2f   : > { %6812 = sst [smem:[#allocation42_spill]] %s5361_s15  ;;  %s399_s13 = sshll.u32 %s5371_s14, 4  ;;  %s400_s13 = int_to_ptr.vmem [resolvable:$true] %s399_s13 }
  0x30   : > { %6813 = sst [smem:[#allocation43_spill]] %s5365_s16  ;;  %s4883_s20 = scalar_lea.hbm %s6817_s6, 4096 }
  0x31   : > { %s6814_s7 = scalar_select %p5556_p3, 1, 0 }
  0x32   : > { %s6816_s5 = scalar_select %p5564_p5, 1, 0 }
  0x33   : > { %6815 = sst [smem:[#allocation44_spill]] %s6814_s7  ;;  %p4884_p6 = scmp.ne.s32.totalorder %s6817_s6, %s4883_s20 }
  0x34   : > { %p4890_p10 = scmp.lt.u32.totalorder %s4883_s20, %s6817_s6 }
  0x35   : > { %p4886_p8 = pnand %p5578_p7, %p4884_p6 }
  0x37   : > { %p4887_p9 = pneg %p4886_p8 }
  0x39   : > { %p4892_p11 = pnand %p4890_p10, %p4887_p9 }
  0x3b   : > { %4895 = shalt.err (!%p4892_p11)
}
  0x3c   : > { %s4896_s4 = scalar_lea.vmem %s400_s13, 4096  ;;  %p4904_p2 = scmp.lt.s32.totalorder %s400_s13, %s400_s13 }
  0x3d   : > { %p4897_p12 = scmp.ne.s32.totalorder %s400_s13, %s4896_s4  ;;  %p4905_p4 = scmp.lt.s32.totalorder %s4896_s4, %s4896_s4 }
  0x3f   : > { %p4899_p13 = pnand %p4897_p12, %p5578_p7  ;;  %p4906_p1 = por %p4905_p4, %p4904_p2 }
  0x41   : > { %p4900_p0 = pneg %p4899_p13 }
  0x43   : > { %p4907_p3 = pnand %p4906_p1, %p4900_p0 }
  0x45   : > { %4910 = shalt.err (!%p4907_p3)
}
  0x46   : > { %s5373_s18 = smov 256   ;;  %s5374_s21 = smov 16  }
  0x47   : > { %4432 = dma.hbm_to_vmem [thread:$0]  (!%p5564_p5), %s6817_s6, 4096, %s400_s13, [#allocation13], %s5373_s18, %s5373_s18, %s5374_s21  }
  0x48   : > { %s6819_s8 = sld [smem:[#allocation64_spill]] }
  0x4e   : > { %s4911_s2 = scalar_lea.hbm %s6819_s8, 12288 }
  0x4f   : > { %p4912_p6 = scmp.ne.s32.totalorder %s6819_s8, %s4911_s2  ;;  %p4918_p8 = scmp.lt.u32.totalorder %s4911_s2, %s6819_s8 }
  0x51   : > { %p4914_p1 = pnand %p4912_p6, %p5578_p7 }
  0x53   : > { %p4915_p3 = pneg %p4914_p1 }
  0x55   : > { %p4920_p9 = pnand %p4918_p8, %p4915_p3 }
  0x57   : > { %4923 = shalt.err (!%p4920_p9)
}
  0x58   : > { %s4924_s13 = scalar_lea.vmem %s5568_s19, 12288  ;;  %p4932_p13 = scmp.lt.s32.totalorder %s5568_s19, %s5568_s19 }
  0x59   : > { %p4925_p10 = scmp.ne.s32.totalorder %s5568_s19, %s4924_s13  ;;  %p4933_p0 = scmp.lt.s32.totalorder %s4924_s13, %s4924_s13 }
  0x5b   : > { %p4927_p11 = pnand %p4925_p10, %p5578_p7  ;;  %p4934_p2 = por %p4933_p0, %p4932_p13 }
  0x5d   : > { %p4928_p12 = pneg %p4927_p11 }
  0x5f   : > { %p4935_p4 = pnand %p4934_p2, %p4928_p12 }
  0x61   : > { %4938 = shalt.err (!%p4935_p4)
}
  0x62   : > { %4435 = dma.hbm_to_vmem [thread:$0]  (!%p5564_p5), %s6819_s8, 12288, %s5568_s19, [#allocation16], %s5373_s18, %s5373_s18, %s5374_s21  }
  0x63   : > { %s46_s24 = sadd.s32 1, %s5361_s15  ;;  %s49_s25 = sadd.s32 1, %s5365_s16 }
  0x64   : > { %p47_p6 = scmp.ge.s32.totalorder %s46_s24, 2  ;;  %p6763_p1 = scmp.eq.s32.totalorder %s5369_s11, 0 }
  0x65   : > { %s5621_s7 = sshll.u32 %s5361_s15, 2  ;;  %s94_s20 = sadd.s32 1, %s5337_s28 }
  0x66   : > { %s6955_s24 = smov (%p47_p6, %s46_s24), 0  ;;  %s6957_s25 = smov (!%p47_p6, %s49_s25), %s5365_s16 }
  0x67   : > { %6820 = sst [smem:[#allocation45_spill]] %s6955_s24  ;;  %s54_s22 = ssub.s32 %s5361_s15, %s6955_s24 }
  0x68   : > { %s3838_s17 = sadd.s32 4294967295, %s5621_s7  ;;  %p51_p3 = scmp.ge.s32.totalorder %s6957_s25, 2 }
  0x69   : > { %p83_p8 = scmp.gt.s32.totalorder %s3838_s17, 0  ;;  %s3839_s19 = sshll.u32 %s6955_s24, 2 }
  0x6a   : > { %p101_p9 = scmp.ne.s32.totalorder %s5337_s28, %s5333_s27  ;;  %s6959_s25 = smov (%p51_p3, %s6957_s25), 0 }
  0x6b   : > { %6821 = sst [smem:[#allocation46_spill]] %s6959_s25  ;;  %s6961_s17 = smov (!%p83_p8, %s3838_s17), 0 }
  0x6c   : > { %s5637_s18 = ssub.s32 %s5365_s16, %s6959_s25  ;;  %s3840_s21 = sadd.s32 4294967295, %s3839_s19 }
  0x6d   : > { %6822 = sst [smem:[#allocation47_spill]] %s5637_s18  ;;  %s5640_s4 = sor.u32 %s54_s22, %s5637_s18 }
  0x6e   : > { %p87_p10 = scmp.gt.s32.totalorder %s3840_s21, 0  ;;  %p5645_p12 = por %p101_p9, %p6763_p1 }
  0x6f   : > { %p107_p13 = scmp.ne.s32.totalorder %s5333_s27, %s5329_s26  ;;  %s5651_s2 = sadd.s32 4, %s3839_s19 }
  0x70   : > { %s6963_s21 = smov (!%p87_p10, %s3840_s21), 0  ;;  %6824 = sst [smem:[#allocation48_spill]] %s5651_s2 }
  0x71   : > { %s90_s23 = ssub.s32 %s6961_s17, %s6963_s21  ;;  %p6825_p2 = scmp.eq.s32.totalorder %s5551_s10, 0 }
  0x72   : > { %s91_s22 = sor.u32 %s90_s23, %s5637_s18  ;;  %p6762_p3 = scmp.lt.s32.totalorder %s5369_s11, 4 }
  0x73   : > { %p5657_p4 = por %p107_p13, %p6825_p2  ;;  %p92_p6 = scmp.eq.s32.totalorder %s91_s22, 0 }
  0x74   : > { %s5663_s8 = sshll.u32 %s5365_s16, 3  ;;  %s5666_s26 = sand.u32 1, %s5369_s11  }
  0x75   : > { %s6826_s6 = scalar_select %p5657_p4, 1, 0 }
  0x76   : > { %s5669_s19 = scalar_select %p92_p6, %s5337_s28, %s94_s20  }
  0x77   : > { %6827 = sst [smem:[#allocation49_spill]] %s6826_s6  ;;  %s470_s25 = sand.u32 1, %s5337_s28  }
  0x78   : > { %6828 = sst [smem:[#allocation50_spill]] %s5669_s19  ;;  %s481_s27 = sadd.s32 %s5663_s8, %s6961_s17 }
  0x79   : > { %s3858_s23 = sshll.u32 %s470_s25, 2  ;;  %s3862_s24 = sshll.u32 %s481_s27, 6 }
  0x7a   : > { %s6829_s1 = sld [smem:[#allocation57_spill]]  ;;  %s472_s22 = scalar_lea.vmem [#allocation6], %s3858_s23 }
  0x7b   : > { %s485_s0 = sshll.u32 %s472_s22, 4  ;;  %p5684_p8 = pnand %p6762_p3, %p5645_p12  ;;  %s5688_s0 = int_to_ptr.vmem [resolvable:$true] %s485_s0 }
  0x7c   : > { %s6766_s27 = scalar_lea.sflag [#allocation7], %s5666_s26 }
  0x7d   : > { %p4941_p10 = pneg %p5684_p8 }
  0x80   : > { %s5678_s6 = scalar_lea.hbm %s6829_s1, %s3862_s24  ;;  %s4944_s18 = scalar_lea.hbm %s6829_s1, 1024 }
  0x81   : > { %s4939_s25 = scalar_lea.hbm %s5678_s6, 64  ;;  %p4945_p12 = scmp.lt.u32.totalorder %s5678_s6, %s6829_s1 }
  0x82   : > { %p4940_p9 = scmp.ne.s32.totalorder %s5678_s6, %s4939_s25  ;;  %p4946_p6 = scmp.lt.u32.totalorder %s4944_s18, %s4939_s25 }
  0x83   : > { %p4948_p3 = scmp.lt.u32.totalorder %s4939_s25, %s5678_s6 }
  0x84   : > { %p4942_p13 = pnand %p4941_p10, %p4940_p9  ;;  %p4947_p0 = por %p4946_p6, %p4945_p12 }
  0x86   : > { %p4943_p2 = pneg %p4942_p13  ;;  %p4949_p1 = por %p4948_p3, %p4947_p0 }
  0x88   : > { %p4950_p11 = pnand %p4949_p1, %p4943_p2 }
  0x8a   : > { %4953 = shalt.err (!%p4950_p11)
}
  0x8b   : > { %s4954_s23 = scalar_lea.vmem %s5688_s0, 64  ;;  %s5375_s22 = smov [#allocation6]  }
  0x8c   : > { %p4955_p9 = scmp.ne.s32.totalorder %s5688_s0, %s4954_s23  ;;  %s4959_s24 = sshll.u32 %s5375_s22, 4  ;;  %s4960_s24 = int_to_ptr.vmem [resolvable:$false] %s4959_s24 }
  0x8d   : > { %s4961_s17 = scalar_lea.vmem %s4960_s24, 128  ;;  %p4962_p5 = scmp.lt.s32.totalorder %s5688_s0, %s4960_s24 }
  0x8e   : > { %p4957_p13 = pnand %p4955_p9, %p4941_p10  ;;  %p4963_p12 = scmp.lt.s32.totalorder %s4961_s17, %s4954_s23 }
  0x90   : > { %p4958_p4 = pneg %p4957_p13  ;;  %p4964_p6 = por %p4963_p12, %p4962_p5 }
  0x92   : > { %p4965_p0 = pnand %p4964_p6, %p4958_p4 }
  0x94   : > { %4968 = shalt.err (!%p4965_p0)
}
  0x95   : > { %4445 = dma.hbm_to_vmem [thread:$0]  (!%p5684_p8), %s5678_s6, 64, %s5688_s0, %s6766_s27  }
  0x96   : > { %s3836_s20 = sadd.s32 4294967294, %s5369_s11   ;;  %s58_s25 = sadd.s32 1, %s5349_s12 }
  0x97   : > { %p65_p5 = scmp.ne.s32.totalorder %s5349_s12, %s5345_s30  ;;  %p6831_p1 = scmp.eq.s32.totalorder %s5640_s4, 0 }
  0x98   : > { %p6833_p11 = scmp.eq.s32.totalorder %s5369_s11, 0  ;;  %p71_p3 = scmp.ne.s32.totalorder %s5345_s30, %s5341_s29 }
  0x99   : > { %s5725_s18 = scalar_select %p6831_p1, %s5349_s12, %s58_s25  }
  0x9a   : > { %p67_p4 = por %p6833_p11, %p65_p5  ;;  %p374_p10 = scmp.eq.s32.totalorder %s5551_s10, 3 }
  0x9b   : > { %6832 = sst [smem:[#allocation51_spill]] %s5725_s18  ;;  %p380_p2 = scmp.eq.s32.totalorder %s3836_s20, 3 }
  0x9c   : > { %p6834_p9 = scmp.eq.s32.totalorder %s5551_s10, 0  ;;  %p5738_p12 = por %p374_p10, %p65_p5 }
  0x9d   : > { %p5742_p8 = por %p380_p2, %p71_p3  ;;  %s5747_s4 = sand.u32 1, %s5349_s12  }
  0x9e   : > { %p5734_p13 = por %p6834_p9, %p71_p3  ;;  %p6839_p6 = scmp.lt.s32.totalorder %s5369_s11, 4 }
  0x9f   : > { %s6836_s0 = scalar_select %p5738_p12, 1, 0 }
  0xa0   : > { %s6835_s13 = scalar_select %p5734_p13, 1, 0 }
  0xa1   : > { %s6837_s6 = scalar_select %p5742_p8, 1, 0 }
  0xa2   : > { %p5751_p0 = pnand %p6839_p6, %p67_p4  ;;  %s3867_s23 = sshll.u32 %s5747_s4, 6 }
  0xa3   : > { %6838 = sst [smem:[#allocation52_spill]] %s6837_s6  ;;  %s4157_s22 = sshll.u32 %s5361_s15, 4 }
  0xa4   : > { %s5758_s24 = sshll.u32 %s5365_s16, 5  ;;  %s520_s20 = scalar_lea.vmem [#allocation9], %s3867_s23 }
  0xa5   : > { %s527_s17 = sadd.s32 %s4157_s22, %s5758_s24  ;;  %s530_s25 = sshll.u32 %s520_s20, 4  ;;  %s5761_s25 = int_to_ptr.vmem [resolvable:$true] %s530_s25 }
  0xa6   : > { %s3871_s27 = sshll.u32 %s527_s17, 6  ;;  %s6841_s3 = sld [smem:[#allocation59_spill]] }
  0xa7   : > { %s6776_s12 = scalar_lea.sflag [#allocation10], %s5666_s26  ;;  %p6773_p1 = pneg %p5751_p0 }
  0xac   : > { %s5766_s18 = scalar_lea.hbm %s6841_s3, %s3871_s27  ;;  %s4974_s17 = scalar_lea.hbm %s6841_s3, 4096 }
  0xad   : > { %s4969_s19 = scalar_lea.hbm %s5766_s18, 1024  ;;  %p4975_p3 = scmp.lt.u32.totalorder %s5766_s18, %s6841_s3 }
  0xae   : > { %p4970_p5 = scmp.ne.s32.totalorder %s5766_s18, %s4969_s19  ;;  %p4976_p10 = scmp.lt.u32.totalorder %s4974_s17, %s4969_s19 }
  0xaf   : > { %p4978_p9 = scmp.lt.u32.totalorder %s4969_s19, %s5766_s18 }
  0xb0   : > { %p4972_p11 = pnand %p6773_p1, %p4970_p5  ;;  %p4977_p2 = por %p4976_p10, %p4975_p3 }
  0xb2   : > { %p4973_p4 = pneg %p4972_p11  ;;  %p4979_p6 = por %p4978_p9, %p4977_p2 }
  0xb4   : > { %p4980_p8 = pnand %p4979_p6, %p4973_p4 }
  0xb6   : > { %4983 = shalt.err (!%p4980_p8)
}
  0xb7   : > { %s4984_s27 = scalar_lea.vmem %s5761_s25, 1024  ;;  %s5376_s20 = smov [#allocation9]  }
  0xb8   : > { %p4985_p5 = scmp.ne.s32.totalorder %s5761_s25, %s4984_s27  ;;  %s4989_s23 = sshll.u32 %s5376_s20, 4  ;;  %s4990_s23 = int_to_ptr.vmem [resolvable:$false] %s4989_s23 }
  0xb9   : > { %s4991_s22 = scalar_lea.vmem %s4990_s23, 2048  ;;  %p4992_p13 = scmp.lt.s32.totalorder %s5761_s25, %s4990_s23 }
  0xba   : > { %p4987_p11 = pnand %p4985_p5, %p6773_p1  ;;  %p4993_p3 = scmp.lt.s32.totalorder %s4991_s22, %s4984_s27 }
  0xbc   : > { %p4988_p12 = pneg %p4987_p11  ;;  %p4994_p10 = por %p4993_p3, %p4992_p13 }
  0xbe   : > { %p4995_p2 = pnand %p4994_p10, %p4988_p12 }
  0xc0   : > { %4998 = shalt.err (!%p4995_p2)
}
  0xc1   : > { %s5377_s19 = smov 128   ;;  %s5378_s17 = smov 8  }
  0xc2   : > { %4451 = dma.hbm_to_vmem [thread:$0]  (!%p5751_p0), %s5766_s18, 1024, %s5761_s25, %s6776_s12, %s5377_s19, %s5377_s19, %s5378_s17  }
  0xc3   : > { %s5379_s1 = smov [#allocation17]   ;;  %s3854_s20 = sshll.u32 %s5747_s4, 4 }
  0xc4   : > { %s428_s21 = sshll.u32 %s5379_s1, 4  ;;  %s6842_s9 = sld [smem:[#allocation65_spill]]  ;;  %s429_s21 = int_to_ptr.vmem [resolvable:$true] %s428_s21 }
  0xca   : > { %s4999_s22 = scalar_lea.hbm %s6842_s9, 6144 }
  0xcb   : > { %p5000_p13 = scmp.ne.s32.totalorder %s6842_s9, %s4999_s22  ;;  %p5006_p4 = scmp.lt.u32.totalorder %s4999_s22, %s6842_s9 }
  0xcd   : > { %p5002_p12 = pnand %p5000_p13, %p5578_p7 }
  0xcf   : > { %p5003_p8 = pneg %p5002_p12 }
  0xd1   : > { %p5008_p9 = pnand %p5006_p4, %p5003_p8 }
  0xd3   : > { %5011 = shalt.err (!%p5008_p9)
}
  0xd4   : > { %s5012_s18 = scalar_lea.vmem %s429_s21, 6144  ;;  %p5020_p3 = scmp.lt.s32.totalorder %s429_s21, %s429_s21 }
  0xd5   : > { %p5013_p6 = scmp.ne.s32.totalorder %s429_s21, %s5012_s18  ;;  %p5021_p10 = scmp.lt.s32.totalorder %s5012_s18, %s5012_s18 }
  0xd7   : > { %p5015_p5 = pnand %p5013_p6, %p5578_p7  ;;  %p5022_p2 = por %p5021_p10, %p5020_p3 }
  0xd9   : > { %p5016_p11 = pneg %p5015_p5 }
  0xdb   : > { %p5023_p1 = pnand %p5022_p2, %p5016_p11 }
  0xdd   : > { %5026 = shalt.err (!%p5023_p1)
}
  0xde   : > { %p6843_p13 = scmp.ne.s32.totalorder %s6816_s5, 0  ;;  %s6844_s28 = sadd.s32 %s5663_s8, %s5621_s7 }
  0xdf   : > { %s3857_s6 = sshll.u32 %s6844_s28, 6  ;;  %s6845_s1 = sld [smem:[#allocation56_spill]] }
  0xe0   : > { %4438 = dma.hbm_to_vmem [thread:$0]  (!%p6843_p13), %s6842_s9, 6144, %s429_s21, [#allocation16], %s5377_s19, %s5377_s19, %s5378_s17  }
  0xe1   : > { %s449_s5 = scalar_lea.vmem [#allocation3], %s3854_s20  ;;  %s446_s22 = scalar_lea.sflag [#allocation4], %s5747_s4 }
  0xe2   : > { %s458_s27 = sshll.u32 %s449_s5, 4  ;;  %p6846_p1 = pneg %p5751_p0  ;;  %s5823_s27 = int_to_ptr.vmem [resolvable:$true] %s458_s27 }
  0xe5   : > { %s5821_s23 = scalar_lea.hbm %s6845_s1, %s3857_s6  ;;  %s5032_s21 = scalar_lea.hbm %s6845_s1, 1024 }
  0xe6   : > { %s5027_s18 = scalar_lea.hbm %s5821_s23, 256  ;;  %p5033_p4 = scmp.lt.u32.totalorder %s5821_s23, %s6845_s1 }
  0xe7   : > { %p5028_p7 = scmp.ne.s32.totalorder %s5821_s23, %s5027_s18  ;;  %p5034_p9 = scmp.lt.u32.totalorder %s5032_s21, %s5027_s18 }
  0xe8   : > { %p5036_p5 = scmp.lt.u32.totalorder %s5027_s18, %s5821_s23 }
  0xe9   : > { %p5030_p12 = pnand %p5028_p7, %p6846_p1  ;;  %p5035_p6 = por %p5034_p9, %p5033_p4 }
  0xeb   : > { %p5031_p8 = pneg %p5030_p12  ;;  %p5037_p11 = por %p5036_p5, %p5035_p6 }
  0xed   : > { %p5038_p3 = pnand %p5037_p11, %p5031_p8 }
  0xef   : > { %5041 = shalt.err (!%p5038_p3)
}
  0xf0   : > { %s5042_s20 = scalar_lea.vmem %s5823_s27, 256  ;;  %p6847_p2 = pmov %p6846_p1 }
  0xf1   : > { %p5043_p10 = scmp.ne.s32.totalorder %s5823_s27, %s5042_s20  ;;  %s5380_s28 = smov [#allocation3]  }
  0xf2   : > { %s5047_s6 = sshll.u32 %s5380_s28, 4  ;;  %s5048_s6 = int_to_ptr.vmem [resolvable:$false] %s5047_s6 }
  0xf3   : > { %p5045_p13 = pnand %p5043_p10, %p6847_p2  ;;  %s5049_s14 = scalar_lea.vmem %s5048_s6, 512 }
  0xf4   : > { %p5050_p1 = scmp.lt.s32.totalorder %s5823_s27, %s5048_s6  ;;  %p5051_p12 = scmp.lt.s32.totalorder %s5049_s14, %s5042_s20 }
  0xf5   : > { %p5046_p7 = pneg %p5045_p13 }
  0xf6   : > { %p5052_p4 = por %p5051_p12, %p5050_p1 }
  0xf8   : > { %p5053_p9 = pnand %p5052_p4, %p5046_p7 }
  0xfa   : > { %5056 = shalt.err (!%p5053_p9)
}
  0xfb   : > { %s5381_s25 = smov 64   ;;  %s6848_s5 = sld [smem:[#allocation36_spill]] }
  0xfc   : > { %s6849_s18 = sld [smem:[#allocation48_spill]]  ;;  %s6850_s19 = sld [smem:[#allocation35_spill]] }
  0xfd   : > { %s6851_s17 = sld [smem:[#allocation34_spill]]  ;;  %s6852_s21 = sld [smem:[#allocation47_spill]] }
  0xfe   : > { %s5382_s3 = smov 4   ;;  %s4148_s16 = sadd.s32 4, %s5621_s7 }
  0xff   : > { %4442 = dma.hbm_to_vmem [thread:$0]  (!%p5751_p0), %s5821_s23, 256, %s5823_s27, %s446_s22, %s5381_s25, %s5381_s25, %s5382_s3  }
 0x100   : > { %p119_p8 = scmp.lt.s32.totalorder %s4148_s16, 7  ;;  %p6854_p3 = scmp.eq.s32.totalorder %s5369_s11, 0 }
 0x101   : > { %s130_s20 = sadd.s32 1, %s6848_s5  ;;  %s494_s6 = sand.u32 1, %s6848_s5  }
 0x102   : > { %p6853_p6 = scmp.lt.s32.totalorder %s6849_s18, 7  ;;  %s6967_s16 = smov (!%p119_p8, %s4148_s16), 7 }
 0x103   : > { %p137_p5 = scmp.ne.s32.totalorder %s6848_s5, %s6850_s19  ;;  %p143_p11 = scmp.ne.s32.totalorder %s6850_s19, %s6851_s17 }
 0x104   : > { %s6965_s18 = smov (!%p6853_p6, %s6849_s18), 7  ;;  %p6855_p13 = scmp.eq.s32.totalorder %s5551_s10, 0 }
 0x105   : > { %s126_s28 = ssub.s32 %s6967_s16, %s6965_s18  ;;  %p139_p10 = por %p137_p5, %p6854_p3 }
 0x106   : > { %s127_s14 = sor.u32 %s126_s28, %s6852_s21  ;;  %p5866_p7 = por %p143_p11, %p6855_p13 }
 0x107   : > { %p128_p2 = scmp.eq.s32.totalorder %s127_s14, 0  ;;  %s3863_s7 = sshll.u32 %s494_s6, 2 }
 0x108   : > { %s505_s2 = sadd.s32 %s5663_s8, %s6967_s16  ;;  %s6857_s25 = sld [smem:[#allocation58_spill]] }
 0x109   : > { %s6969_s5 = smov (!%p128_p2, %s6848_s5), %s130_s20  ;;  %s3866_s23 = sshll.u32 %s505_s2, 6 }
 0x10a   : > { %s496_s18 = scalar_lea.vmem [#allocation8], %s3863_s7  ;;  %p6859_p0 = scmp.lt.s32.totalorder %s5369_s11, 4 }
 0x10b   : > { %s509_s17 = sshll.u32 %s496_s18, 4  ;;  %s5879_s17 = int_to_ptr.vmem [resolvable:$true] %s509_s17 }
 0x10c   : > { %p5883_p1 = pnand %p6859_p0, %p139_p10 }
 0x10e   : > { %s6858_s3 = smov %s6857_s25  ;;  %s5877_s19 = scalar_lea.hbm %s6857_s25, %s3866_s23 }
 0x10f   : > { %s5057_s8 = scalar_lea.hbm %s5877_s19, 64  ;;  %p5059_p4 = pneg %p5883_p1 }
 0x110   : > { %p5058_p12 = scmp.ne.s32.totalorder %s5877_s19, %s5057_s8  ;;  %s5062_s6 = scalar_lea.hbm %s6858_s3, 1024 }
 0x111   : > { %p5063_p6 = scmp.lt.u32.totalorder %s5877_s19, %s6858_s3  ;;  %p5064_p5 = scmp.lt.u32.totalorder %s5062_s6, %s5057_s8 }
 0x112   : > { %p5060_p9 = pnand %p5059_p4, %p5058_p12  ;;  %p5066_p3 = scmp.lt.u32.totalorder %s5057_s8, %s5877_s19 }
 0x113   : > { %p5065_p11 = por %p5064_p5, %p5063_p6 }
 0x114   : > { %p5061_p8 = pneg %p5060_p9 }
 0x115   : > { %p5067_p10 = por %p5066_p3, %p5065_p11 }
 0x117   : > { %p5068_p2 = pnand %p5067_p10, %p5061_p8 }
 0x119   : > { %5071 = shalt.err (!%p5068_p2)
}
 0x11a   : > { %s5072_s2 = scalar_lea.vmem %s5879_s17, 64  ;;  %s5383_s23 = smov [#allocation8]  }
 0x11b   : > { %p5073_p13 = scmp.ne.s32.totalorder %s5879_s17, %s5072_s2  ;;  %s5077_s27 = sshll.u32 %s5383_s23, 4  ;;  %s5078_s27 = int_to_ptr.vmem [resolvable:$false] %s5077_s27 }
 0x11c   : > { %s5079_s22 = scalar_lea.vmem %s5078_s27, 128  ;;  %p5080_p9 = scmp.lt.s32.totalorder %s5879_s17, %s5078_s27 }
 0x11d   : > { %p5075_p0 = pnand %p5073_p13, %p5059_p4  ;;  %p5081_p6 = scmp.lt.s32.totalorder %s5079_s22, %s5072_s2 }
 0x11f   : > { %p5076_p12 = pneg %p5075_p0  ;;  %p5082_p5 = por %p5081_p6, %p5080_p9 }
 0x121   : > { %p5083_p11 = pnand %p5082_p5, %p5076_p12 }
 0x123   : > { %5086 = shalt.err (!%p5083_p11)
}
 0x124   : > { %s6861_s25 = scalar_lea.sflag [#allocation7], %s5666_s26  ;;  %s6862_s18 = sld [smem:[#allocation45_spill]] }
 0x125   : > { %s6863_s8 = sld [smem:[#allocation33_spill]]  ;;  %s6864_s16 = sld [smem:[#allocation32_spill]] }
 0x126   : > { %s6865_s20 = sld [smem:[#allocation31_spill]]  ;;  %s6775_s6 = sshll.u32 %s5361_s15, 3 }
 0x127   : > { %4448 = dma.hbm_to_vmem [thread:$0]  (!%p5883_p1), %s5877_s19, 64, %s5879_s17, %s6861_s25  }
 0x128   : > { %s3844_s28 = sadd.s32 4294967295, %s6775_s6  ;;  %p6866_p1 = scmp.eq.s32.totalorder %s5369_s11, 0 }
 0x129   : > { %p183_p4 = scmp.gt.s32.totalorder %s3844_s28, 0  ;;  %p6867_p0 = scmp.eq.s32.totalorder %s5551_s10, 0 }
 0x12a   : > { %s6774_s14 = sshll.u32 %s6862_s18, 3  ;;  %s6869_s1 = sld [smem:[#allocation60_spill]] }
 0x12b   : > { %s3846_s7 = sadd.s32 4294967295, %s6774_s14  ;;  %s194_s2 = sadd.s32 1, %s6863_s8 }
 0x12c   : > { %p187_p8 = scmp.gt.s32.totalorder %s3846_s7, 0  ;;  %s6971_s28 = smov (!%p183_p4, %s3844_s28), 0 }
 0x12d   : > { %p201_p3 = scmp.ne.s32.totalorder %s6863_s8, %s6864_s16  ;;  %p207_p10 = scmp.ne.s32.totalorder %s6864_s16, %s6865_s20 }
 0x12e   : > { %s6973_s7 = smov (!%p187_p8, %s3846_s7), 0  ;;  %s542_s27 = sand.u32 1, %s6863_s8  }
 0x12f   : > { %s190_s23 = ssub.s32 %s6971_s28, %s6973_s7  ;;  %p203_p2 = por %p201_p3, %p6866_p1 }
 0x130   : > { %s191_s19 = sor.u32 %s190_s23, %s6852_s21  ;;  %p5931_p12 = por %p207_p10, %p6867_p0 }
 0x131   : > { %p192_p13 = scmp.eq.s32.totalorder %s191_s19, 0  ;;  %s3872_s22 = sshll.u32 %s542_s27, 3 }
 0x132   : > { %s6868_s17 = scalar_select %p5931_p12, 1, 0 }
 0x133   : > { %s3875_s25 = sshll.u32 %s6971_s28, 1  ;;  %s6975_s8 = smov (!%p192_p13, %s6863_s8), %s194_s2 }
 0x134   : > { %s554_s14 = sadd.s32 %s3875_s25, %s5758_s24  ;;  %s544_s12 = scalar_lea.vmem [#allocation11], %s3872_s22 }
 0x135   : > { %s3877_s6 = sshll.u32 %s554_s14, 6  ;;  %s558_s16 = sshll.u32 %s544_s12, 4  ;;  %s5944_s16 = int_to_ptr.vmem [resolvable:$true] %s558_s16 }
 0x136   : > { %s5942_s23 = scalar_lea.hbm %s6869_s1, %s3877_s6  ;;  %p6870_p9 = scmp.lt.s32.totalorder %s5369_s11, 4 }
 0x137   : > { %s5087_s14 = scalar_lea.hbm %s5942_s23, 128  ;;  %s5092_s2 = scalar_lea.hbm %s6869_s1, 4096 }
 0x138   : > { %p5948_p6 = pnand %p6870_p9, %p203_p2  ;;  %p5088_p5 = scmp.ne.s32.totalorder %s5942_s23, %s5087_s14 }
 0x139   : > { %p5093_p3 = scmp.lt.u32.totalorder %s5942_s23, %s6869_s1  ;;  %p5094_p10 = scmp.lt.u32.totalorder %s5092_s2, %s5087_s14 }
 0x13a   : > { %p5089_p11 = pneg %p5948_p6  ;;  %p5096_p2 = scmp.lt.u32.totalorder %s5087_s14, %s5942_s23 }
 0x13b   : > { %p5095_p1 = por %p5094_p10, %p5093_p3 }
 0x13c   : > { %p5090_p4 = pnand %p5089_p11, %p5088_p5 }
 0x13d   : > { %p5097_p13 = por %p5096_p2, %p5095_p1 }
 0x13e   : > { %p5091_p8 = pneg %p5090_p4 }
 0x140   : > { %p5098_p0 = pnand %p5097_p13, %p5091_p8 }
 0x142   : > { %5101 = shalt.err (!%p5098_p0)
}
 0x143   : > { %s5102_s22 = scalar_lea.vmem %s5944_s16, 128  ;;  %s5384_s25 = smov [#allocation11]  }
 0x144   : > { %p5103_p9 = scmp.ne.s32.totalorder %s5944_s16, %s5102_s22  ;;  %s5107_s20 = sshll.u32 %s5384_s25, 4  ;;  %s5108_s20 = int_to_ptr.vmem [resolvable:$false] %s5107_s20 }
 0x145   : > { %s5109_s7 = scalar_lea.vmem %s5108_s20, 256  ;;  %p5110_p12 = scmp.lt.s32.totalorder %s5944_s16, %s5108_s20 }
 0x146   : > { %p5105_p5 = pnand %p5103_p9, %p5089_p11  ;;  %p5111_p3 = scmp.lt.s32.totalorder %s5109_s7, %s5102_s22 }
 0x148   : > { %p5106_p4 = pneg %p5105_p5  ;;  %p5112_p10 = por %p5111_p3, %p5110_p12 }
 0x14a   : > { %p5113_p1 = pnand %p5112_p10, %p5106_p4 }
 0x14c   : > { %5116 = shalt.err (!%p5113_p1)
}
 0x14d   : > { %s6872_s14 = scalar_lea.sflag [#allocation10], %s5666_s26  ;;  %s6873_s12 = sld [smem:[#allocation29_spill]] }
 0x14e   : > { %s6874_s6 = sld [smem:[#allocation30_spill]]  ;;  %s6875_s2 = sld [smem:[#allocation28_spill]] }
 0x14f   : > { %4454 = dma.hbm_to_vmem [thread:$0]  (!%p5948_p6), %s5942_s23, 128, %s5944_s16, %s6872_s14  }
 0x150   : > { %s6876_s27 = sshll.u32 %s5361_s15, 3  ;;  %s6877_s22 = sshll.u32 %s6862_s18, 3 }
 0x151   : > { %s4152_s19 = sadd.s32 8, %s6876_s27  ;;  %s4154_s28 = sadd.s32 8, %s6877_s22 }
 0x152   : > { %p219_p12 = scmp.lt.s32.totalorder %s4152_s19, 15  ;;  %p223_p11 = scmp.lt.s32.totalorder %s4154_s28, 15 }
 0x153   : > { %p6878_p13 = scmp.eq.s32.totalorder %s5369_s11, 0  ;;  %p6880_p6 = scmp.eq.s32.totalorder %s5551_s10, 0 }
 0x154   : > { %p237_p8 = scmp.ne.s32.totalorder %s6874_s6, %s6873_s12  ;;  %s6977_s19 = smov (!%p219_p12, %s4152_s19), 15 }
 0x155   : > { %s6979_s28 = smov (!%p223_p11, %s4154_s28), 15  ;;  %s230_s25 = sadd.s32 1, %s6874_s6 }
 0x156   : > { %p243_p2 = scmp.ne.s32.totalorder %s6873_s12, %s6875_s2  ;;  %s226_s20 = ssub.s32 %s6977_s19, %s6979_s28 }
 0x157   : > { %p5990_p0 = por %p237_p8, %p6878_p13  ;;  %s227_s18 = sor.u32 %s226_s20, %s6852_s21 }
 0x158   : > { %p5997_p9 = por %p243_p2, %p6880_p6  ;;  %p228_p5 = scmp.eq.s32.totalorder %s227_s18, 0 }
 0x159   : > { %s567_s23 = sand.u32 1, %s6874_s6   ;;  %s3880_s27 = sshll.u32 %s6977_s19, 1 }
 0x15a   : > { %s6881_s16 = scalar_select %p5997_p9, 1, 0 }
 0x15b   : > { %s3878_s14 = sshll.u32 %s567_s23, 3  ;;  %s6981_s6 = smov (!%p228_p5, %s6874_s6), %s230_s25 }
 0x15c   : > { %s579_s12 = sadd.s32 %s3880_s27, %s5758_s24  ;;  %s569_s22 = scalar_lea.vmem [#allocation12], %s3878_s14 }
 0x15d   : > { %s3882_s2 = sshll.u32 %s579_s12, 6  ;;  %s583_s28 = sshll.u32 %s569_s22, 4  ;;  %s6011_s28 = int_to_ptr.vmem [resolvable:$true] %s583_s28 }
 0x15e   : > { %s6882_s9 = sld [smem:[#allocation61_spill]]  ;;  %p6883_p4 = scmp.lt.s32.totalorder %s5369_s11, 4 }
 0x15f   : > { %s566_s24 = scalar_lea.sflag [#allocation13], %s5666_s26 }
 0x160   : > { %p6017_p3 = pnand %p6883_p4, %p5990_p0 }
 0x162   : > { %p5119_p1 = pneg %p6017_p3 }
 0x164   : > { %s6009_s15 = scalar_lea.hbm %s6882_s9, %s3882_s2  ;;  %s5122_s25 = scalar_lea.hbm %s6882_s9, 4096 }
 0x165   : > { %s5117_s19 = scalar_lea.hbm %s6009_s15, 128  ;;  %p5123_p8 = scmp.lt.u32.totalorder %s6009_s15, %s6882_s9 }
 0x166   : > { %p5118_p10 = scmp.ne.s32.totalorder %s6009_s15, %s5117_s19  ;;  %p5124_p2 = scmp.lt.u32.totalorder %s5122_s25, %s5117_s19 }
 0x167   : > { %p5126_p0 = scmp.lt.u32.totalorder %s5117_s19, %s6009_s15 }
 0x168   : > { %p5120_p12 = pnand %p5119_p1, %p5118_p10  ;;  %p5125_p13 = por %p5124_p2, %p5123_p8 }
 0x16a   : > { %p5121_p11 = pneg %p5120_p12  ;;  %p5127_p6 = por %p5126_p0, %p5125_p13 }
 0x16c   : > { %p5128_p5 = pnand %p5127_p6, %p5121_p11 }
 0x16e   : > { %5131 = shalt.err (!%p5128_p5)
}
 0x16f   : > { %s5132_s26 = scalar_lea.vmem %s6011_s28, 128  ;;  %s5385_s18 = smov [#allocation12]  }
 0x170   : > { %p5133_p4 = scmp.ne.s32.totalorder %s6011_s28, %s5132_s26  ;;  %s5137_s23 = sshll.u32 %s5385_s18, 4  ;;  %s5138_s23 = int_to_ptr.vmem [resolvable:$false] %s5137_s23 }
 0x171   : > { %s5139_s14 = scalar_lea.vmem %s5138_s23, 256  ;;  %p5140_p9 = scmp.lt.s32.totalorder %s6011_s28, %s5138_s23 }
 0x172   : > { %p5135_p10 = pnand %p5133_p4, %p5119_p1  ;;  %p5141_p8 = scmp.lt.s32.totalorder %s5139_s14, %s5132_s26 }
 0x174   : > { %p5136_p12 = pneg %p5135_p10  ;;  %p5142_p2 = por %p5141_p8, %p5140_p9 }
 0x176   : > { %p5143_p13 = pnand %p5142_p2, %p5136_p12 }
 0x178   : > { %5146 = shalt.err (!%p5143_p13)
}
 0x179   : > { %4457 = dma.hbm_to_vmem [thread:$0]  (!%p6017_p3), %s6009_s15, 128, %s6011_s28, %s566_s24  }
 0x17a   : > { %s6885_s27 = sld [smem:[#allocation44_spill]] }
 0x180   : > { %p6886_p11 = scmp.ne.s32.totalorder %s6885_s27, 0 }
 0x182   : > { %592 = sbr.rel (%p6886_p11) target bundleno = 1122 (0x462), region = 64 }
 0x189   : > { %s6050_s12 = sand.u32 1, %s5345_s30   ;;  %p6887_p9 = scmp.ne.s32.totalorder %s6835_s13, 0 }
 0x18a   : > { %s3884_s2 = sshll.u32 %s6050_s12, 4  ;;  %s595_s22 = scalar_lea.sflag [#allocation4], %s6050_s12 }
 0x18b   : > { %s6054_s19 = scalar_lea.vmem [#allocation3], %s3884_s2 }
 0x18c   : > { %5256 = dma.done.wait (%p6887_p9), %s595_s22, 256  }
 0x18d   : > { %5258 = vsyncadd (%p6887_p9), %s595_s22, 4294967040  ;;  %s6888_s15 = sld [smem:[#allocation37_spill]]  ;;  %s6889_s28 = sld [smem:[#allocation49_spill]] }
 0x18e   : > { %s603_s21 = sand.u32 1, %s5551_s10  }
 0x18f   : > { %s604_s3 = scalar_lea.sflag [#allocation7], %s603_s21 }
 0x193   : > { %s605_s24 = sand.u32 1, %s6888_s15   ;;  %p6890_p3 = scmp.ne.s32.totalorder %s6889_s28, 0 }
 0x194   : > { %s6062_s1 = sshll.u32 %s605_s24, 2 }
 0x195   : > { %s607_s25 = scalar_lea.vmem [#allocation6], %s6062_s1 }
 0x196   : > { %5260 = dma.done.wait (%p6890_p3), %s604_s3, 64  }
 0x197   : > { %5262 = vsyncadd (%p6890_p3), %s604_s3, 4294967232  ;;  %s6891_s20 = sld [smem:[#allocation35_spill]] }
 0x19d   : > { %s614_s7 = sand.u32 1, %s6891_s20  }
 0x19e   : > { %s6070_s26 = sshll.u32 %s614_s7, 2 }
 0x19f   : > { %s616_s18 = scalar_lea.vmem [#allocation8], %s6070_s26 }
 0x1a0   : > { %5264 = dma.done.wait (%p5866_p7), %s604_s3, 64  }
 0x1a1   : > { %5266 = vsyncadd (%p5866_p7), %s604_s3, 4294967232  ;;  %s3887_s23 = sshll.u32 %s6050_s12, 6  ;;  %s622_s14 = scalar_lea.sflag [#allocation10], %s603_s21 }
 0x1a2   : > { %s6078_s27 = scalar_lea.vmem [#allocation9], %s3887_s23 }
 0x1a3   : > { %5268 = dma.done.wait (%p6887_p9), %s622_s14, 1024  }
 0x1a4   : > { %5270 = vsyncadd (%p6887_p9), %s622_s14, 4294966272  ;;  %s6892_s2 = sld [smem:[#allocation32_spill]]  ;;  %p6893_p1 = scmp.ne.s32.totalorder %s6868_s17, 0 }
 0x1aa   : > { %s632_s22 = sand.u32 1, %s6892_s2  }
 0x1ab   : > { %s6085_s15 = sshll.u32 %s632_s22, 3 }
 0x1ac   : > { %s634_s28 = scalar_lea.vmem [#allocation11], %s6085_s15 }
 0x1ad   : > { %5272 = dma.done.wait (%p6893_p1), %s622_s14, 128  }
 0x1ae   : > { %5274 = vsyncadd (%p6893_p1), %s622_s14, 4294967168  ;;  %s6894_s4 = sld [smem:[#allocation29_spill]]  ;;  %s640_s13 = scalar_lea.sflag [#allocation13], %s603_s21 }
 0x1af   : > { %p6895_p7 = scmp.ne.s32.totalorder %s6881_s16, 0 }
 0x1b4   : > { %s641_s24 = sand.u32 1, %s6894_s4  }
 0x1b5   : > { %s6093_s3 = sshll.u32 %s641_s24, 3 }
 0x1b6   : > { %s643_s20 = scalar_lea.vmem [#allocation12], %s6093_s3 }
 0x1b7   : > { %5276 = dma.done.wait (%p6895_p7), %s640_s13, 128  }
 0x1b8   : > { %5278 = vsyncadd (%p6895_p7), %s640_s13, 4294967168  ;;  %p6896_p0 = scmp.eq.s32.totalorder %s5551_s10, 0 }
 0x1ba   : > { %5280 = dma.done.wait (%p6896_p0), [#allocation13], 4096   ;;  %p6897_p6 = pmov %p6896_p0 }
 0x1bb   : > { %p6898_p5 = pmov %p6896_p0 }
 0x1bc   : > { %5282 = vsyncadd (%p6897_p6), [#allocation13], 4294963200 }
 0x1bd   : > { %5284 = dma.done.wait (%p6898_p5), [#allocation16], 18432   ;;  %p6899_p4 = pmov %p6896_p0 }
 0x1be   : > { %v5386_v0 = vmov 0   ;;  %v4642_v1 = vld [vmem:[#allocation14 + $0x4] ss:$16 sps:$4 sm:$0xff]   ;;  %v4644_v2 = vld [vmem:[#allocation14 + $0xc] ss:$16 sps:$4 sm:$0xff]   ;;  %s6900_s10 = sld [smem:[#allocation40_spill]] }
 0x1bf   : > { %5286 = vsyncadd (%p6899_p4), [#allocation16], 4294948864  ;;  %1009 = vmatprep.mubr.bf16.mxu0 %v5386_v0  ;;  %1072 = vmatprep.mubr.bf16.mxu1 %v5386_v0  ;;  %v4646_v3 = vld [vmem:[#allocation14] ss:$16 sps:$4 sm:$0xff]   ;;  %v4647_v4 = vld [vmem:[#allocation14 + $0x8] ss:$16 sps:$4 sm:$0xff]  }
 0x1c0   : > { %977 = vmatprep.subr.bf16.mxu0 %v4642_v1  ;;  %1040 = vmatprep.subr.bf16.mxu1 %v4644_v2  ;;  %v4648_v5 = vld [vmem:[#allocation14 + $0x24] ss:$16 sps:$4 sm:$0xff]   ;;  %v4650_v6 = vld [vmem:[#allocation14 + $0x2c] ss:$16 sps:$4 sm:$0xff]   ;;  %v4652_v7 = vld [vmem:[#allocation14 + $0x20] ss:$16 sps:$4 sm:$0xff]  }
 0x1c1   : > { %978 = vmatpush1.bf16.msra.mxu0 %v4646_v3  ;;  %1041 = vmatpush1.bf16.msra.mxu1 %v4647_v4  ;;  %v4653_v8 = vld [vmem:[#allocation14 + $0x28] ss:$16 sps:$4 sm:$0xff]   ;;  %v4654_v9 = vld [vmem:[#allocation14 + $0x44] ss:$16 sps:$4 sm:$0xff]   ;;  %v4656_v10 = vld [vmem:[#allocation14 + $0x4c] ss:$16 sps:$4 sm:$0xff]   ;;  %v779_v3 = vlaneseq }
 0x1c2   : > { %979 = vmatprep.subr.bf16.mxu0 %v4648_v5  ;;  %1042 = vmatprep.subr.bf16.mxu1 %v4650_v6  ;;  %v4658_v11 = vld [vmem:[#allocation14 + $0x40] ss:$16 sps:$4 sm:$0xff]   ;;  %v4659_v12 = vld [vmem:[#allocation14 + $0x48] ss:$16 sps:$4 sm:$0xff]   ;;  %v4660_v13 = vld [vmem:[#allocation14 + $0x64] ss:$16 sps:$4 sm:$0xff]  }
 0x1c3   : > { %v4662_v14 = vld [vmem:[#allocation14 + $0x6c] ss:$16 sps:$4 sm:$0xff]   ;;  %v4664_v15 = vld [vmem:[#allocation14 + $0x60] ss:$16 sps:$4 sm:$0xff]   ;;  %v4665_v16 = vld [vmem:[#allocation14 + $0x68] ss:$16 sps:$4 sm:$0xff]  }
 0x1c4   : > { %v4666_v17 = vld [vmem:[#allocation14 + $0x84] ss:$16 sps:$4 sm:$0xff]   ;;  %v4668_v18 = vld [vmem:[#allocation14 + $0x8c] ss:$16 sps:$4 sm:$0xff]   ;;  %v4670_v19 = vld [vmem:[#allocation14 + $0x80] ss:$16 sps:$4 sm:$0xff]  }
 0x1c5   : > { %980 = vmatpush1.bf16.msra.mxu0 %v4652_v7  ;;  %1043 = vmatpush1.bf16.msra.mxu1 %v4653_v8  ;;  %v4671_v20 = vld [vmem:[#allocation14 + $0x88] ss:$16 sps:$4 sm:$0xff]   ;;  %v4672_v21 = vld [vmem:[#allocation14 + $0xa4] ss:$16 sps:$4 sm:$0xff]   ;;  %v4674_v22 = vld [vmem:[#allocation14 + $0xac] ss:$16 sps:$4 sm:$0xff]  }
 0x1c6   : > { %981 = vmatprep.subr.bf16.mxu0 %v4654_v9  ;;  %1044 = vmatprep.subr.bf16.mxu1 %v4656_v10  ;;  %v4676_v23 = vld [vmem:[#allocation14 + $0xa0] ss:$16 sps:$4 sm:$0xff]   ;;  %v4677_v24 = vld [vmem:[#allocation14 + $0xa8] ss:$16 sps:$4 sm:$0xff]   ;;  %v4678_v25 = vld [vmem:[#allocation14 + $0xc4] ss:$16 sps:$4 sm:$0xff]  }
 0x1c7   : > { %v4680_v26 = vld [vmem:[#allocation14 + $0xcc] ss:$16 sps:$4 sm:$0xff]   ;;  %v4682_v27 = vld [vmem:[#allocation14 + $0xc0] ss:$16 sps:$4 sm:$0xff]   ;;  %v4683_v28 = vld [vmem:[#allocation14 + $0xc8] ss:$16 sps:$4 sm:$0xff]  }
 0x1c8   : > { %v4684_v29 = vld [vmem:[#allocation14 + $0xe4] ss:$16 sps:$4 sm:$0xff]   ;;  %v4686_v30 = vld [vmem:[#allocation14 + $0xec] ss:$16 sps:$4 sm:$0xff]   ;;  %v4688_v31 = vld [vmem:[#allocation14 + $0xe0] ss:$16 sps:$4 sm:$0xff]  }
 0x1c9   : > { %982 = vmatpush1.bf16.msra.mxu0 %v4658_v11  ;;  %1045 = vmatpush1.bf16.msra.mxu1 %v4659_v12  ;;  %v4689_v32 = vld [vmem:[#allocation14 + $0xe8] ss:$16 sps:$4 sm:$0xff]   ;;  %v739_v33 = vld [vmem:[%s607_s25] sm:$0xf]  ;;  %v743_v46 = vld [vmem:[%s6054_s19 + $0xc] sm:$0xf] }
 0x1ca   : > { %983 = vmatprep.subr.bf16.mxu0 %v4660_v13  ;;  %1046 = vmatprep.subr.bf16.mxu1 %v4662_v14  ;;  %v740_v34 = vld [vmem:[%s6054_s19] sm:$0xf]  ;;  %v4693_v35 = vld [vmem:[#allocation15 + $0x4] ss:$16 sps:$4 sm:$0xff]   ;;  %v744_v47 = vld [vmem:[%s616_s18] sm:$0xf] }
 0x1cb   : > { %v4703_v36 = vld [vmem:[#allocation17] ss:$8 sps:$4 sm:$0xff]   ;;  %v3894_v37 = vcombine.low %v739_v33, %v740_v34  ;;  %v4696_v39 = vld [vmem:[#allocation15 + $0x24] ss:$16 sps:$4 sm:$0xff]   ;;  %v4707_v40 = vld [vmem:[#allocation17 + $0x10] ss:$8 sps:$4 sm:$0xff]   ;;  %v3896_v50 = vcombine.low %v743_v46, %v744_v47 }
 0x1cc   : > { %v4691_v38 = vld [vmem:[#allocation15] ss:$16 sps:$4 sm:$0xff]   ;;  %v4699_v42 = vld [vmem:[#allocation15 + $0x44] ss:$16 sps:$4 sm:$0xff]   ;;  %v4722_v61 = vld [vmem:[#allocation15 + $0xc] ss:$16 sps:$4 sm:$0xff]  }
 0x1cd   : > { %984 = vmatpush1.bf16.msra.mxu0 %v4664_v15  ;;  %1047 = vmatpush1.bf16.msra.mxu1 %v4665_v16  ;;  %v4694_v41 = vld [vmem:[#allocation15 + $0x20] ss:$16 sps:$4 sm:$0xff]   ;;  %v4690_v43 = vld [vmem:[%s6054_s19 + $0x4] sm:$0xff]   ;;  %v780_v4 = vshrl.u32 %v779_v3, 7  ;;  %s6901_s19 = sld [smem:[#allocation63_spill]]  ;;  %p1196_p10 = scmp.gt.s32.totalorder %s6900_s10, 0 }
 0x1ce   : > { %985 = vmatprep.subr.bf16.mxu0 %v4666_v17  ;;  %1048 = vmatprep.subr.bf16.mxu1 %v4668_v18  ;;  %v4697_v44 = vld [vmem:[#allocation15 + $0x40] ss:$16 sps:$4 sm:$0xff]   ;;  %v4702_v45 = vld [vmem:[#allocation15 + $0x64] ss:$16 sps:$4 sm:$0xff]   ;;  %p1202_p12 = scmp.lt.s32.totalorder %s6900_s10, 1  ;;  %vm1339_vm1 = vcmask 1040384  }
 0x1cf   : > { %v4700_v48 = vld [vmem:[#allocation15 + $0x60] ss:$16 sps:$4 sm:$0xff]   ;;  %v4706_v49 = vld [vmem:[#allocation15 + $0x84] ss:$16 sps:$4 sm:$0xff]   ;;  %v789_v5 = vsub.s32 2, %v780_v4  ;;  %v793_v7 = vsub.s32 3, %v780_v4 }
 0x1d0   : > { %v4704_v51 = vld [vmem:[#allocation15 + $0x80] ss:$16 sps:$4 sm:$0xff]   ;;  %v4710_v52 = vld [vmem:[#allocation15 + $0xa4] ss:$16 sps:$4 sm:$0xff]   ;;  %v781_v8 = vsub.s32 0, %v780_v4  ;;  %v785_v9 = vsub.s32 1, %v780_v4 }
 0x1d1   : > { %986 = vmatpush1.bf16.msra.mxu0 %v4670_v19  ;;  %1049 = vmatpush1.bf16.msra.mxu1 %v4671_v20  ;;  %v4708_v53 = vld [vmem:[#allocation15 + $0xa0] ss:$16 sps:$4 sm:$0xff]   ;;  %v4714_v55 = vld [vmem:[#allocation15 + $0xc4] ss:$16 sps:$4 sm:$0xff]   ;;  %s1197_s21 = scalar_select %p1196_p10, 1, 0 }
 0x1d2   : > { %987 = vmatprep.subr.bf16.mxu0 %v4672_v21  ;;  %1050 = vmatprep.subr.bf16.mxu1 %v4674_v22  ;;  %v4711_v54 = vld [vmem:[#allocation17 + $0x20] ss:$8 sps:$4 sm:$0xff]   ;;  %v4715_v57 = vld [vmem:[#allocation17 + $0x30] ss:$8 sps:$4 sm:$0xff]   ;;  %v4718_v58 = vld [vmem:[#allocation15 + $0xe4] ss:$16 sps:$4 sm:$0xff]  }
 0x1d3   : > { %v4712_v56 = vld [vmem:[#allocation15 + $0xc0] ss:$16 sps:$4 sm:$0xff]   ;;  %v6122_v2 = vld [vmem:[#allocation17 + $0x4] ss:$8 sps:$4 sm:$0xff]   ;;  %v1198_v20 = vstv %s1197_s21  ;;  %s6148_s1 = scalar_select %p1202_p12, 1, 0 }
 0x1d4   : > { %v4716_v59 = vld [vmem:[#allocation15 + $0xe0] ss:$16 sps:$4 sm:$0xff]   ;;  %vm1199_vm0 = vcmp.eq.s32.totalorder %v1198_v20, 1  ;;  %vm1340_vm2 = vsmask.f32 256  ;;  %vm1452_vm5 = vcmask 1043456  }
 0x1d5   : > { %988 = vmatpush1.bf16.msra.mxu0 %v4676_v23  ;;  %1051 = vmatpush1.bf16.msra.mxu1 %v4677_v24  ;;  %v4719_v60 = vld [vmem:[#allocation17 + $0x40] ss:$8 sps:$4 sm:$0xff]   ;;  %v4723_v62 = vld [vmem:[#allocation17 + $0x50] ss:$8 sps:$4 sm:$0xff]   ;;  %vm6208_vm3 = vmand %vm1339_vm1, %vm1340_vm2  ;;  %vm1453_vm6 = vsmask.f32 3328 }
 0x1d6   : > { %989 = vmatprep.subr.bf16.mxu0 %v4678_v25  ;;  %1052 = vmatprep.subr.bf16.mxu1 %v4680_v26  ;;  %v4727_v63 = vld [vmem:[#allocation17 + $0x60] ss:$8 sps:$4 sm:$0xff]   ;;  %v4731_v1 = vld [vmem:[#allocation17 + $0x70] ss:$8 sps:$4 sm:$0xff]   ;;  %vm6324_vm7 = vmand %vm1452_vm5, %vm1453_vm6  ;;  %s6925_s26 = sld [smem:[#allocation66_spill]]  ;;  %s3893_s18 = sshll.u32 %s6050_s12, 7 }
 0x1d7   : > { %v777_v6 = vld [vmem:[%s6901_s19] sm:$0xf]  ;;  %v1175_v23 = vld [vmem:[%s634_s28] sm:$0xff]  ;;  %s6585_s23 = scalar_lea.vmem [#allocation18], %s3893_s18  ;;  %s6926_s14 = sld [smem:[#allocation41_spill]] }
 0x1d8   : > { %v6129_v10 = vrot.slane %v777_v6, %v789_v5  ;;  %v6131_v11 = vrot.slane %v777_v6, %v793_v7  ;;  %v6133_v12 = vrot.slane %v777_v6, %v781_v8  ;;  %v6135_v15 = vrot.slane %v777_v6, %v785_v9  ;;  %v1171_v7 = vld [vmem:[%s6078_s27 + $0x20] sm:$0xff]  ;;  %v1172_v8 = vld [vmem:[%s6078_s27 + $0x28] sm:$0xff]  ;;  %s3595_s15 = sshll.u32 %s6585_s23, 4  ;;  %s6927_s3 = sld [smem:[#allocation67_spill]]  ;;  %s6621_s15 = int_to_ptr.vmem [resolvable:$true] %s3595_s15 }
 0x1d9   : > { %990 = vmatpush1.bf16.msra.mxu0 %v4682_v27  ;;  %1053 = vmatpush1.bf16.msra.mxu1 %v4683_v28  ;;  %p6928_p2 = scmp.ne.s32.totalorder %s6836_s0, 0  ;;  %s5387_s17 = smov [#allocation18]  }
 0x1da   : > { %991 = vmatprep.subr.bf16.mxu0 %v4684_v29  ;;  %1054 = vmatprep.subr.bf16.mxu1 %v4686_v30  ;;  %s5151_s16 = sshll.u32 %s5387_s17, 4  ;;  %s5152_s16 = int_to_ptr.vmem [resolvable:$false] %s5151_s16 }
 0x1db   : > { %s5153_s19 = scalar_lea.vmem %s5152_s16, 4096  ;;  %p5154_p9 = scmp.lt.s32.totalorder %s6621_s15, %s5152_s16 }
 0x1dd   : > { %992 = vmatpush1.bf16.msra.mxu0 %v4688_v31  ;;  %1055 = vmatpush1.bf16.msra.mxu1 %v4689_v32  ;;  %v1167_v31 = vld [vmem:[%s6078_s27] sm:$0xff]  ;;  %v1168_v32 = vld [vmem:[%s6078_s27 + $0x8] sm:$0xff]  ;;  %s4143_s2 = sshll.u32 %s6926_s14, 5 }
 0x1de   : > { %1569 = vmatprep.subr.bf16.mxu0 %v4693_v35  ;;  %4243 = vmatprep.subr.bf16.mxu1 %v4703_v36 }
 0x1e0   : > { %1010 = vmatmul.mubr.bf16.vlgmr.msra.gmra.mrb[0].mxu0 %v3894_v37  ;;  %1073 = vmatmul.mubr.bf16.vlgmr.msra.gmra.mrb[0].mxu1 %v3894_v37 }
 0x1e1   : > { %1019 = vmatprep.mubr.bf16.mxu0 %v5386_v0  ;;  %1082 = vmatprep.mubr.bf16.mxu1 %v5386_v0 }
 0x1e2   : > { %1570 = vmatpush1.bf16.msra.mxu0 %v4691_v38  ;;  %4244 = vmatpush3.bf16.msra.mxu1 %v4703_v36 }
 0x1e3   : > { %1571 = vmatprep.subr.bf16.mxu0 %v4696_v39  ;;  %4245 = vmatprep.subr.bf16.mxu1 %v4707_v40 }
 0x1e6   : > { %1572 = vmatpush1.bf16.msra.mxu0 %v4694_v41  ;;  %4246 = vmatpush3.bf16.msra.mxu1 %v4707_v40  ;;  %v1204_v41 = vstv %s6148_s1 }
 0x1e7   : > { %1573 = vmatprep.subr.bf16.mxu0 %v4699_v42  ;;  %4247 = vmatprep.subr.bf16.mxu1 %v4711_v54  ;;  %vm6217_vm4 = vcmp.eq.s32.totalorder %v1204_v41, 1  ;;  %v4734_v41 = vld [vmem:[#allocation15 + $0x6c] ss:$16 sps:$4 sm:$0xff]  }
 0x1e8   : > { %1020 = vmatmul.mubr.bf16.gmra.mrb[4].mxu0 %v4690_v43  ;;  %1083 = vmatmul.mubr.bf16.gmra.mrb[4].mxu1 %v4690_v43 }
 0x1e9   : > { %1029 = vmatprep.mubr.bf16.mxu0 %v5386_v0  ;;  %1092 = vmatprep.mubr.bf16.mxu1 %v5386_v0 }
 0x1ea   : > { %1574 = vmatpush1.bf16.msra.mxu0 %v4697_v44  ;;  %4248 = vmatpush3.bf16.msra.mxu1 %v4711_v54  ;;  %v4720_v54 = vld [vmem:[#allocation15 + $0x8] ss:$16 sps:$4 sm:$0xff]  }
 0x1eb   : > { %1575 = vmatprep.subr.bf16.mxu0 %v4702_v45  ;;  %4249 = vmatprep.subr.bf16.mxu1 %v4715_v57 }
 0x1ee   : > { %1576 = vmatpush1.bf16.msra.mxu0 %v4700_v48  ;;  %4250 = vmatpush3.bf16.msra.mxu1 %v4715_v57 }
 0x1ef   : > { %1577 = vmatprep.subr.bf16.mxu0 %v4706_v49  ;;  %4251 = vmatprep.subr.bf16.mxu1 %v4719_v60 }
 0x1f0   : > { %1030 = vmatmul.mubr.bf16.gmra.mrb[8].mxu0 %v3896_v50  ;;  %1093 = vmatmul.mubr.bf16.gmra.mrb[8].mxu1 %v3896_v50 }
 0x1f1   : > { %1601 = vmatprep.mubr.bf16.mxu0 %v5386_v0 }
 0x1f2   : > { %1578 = vmatpush1.bf16.msra.mxu0 %v4704_v51  ;;  %4252 = vmatpush3.bf16.msra.mxu1 %v4719_v60 }
 0x1f3   : > { %1579 = vmatprep.subr.bf16.mxu0 %v4710_v52  ;;  %4253 = vmatprep.subr.bf16.mxu1 %v4723_v62 }
 0x1f6   : > { %1580 = vmatpush1.bf16.msra.mxu0 %v4708_v53  ;;  %4254 = vmatpush3.bf16.msra.mxu1 %v4723_v62  ;;  %v4726_v62 = vld [vmem:[#allocation15 + $0x2c] ss:$16 sps:$4 sm:$0xff]  }
 0x1f7   : > { %1581 = vmatprep.subr.bf16.mxu0 %v4714_v55  ;;  %4255 = vmatprep.subr.bf16.mxu1 %v4727_v63  ;;  %v1169_v55 = vld [vmem:[%s6078_s27 + $0x10] sm:$0xff] }
 0x1fa   : > { %1582 = vmatpush1.bf16.msra.mxu0 %v4712_v56  ;;  %4256 = vmatpush3.bf16.msra.mxu1 %v4727_v63 }
 0x1fb   : > { %1583 = vmatprep.subr.bf16.mxu0 %v4718_v58  ;;  %4257 = vmatprep.subr.bf16.mxu1 %v4731_v1 }
 0x1fe   : > { %1584 = vmatpush1.bf16.msra.mxu0 %v4716_v59  ;;  %4258 = vmatpush3.bf16.msra.mxu1 %v4731_v1  ;;  %v1170_v1 = vld [vmem:[%s6078_s27 + $0x18] sm:$0xff] }
 0x1ff   : > { %1754 = vmatprep.subr.bf16.mxu0 %v4722_v61  ;;  %4267 = vmatprep.subr.bf16.mxu1 %v6122_v2 }
 0x2b3   : > { %v1011_v13 = vpop.f32.mrb[0].mxu0  ;;  %v1074_v14 = vpop.f32.mrb[0].mxu1 }
 0x2b4   : > { %v1075_v16 = vadd.f32 %v1074_v14, %v6129_v10  ;;  %v1013_v17 = vpop.f32.mrb[1].mxu0  ;;  %v1076_v18 = vpop.f32.mrb[1].mxu1 }
 0x2b5   : > { %v1077_v19 = vadd.f32 %v1076_v18, %v6131_v11  ;;  %v1015_v21 = vpop.f32.mrb[2].mxu0  ;;  %v1078_v22 = vpop.f32.mrb[2].mxu1 }
 0x2b6   : > { %v1016_v24 = vadd.f32 %v1015_v21, %v6133_v12  ;;  %v1079_v25 = vadd.f32 %v1078_v22, %v6129_v10  ;;  %v1017_v26 = vpop.f32.mrb[3].mxu0  ;;  %v1080_v27 = vpop.f32.mrb[3].mxu1  ;;  %v4730_v22 = vld [vmem:[#allocation15 + $0x4c] ss:$16 sps:$4 sm:$0xff]  }
 0x2b7   : > { %v4160_v28 = vpack.c.bf16 %v1077_v19, %v1075_v16  ;;  %v1018_v29 = vadd.f32 %v1017_v26, %v6135_v15  ;;  %v1081_v30 = vadd.f32 %v1080_v27, %v6131_v11  ;;  %v4724_v19 = vld [vmem:[#allocation15 + $0x28] ss:$16 sps:$4 sm:$0xff]  }
 0x2b9   : > { %v1194_v33 = vadd.bf16 %v4160_v28, %v1175_v23  ;;  %v4161_v34 = vpack.c.bf16 %v1018_v29, %v1016_v24  ;;  %v4162_v35 = vpack.c.bf16 %v1081_v30, %v1079_v25 }
 0x2bb   : > { %v6152_v36 = vsel %vm1199_vm0, %v1194_v33, 0  ;;  %v6154_v37 = vadd.bf16 %v4161_v34, %v1167_v31  ;;  %v6156_v38 = vadd.bf16 %v4162_v35, %v1168_v32  ;;  %v1021_v39 = vpop.f32.mrb[4].mxu0  ;;  %v1084_v40 = vpop.f32.mrb[4].mxu1  ;;  %v4728_v35 = vld [vmem:[#allocation15 + $0x48] ss:$16 sps:$4 sm:$0xff]  }
 0x2bc   : > { %v1229_v42 = vrot.slane %v6152_v36, 4  ;;  %v3939_v43 = vcombine.high %v6152_v36, %v6152_v36  ;;  %v6164_v44 = vcombine.low %v6152_v36, %v6152_v36  ;;  %v1022_v45 = vadd.f32 %v1021_v39, %v6133_v12  ;;  %v1023_v46 = vpop.f32.mrb[5].mxu0  ;;  %v1086_v47 = vpop.f32.mrb[5].mxu1 }
 0x2bd   : > { %v6169_v48 = vcombine.high %v6156_v38, %v6156_v38  ;;  %v6173_v49 = vcombine.low %v6156_v38, %v6156_v38  ;;  %v1085_v50 = vadd.f32 %v1084_v40, %v6129_v10  ;;  %v1024_v51 = vadd.f32 %v1023_v46, %v6135_v15  ;;  %v1025_v52 = vpop.f32.mrb[6].mxu0  ;;  %v1088_v53 = vpop.f32.mrb[6].mxu1 }
 0x2be   : > { %v1087_v56 = vadd.f32 %v1086_v47, %v6131_v11  ;;  %v1026_v57 = vadd.f32 %v1025_v52, %v6133_v12  ;;  %v1089_v58 = vadd.f32 %v1088_v53, %v6129_v10  ;;  %v1027_v59 = vpop.f32.mrb[7].mxu0  ;;  %v1090_v60 = vpop.f32.mrb[7].mxu1  ;;  %v3959_v61 = vcombine.low %v6152_v36, %v6154_v37 }
 0x2bf   : > { %v4163_v63 = vpack.c.bf16 %v1024_v51, %v1022_v45  ;;  %v1028_v3 = vadd.f32 %v1027_v59, %v6135_v15  ;;  %v1091_v4 = vadd.f32 %v1090_v60, %v6131_v11  ;;  %v3940_v5 = vcombine.high %v6154_v37, %v6154_v37 }
 0x2c0   : > { %v4164_v6 = vpack.c.bf16 %v1087_v56, %v1085_v50  ;;  %1602 = vmatmul.mubr.bf16.vlgmr.msra.gmra.mrb[12].mxu0 %v3959_v61  ;;  %v1260_v9 = vshrl.u32 %v3939_v43, 16  ;;  %v1263_v13 = vshll.u32 %v3939_v43, 16  ;;  %v1274_v14 = vshrl.u32 %v6169_v48, 16 }
 0x2c1   : > { %v6191_v16 = vadd.bf16 %v4163_v63, %v1169_v55  ;;  %v4165_v17 = vpack.c.bf16 %v1028_v3, %v1026_v57  ;;  %v4166_v18 = vpack.c.bf16 %v1091_v4, %v1089_v58  ;;  %1755 = vmatpush1.bf16.msra.mxu0 %v4720_v54  ;;  %1611 = vmatprep.mubr.bf16.mxu0 %v5386_v0  ;;  %v1267_v20 = vshrl.u32 %v3940_v5, 16  ;;  %v1173_v55 = vld [vmem:[%s6078_s27 + $0x30] sm:$0xff] }
 0x2c2   : > { %v6194_v21 = vadd.bf16 %v4164_v6, %v1170_v1  ;;  %1756 = vmatprep.subr.bf16.mxu0 %v4726_v62  ;;  %v1262_v23 = vrot.slane %v1260_v9, 7  ;;  %v1270_v24 = vshll.u32 %v3940_v5, 16  ;;  %v1276_v25 = vrot.slane %v1274_v14, 7 }
 0x2c3   : > { %v3942_v26 = vcombine.high %v6191_v16, %v6191_v16  ;;  %v6200_v27 = vcombine.low %v6191_v16, %v6191_v16  ;;  %v6202_v28 = vadd.bf16 %v4165_v17, %v1171_v7  ;;  %v6204_v29 = vadd.bf16 %v4166_v18, %v1172_v8  ;;  %v1031_v30 = vpop.f32.mrb[8].mxu0  ;;  %v1094_v32 = vpop.f32.mrb[8].mxu1  ;;  %v4732_v7 = vld [vmem:[#allocation15 + $0x68] ss:$16 sps:$4 sm:$0xff]   ;;  %v4738_v8 = vld [vmem:[#allocation15 + $0x8c] ss:$16 sps:$4 sm:$0xff]  }
 0x2c4   : > { %v1032_v33 = vadd.f32 %v1031_v30, %v6133_v12  ;;  %v1033_v34 = vpop.f32.mrb[9].mxu0  ;;  %v6215_v39 = vcombine.low %v6156_v38, %v6191_v16  ;;  %v1265_v40 = vor.u32 %v1263_v13, %v1262_v23  ;;  %v1269_v43 = vrot.slane %v1267_v20, 7  ;;  %v1096_v46 = vpop.f32.mrb[9].mxu1 }
 0x2c5   : > { %1757 = vmatpush1.bf16.msra.mxu0 %v4724_v19  ;;  %v1034_v47 = vadd.f32 %v1033_v34, %v6135_v15  ;;  %v1277_v50 = vshll.u32 %v6169_v48, 16  ;;  %v1281_v51 = vshrl.u32 %v3942_v26, 16  ;;  %v1284_v52 = vshll.u32 %v3942_v26, 16  ;;  %v1035_v53 = vpop.f32.mrb[10].mxu0  ;;  %v1098_v54 = vpop.f32.mrb[10].mxu1  ;;  %v1176_v19 = vld [vmem:[%s643_s20] sm:$0xff] }
 0x2c6   : > { %1758 = vmatprep.subr.bf16.mxu0 %v4730_v22  ;;  %v1272_v56 = vor.u32 %v1270_v24, %v1269_v43  ;;  %v1342_v57 = vsel %vm6208_vm3, 0, %v1265_v40  ;;  %v6228_v58 = vcombine.low %v6194_v21, %v6202_v28  ;;  %v1036_v59 = vadd.f32 %v1035_v53, %v6133_v12  ;;  %v1037_v60 = vpop.f32.mrb[11].mxu0  ;;  %v1100_v61 = vpop.f32.mrb[11].mxu1  ;;  %s3579_s20 = scalar_lea.sflag [#allocation5], %s6050_s12 }
 0x2c7   : > { %v4167_v48 = vpack.c.bf16 %v1034_v47, %v1032_v33  ;;  %v1279_v62 = vor.u32 %v1277_v50, %v1276_v25  ;;  %v1283_v63 = vrot.slane %v1281_v51, 7  ;;  %v1095_v1 = vadd.f32 %v1094_v32, %v6129_v10  ;;  %v1174_v32 = vld [vmem:[%s6078_s27 + $0x38] sm:$0xff]  ;;  %s4170_s27 = sshll.u32 %s6900_s10, 4  ;;  %s5147_s10 = scalar_lea.vmem %s6621_s15, 2048 }
 0x2c8   : > { %1612 = vmatmul.mubr.bf16.gmra.mrb[16].mxu0 %v6215_v39  ;;  %v6235_v3 = vsel %vm6208_vm3, 0, %v1272_v56  ;;  %v3943_v4 = vcombine.high %v6194_v21, %v6194_v21  ;;  %v3944_v12 = vcombine.high %v6202_v28, %v6202_v28  ;;  %v1038_v5 = vadd.f32 %v1037_v60, %v6135_v15  ;;  %v4739_v33 = vld [vmem:[#allocation17 + $0x14] ss:$8 sps:$4 sm:$0xff]   ;;  %v4743_v60 = vld [vmem:[#allocation17 + $0x24] ss:$8 sps:$4 sm:$0xff]   ;;  %s3592_s22 = sadd.s32 %s4170_s27, %s4143_s2  ;;  %p5148_p8 = scmp.ne.s32.totalorder %s6621_s15, %s5147_s10 }
 0x2c9   : > { %v6242_v6 = vadd.bf16 %v4167_v48, %v1173_v55  ;;  %1759 = vmatpush1.bf16.msra.mxu0 %v4728_v35  ;;  %v3999_v10 = vcombine.low %v1342_v57, %v6235_v3  ;;  %1621 = vmatprep.mubr.bf16.mxu0 %v5386_v0  ;;  %v1286_v9 = vor.u32 %v1284_v52, %v1283_v63  ;;  %v6248_v13 = vsel %vm6208_vm3, 0, %v1279_v62  ;;  %v4736_v35 = vld [vmem:[#allocation15 + $0x88] ss:$16 sps:$4 sm:$0xff]   ;;  %v4742_v51 = vld [vmem:[#allocation15 + $0xac] ss:$16 sps:$4 sm:$0xff]   ;;  %s4144_s28 = sshll.u32 %s3592_s22, 7  ;;  %p5155_p3 = scmp.lt.s32.totalorder %s5153_s19, %s5147_s10 }
 0x2ca   : > { %1760 = vmatprep.subr.bf16.mxu0 %v4734_v41  ;;  %v1288_v14 = vshrl.u32 %v3943_v4, 16  ;;  %v1291_v17 = vshll.u32 %v3943_v4, 16  ;;  %v1295_v18 = vshrl.u32 %v3944_v12, 16  ;;  %v1298_v15 = vshll.u32 %v3944_v12, 16  ;;  %v4740_v62 = vld [vmem:[#allocation15 + $0xa8] ss:$16 sps:$4 sm:$0xff]   ;;  %s6627_s13 = scalar_lea.hbm %s6927_s3, %s4144_s28  ;;  %p5149_p13 = pnand %p5148_p8, %p6928_p2 }
 0x2cb   : > { %4259 = vmatprep.mubr.bf16.mxu1 %v3999_v10  ;;  %v6254_v20 = vsel %vm6208_vm3, 0, %v1286_v9  ;;  %v4169_v22 = vpack.c.bf16 %v1038_v5, %v1036_v59  ;;  %v1097_v23 = vadd.f32 %v1096_v46, %v6131_v11  ;;  %v3945_v24 = vcombine.high %v6204_v29, %v6204_v29  ;;  %v4746_v4 = vld [vmem:[#allocation15 + $0xcc] ss:$16 sps:$4 sm:$0xff]   ;;  %p5156_p1 = por %p5155_p3, %p5154_p9 }
 0x2cc   : > { %v6261_v25 = vcombine.low %v6248_v13, %v6254_v20  ;;  %v1290_v26 = vrot.slane %v1288_v14, 7  ;;  %v1297_v30 = vrot.slane %v1295_v18, 7  ;;  %v3946_v34 = vcombine.high %v6242_v6, %v6242_v6  ;;  %p5150_p11 = pneg %p5149_p13 }
 0x2cd   : > { %1761 = vmatpush1.bf16.msra.mxu0 %v4732_v7  ;;  %v1195_v40 = vadd.bf16 %v4169_v22, %v1176_v19  ;;  %v4168_v43 = vpack.c.bf16 %v1097_v23, %v1095_v1  ;;  %v1302_v47 = vshrl.u32 %v3945_v24, 16  ;;  %v1305_v11 = vshll.u32 %v3945_v24, 16  ;;  %v4744_v22 = vld [vmem:[#allocation15 + $0xc8] ss:$16 sps:$4 sm:$0xff]  }
 0x2ce   : > { %6906 = vst [vmem:[#allocation53_spill] sm:$0xff] %v6261_v25  ;;  %1762 = vmatprep.subr.bf16.mxu0 %v4738_v8  ;;  %4260 = vmatmul.mubr.bf16.vlgmr.msra.gmra.mrb[12].mxu1 %v6261_v25  ;;  %v1293_v46 = vor.u32 %v1291_v17, %v1290_v26  ;;  %v1300_v50 = vor.u32 %v1298_v15, %v1297_v30  ;;  %v1309_v52 = vshrl.u32 %v3946_v34, 16  ;;  %v1312_v53 = vshll.u32 %v3946_v34, 16  ;;  %v4747_v26 = vld [vmem:[#allocation17 + $0x34] ss:$8 sps:$4 sm:$0xff]   ;;  %p5157_p7 = pnand %p5156_p1, %p5150_p11 }
 0x2cf   : > { %4268 = vmatpush3.bf16.msra.mxu1 %v6122_v2  ;;  %v6270_v54 = vsel %vm6217_vm4, %v1195_v40, 0  ;;  %v6272_v55 = vadd.bf16 %v4168_v43, %v1174_v32  ;;  %v1304_v56 = vrot.slane %v1302_v47, 7  ;;  %v6276_v57 = vcombine.low %v6204_v29, %v6242_v6  ;;  %v4779_v24 = vld [vmem:[#allocation15 + $0x148] ss:$16 sps:$4 sm:$0xff]  }
 0x2d0   : > { %1622 = vmatmul.mubr.bf16.gmra.mrb[20].mxu0 %v6228_v58  ;;  %v6281_v41 = vsel %vm6208_vm3, 0, %v1293_v46  ;;  %v6285_v2 = vsel %vm6208_vm3, 0, %v1300_v50  ;;  %v6289_v45 = vcombine.high %v6270_v54, %v6270_v54  ;;  %v6293_v59 = vcombine.low %v6270_v54, %v6270_v54  ;;  %4269 = vmatprep.subr.bf16.mxu1 %v4739_v33 }
 0x2d1   : > { %1763 = vmatpush1.bf16.msra.mxu0 %v4736_v35  ;;  %v6297_v61 = vcombine.low %v6281_v41, %v6285_v2  ;;  %1631 = vmatprep.mubr.bf16.mxu0 %v5386_v0  ;;  %v1307_v63 = vor.u32 %v1305_v11, %v1304_v56  ;;  %v1311_v1 = vrot.slane %v1309_v52, 7  ;;  %v3950_v12 = vcombine.low %v6154_v37, %v6154_v37  ;;  %v4750_v35 = vld [vmem:[#allocation15 + $0xec] ss:$16 sps:$4 sm:$0xff]  }
 0x2d2   : > { %1764 = vmatprep.subr.bf16.mxu0 %v4742_v51  ;;  %v1373_v5 = vshrl.u32 %v6164_v44, 16  ;;  %v1375_v10 = vshll.u32 %v6164_v44, 16  ;;  %v1230_v7 = vrot.slane %v6154_v37, 4  ;;  %v1231_v14 = vrot.slane %v6156_v38, 4 }
 0x2d3   : > { %6907 = vst [vmem:[#allocation54_spill] sm:$0xff] %v6297_v61  ;;  %4263 = vmatprep.mubr.bf16.mxu1 %v6297_v61  ;;  %4270 = vmatpush3.bf16.msra.mxu1 %v4739_v33  ;;  %v1314_v8 = vor.u32 %v1312_v53, %v1311_v1  ;;  %v6310_v9 = vsel %vm6208_vm3, 0, %v1307_v63  ;;  %v1232_v17 = vrot.slane %v6191_v16, 4  ;;  %v1380_v15 = vshrl.u32 %v3950_v12, 16  ;;  %v4767_v61 = vld [vmem:[#allocation15 + $0x108] ss:$16 sps:$4 sm:$0xff]  }
 0x2d4   : > { %4271 = vmatprep.subr.bf16.mxu1 %v4743_v60  ;;  %v1377_v18 = vrot.slane %v1375_v10, 1  ;;  %v1382_v19 = vshll.u32 %v3950_v12, 16  ;;  %v6316_v44 = vcombine.low %v1229_v42, %v1230_v7  ;;  %v6332_v36 = vcombine.low %v1230_v7, %v1231_v14 }
 0x2d5   : > { %1765 = vmatpush1.bf16.msra.mxu0 %v4740_v62  ;;  %v6320_v23 = vsel %vm6208_vm3, 0, %v1314_v8  ;;  %v6330_v30 = vcombine.low %v1231_v14, %v1232_v17  ;;  %v1387_v42 = vshrl.u32 %v6173_v49, 16  ;;  %v1389_v40 = vshll.u32 %v6173_v49, 16  ;;  %v4751_v49 = vld [vmem:[#allocation17 + $0x44] ss:$8 sps:$4 sm:$0xff]  }
 0x2d6   : > { %1766 = vmatprep.subr.bf16.mxu0 %v4746_v4  ;;  %v6337_v32 = vcombine.low %v6310_v9, %v6320_v23  ;;  %v1378_v33 = vor.u32 %v1377_v18, %v1373_v5  ;;  %v1384_v34 = vrot.slane %v1382_v19, 1  ;;  %v1394_v43 = vshrl.u32 %v6200_v27, 16  ;;  %v4754_v4 = vld [vmem:[#allocation15 + $0x104] ss:$16 sps:$4 sm:$0xff]  }
 0x2d7   : > { %4272 = vmatpush3.bf16.msra.mxu1 %v4743_v60  ;;  %v1396_v47 = vshll.u32 %v6200_v27, 16  ;;  %v3953_v11 = vcombine.low %v6194_v21, %v6194_v21  ;;  %v3954_v46 = vcombine.low %v6202_v28, %v6202_v28  ;;  %v1391_v52 = vrot.slane %v1389_v40, 1  ;;  %v4748_v27 = vld [vmem:[#allocation15 + $0xe8] ss:$16 sps:$4 sm:$0xff]  }
 0x2d8   : > { %6910 = vst [vmem:[#allocation55_spill] sm:$0xff] %v6337_v32  ;;  %4264 = vmatmul.mubr.bf16.gmra.mrb[16].mxu1 %v6337_v32  ;;  %1632 = vmatmul.mubr.bf16.gmra.mrb[24].mxu0 %v6276_v57  ;;  %v1385_v50 = vor.u32 %v1384_v34, %v1380_v15  ;;  %v1455_v51 = vsel %vm6324_vm7, %v1378_v33, 0  ;;  %v1233_v53 = vrot.slane %v6194_v21, 4  ;;  %v1234_v10 = vrot.slane %v6202_v28, 4  ;;  %v4755_v15 = vld [vmem:[#allocation17 + $0x54] ss:$8 sps:$4 sm:$0xff]  }
 0x2d9   : > { %1767 = vmatpush1.bf16.msra.mxu0 %v4744_v22  ;;  %4273 = vmatprep.subr.bf16.mxu1 %v4747_v26  ;;  %v1398_v56 = vrot.slane %v1396_v47, 1  ;;  %v1401_v60 = vshrl.u32 %v3953_v11, 16  ;;  %v1403_v62 = vshll.u32 %v3953_v11, 16  ;;  %v1408_v63 = vshrl.u32 %v3954_v46, 16  ;;  %v4758_v47 = vld [vmem:[#allocation15 + $0x124] ss:$16 sps:$4 sm:$0xff]  }
 0x2da   : > { %v6353_v1 = vsel %vm6324_vm7, %v1385_v50, 0  ;;  %1768 = vmatprep.subr.bf16.mxu0 %v4750_v35  ;;  %1786 = vmatprep.mubr.bf16.mxu0 %v5386_v0  ;;  %v1392_v12 = vor.u32 %v1391_v52, %v1387_v42  ;;  %v1410_v5 = vshll.u32 %v3954_v46, 16  ;;  %v3955_v18 = vcombine.low %v6204_v29, %v6204_v29 }
 0x2db   : > { %v4011_v7 = vcombine.low %v1455_v51, %v6353_v1  ;;  %4274 = vmatpush3.bf16.msra.mxu1 %v4747_v26  ;;  %v1399_v8 = vor.u32 %v1398_v56, %v1394_v43  ;;  %v1405_v14 = vrot.slane %v1403_v62, 1  ;;  %v6366_v42 = vcombine.low %v1233_v53, %v1234_v10  ;;  %v4752_v26 = vld [vmem:[#allocation15 + $0x100] ss:$16 sps:$4 sm:$0xff]   ;;  %v4759_v62 = vld [vmem:[#allocation17 + $0x64] ss:$8 sps:$4 sm:$0xff]  }
 0x2dc   : > { %4275 = vmatprep.subr.bf16.mxu1 %v4751_v49  ;;  %v6362_v19 = vsel %vm6324_vm7, %v1392_v12, 0  ;;  %v1412_v22 = vrot.slane %v1410_v5, 1  ;;  %v3956_v33 = vcombine.low %v6242_v6, %v6242_v6  ;;  %v1415_v40 = vshrl.u32 %v3955_v18, 16  ;;  %v4756_v5 = vld [vmem:[#allocation15 + $0x120] ss:$16 sps:$4 sm:$0xff]  }
 0x2dd   : > { %4283 = vmatprep.mubr.bf16.mxu1 %v4011_v7  ;;  %1769 = vmatpush1.bf16.msra.mxu0 %v4748_v27  ;;  %v6372_v34 = vsel %vm6324_vm7, %v1399_v8, 0  ;;  %v1406_v35 = vor.u32 %v1405_v14, %v1401_v60  ;;  %v1417_v43 = vshll.u32 %v3955_v18, 16  ;;  %v1235_v56 = vrot.slane %v6204_v29, 4  ;;  %v4762_v18 = vld [vmem:[#allocation15 + $0x144] ss:$16 sps:$4 sm:$0xff]  }
 0x2de   : > { %2286 = vmatprep.subr.bf16.mxu0 %v4754_v4  ;;  %v6376_v11 = vcombine.low %v6362_v19, %v6372_v34  ;;  %v1413_v46 = vor.u32 %v1412_v22, %v1408_v63  ;;  %v1422_v50 = vshrl.u32 %v3956_v33, 16  ;;  %v1424_v51 = vshll.u32 %v3956_v33, 16  ;;  %v4764_v12 = vld [vmem:[#allocation15 + $0x160] ss:$16 sps:$4 sm:$0xff]  }
 0x2df   : > { %4276 = vmatpush3.bf16.msra.mxu1 %v4751_v49  ;;  %v6380_v52 = vsel %vm6324_vm7, %v1406_v35, 0  ;;  %v1419_v27 = vrot.slane %v1417_v43, 1  ;;  %v1236_v60 = vrot.slane %v6242_v6, 4  ;;  %v1237_v14 = vrot.slane %v6272_v55, 4 }
 0x2e0   : > { %1787 = vmatmul.mubr.bf16.vlgmr.msra.gmra.mrb[12].mxu0 %v6316_v44  ;;  %4277 = vmatprep.subr.bf16.mxu1 %v4755_v15  ;;  %v6387_v4 = vsel %vm6324_vm7, %v1413_v46, 0  ;;  %v1426_v63 = vrot.slane %v1424_v51, 1  ;;  %v6409_v35 = vcombine.low %v1232_v17, %v1233_v53  ;;  %v6419_v46 = vcombine.low %v1234_v10, %v1235_v56 }
 0x2e1   : > { %2287 = vmatpush1.bf16.msra.mxu0 %v4752_v26  ;;  %1796 = vmatprep.mubr.bf16.mxu0 %v5386_v0  ;;  %v6396_v44 = vcombine.low %v6380_v52, %v6387_v4  ;;  %v1420_v7 = vor.u32 %v1419_v27, %v1415_v40  ;;  %v6398_v8 = vcombine.low %v1235_v56, %v1236_v60  ;;  %v4760_v27 = vld [vmem:[#allocation15 + $0x140] ss:$16 sps:$4 sm:$0xff]   ;;  %v1323_v49 = vshrl.u32 %v6289_v45, 16 }
 0x2e2   : > { %2288 = vmatprep.subr.bf16.mxu0 %v4758_v47  ;;  %v1427_v22 = vor.u32 %v1426_v63, %v1422_v50  ;;  %v4763_v50 = vld [vmem:[#allocation17 + $0x74] ss:$8 sps:$4 sm:$0xff]   ;;  %v6427_v53 = vcombine.low %v1236_v60, %v1237_v14  ;;  %v3947_v56 = vcombine.high %v6272_v55, %v6272_v55  ;;  %v1438_v33 = vshll.u32 %v6293_v59, 16 }
 0x2e3   : > { %4278 = vmatpush3.bf16.msra.mxu1 %v4755_v15  ;;  %v6413_v40 = vsel %vm6324_vm7, %v1420_v7, 0  ;;  %v3957_v7 = vcombine.low %v6272_v55, %v6272_v55  ;;  %v4766_v60 = vld [vmem:[#allocation15 + $0x164] ss:$16 sps:$4 sm:$0xff]   ;;  %v1326_v15 = vshll.u32 %v6289_v45, 16  ;;  %v4769_v63 = vld [vmem:[#allocation15 + $0x10c] ss:$16 sps:$4 sm:$0xff]  }
 0x2e4   : > { %4279 = vmatprep.subr.bf16.mxu1 %v4759_v62  ;;  %v6423_v51 = vsel %vm6324_vm7, %v1427_v22, 0  ;;  %v1316_v17 = vshrl.u32 %v3947_v56, 16  ;;  %v1319_v48 = vshll.u32 %v3947_v56, 16  ;;  %v1325_v26 = vrot.slane %v1323_v49, 7  ;;  %v4772_v56 = vld [vmem:[#allocation15 + $0x184] ss:$16 sps:$4 sm:$0xff]  }
 0x2e5   : > { %2289 = vmatpush1.bf16.msra.mxu0 %v4756_v5  ;;  %v6433_v10 = vcombine.low %v6413_v40, %v6423_v51  ;;  %v1238_v5 = vrot.slane %v6270_v54, 4  ;;  %v1429_v47 = vshrl.u32 %v3957_v7, 16  ;;  %v1431_v43 = vshll.u32 %v3957_v7, 16  ;;  %v4775_v49 = vld [vmem:[#allocation15 + $0x12c] ss:$16 sps:$4 sm:$0xff]  }
 0x2e6   : > { %2290 = vmatprep.subr.bf16.mxu0 %v4762_v18  ;;  %v1436_v22 = vshrl.u32 %v6293_v59, 16  ;;  %v1318_v45 = vrot.slane %v1316_v17, 7  ;;  %v1328_v7 = vor.u32 %v1326_v15, %v1325_v26  ;;  %v1440_v32 = vrot.slane %v1438_v33, 1  ;;  %v4784_v15 = vld [vmem:[#allocation15 + $0x1c4] ss:$16 sps:$4 sm:$0xff]  }
 0x2e7   : > { %4280 = vmatpush3.bf16.msra.mxu1 %v4759_v62  ;;  %v6447_v18 = vcombine.low %v1237_v14, %v1238_v5  ;;  %v1433_v62 = vrot.slane %v1431_v43, 1 }
 0x2e8   : > { %1797 = vmatmul.mubr.bf16.gmra.mrb[16].mxu0 %v6330_v30  ;;  %4281 = vmatprep.subr.bf16.mxu1 %v4763_v50  ;;  %v1321_v25 = vor.u32 %v1319_v48, %v1318_v45  ;;  %v1351_v5 = vsel %vm6208_vm3, 0, %v1328_v7  ;;  %v1441_v59 = vor.u32 %v1440_v32, %v1436_v22  ;;  %v4778_v48 = vld [vmem:[#allocation15 + $0x1a4] ss:$16 sps:$4 sm:$0xff]   ;;  %v4785_v22 = vld [vmem:[#allocation15 + $0x168] ss:$16 sps:$4 sm:$0xff]  }
 0x2e9   : > { %2291 = vmatpush1.bf16.msra.mxu0 %v4760_v27  ;;  %1806 = vmatprep.mubr.bf16.mxu0 %v5386_v0  ;;  %v1434_v14 = vor.u32 %v1433_v62, %v1429_v47  ;;  %v4770_v27 = vld [vmem:[#allocation15 + $0x180] ss:$16 sps:$4 sm:$0xff]   ;;  %v4781_v47 = vld [vmem:[#allocation15 + $0x14c] ss:$16 sps:$4 sm:$0xff]   ;;  %v4791_v7 = vld [vmem:[#allocation15 + $0x188] ss:$16 sps:$4 sm:$0xff]  }
 0x2ea   : > { %2292 = vmatprep.subr.bf16.mxu0 %v4766_v60  ;;  %v6456_v17 = vsel %vm6208_vm3, 0, %v1321_v25  ;;  %v1464_v31 = vsel %vm6324_vm7, %v1441_v59, 0  ;;  %v4773_v25 = vld [vmem:[#allocation15 + $0x128] ss:$16 sps:$4 sm:$0xff]   ;;  %v4790_v60 = vld [vmem:[#allocation15 + $0x1e4] ss:$16 sps:$4 sm:$0xff]   ;;  %v6911_v59 = vcombine.low %v6154_v37, %v6156_v38  ;;  %v6912_v37 = vcombine.low %v6191_v16, %v6194_v21 }
 0x2eb   : > { %4282 = vmatpush3.bf16.msra.mxu1 %v4763_v50  ;;  %v6460_v26 = vsel %vm6324_vm7, %v1434_v14, 0  ;;  %v4066_v33 = vcombine.low %v6320_v23, %v6456_v17  ;;  %v4776_v50 = vld [vmem:[#allocation15 + $0x1a0] ss:$16 sps:$4 sm:$0xff]   ;;  %v4793_v45 = vld [vmem:[#allocation15 + $0x18c] ss:$16 sps:$4 sm:$0xff]   ;;  %v6913_v16 = vcombine.low %v6202_v28, %v6204_v29  ;;  %v6914_v28 = vcombine.low %v6242_v6, %v6272_v55 }
 0x2ec   : > { %2464 = vmatprep.subr.bf16.mxu1 %v4769_v63  ;;  %v4078_v32 = vcombine.low %v6423_v51, %v6460_v26  ;;  %v6474_v43 = vcombine.low %v6460_v26, %v1464_v31  ;;  %v4787_v63 = vld [vmem:[#allocation15 + $0x16c] ss:$16 sps:$4 sm:$0xff]   ;;  %v4788_v62 = vld [vmem:[#allocation15 + $0x1e0] ss:$16 sps:$4 sm:$0xff]   ;;  %v4799_v31 = vld [vmem:[#allocation15 + $0x1c8] ss:$16 sps:$4 sm:$0xff]   ;;  %v6916_v6 = vcombine.low %v6254_v20, %v6281_v41  ;;  %v6918_v41 = vcombine.low %v6353_v1, %v6362_v19 }
 0x2ed   : > { %2293 = vmatpush1.bf16.msra.mxu0 %v4764_v12  ;;  %v6468_v12 = vcombine.low %v6456_v17, %v1351_v5  ;;  %v4797_v14 = vld [vmem:[#allocation15 + $0x1ac] ss:$16 sps:$4 sm:$0xff]   ;;  %v4795_v5 = vld [vmem:[#allocation15 + $0x1a8] ss:$16 sps:$4 sm:$0xff]   ;;  %v4830_v20 = vld [vmem:[#allocation15 + $0x264] ss:$16 sps:$4 sm:$0xff]   ;;  %v6919_v1 = vcombine.low %v6372_v34, %v6380_v52  ;;  %v6920_v19 = vcombine.low %v6387_v4, %v6413_v40 }
 0x2ee   : > { %4284 = vmatmul.mubr.bf16.vlgmr.msra.gmra.mrb[20].mxu1 %v6376_v11  ;;  %2294 = vmatprep.subr.bf16.mxu0 %v4772_v56  ;;  %v4794_v56 = vld [vmem:[#allocation17 + $0x80] ss:$8 sps:$4 sm:$0xff]   ;;  %v4807_v38 = vld [vmem:[#allocation17 + $0x84] ss:$8 sps:$4 sm:$0xff]   ;;  %v4862_v51 = vld [vmem:[#allocation17 + $0x110] ss:$8 sps:$4 sm:$0xff]  }
 0x2ef   : > { %4287 = vmatprep.mubr.bf16.mxu1 %v6396_v44  ;;  %2465 = vmatpush1.bf16.msra.mxu1 %v4767_v61  ;;  %v4782_v61 = vld [vmem:[#allocation15 + $0x1c0] ss:$16 sps:$4 sm:$0xff]   ;;  %v4811_v21 = vld [vmem:[#allocation17 + $0xa4] ss:$8 sps:$4 sm:$0xff]   ;;  %v4837_v17 = vld [vmem:[#allocation15 + $0x228] ss:$16 sps:$4 sm:$0xff]  }
 0x2f0   : > { %1807 = vmatmul.mubr.bf16.gmra.mrb[20].mxu0 %v6366_v42  ;;  %2466 = vmatprep.subr.bf16.mxu1 %v4775_v49  ;;  %v4798_v49 = vld [vmem:[#allocation17 + $0x90] ss:$8 sps:$4 sm:$0xff]   ;;  %v4815_v29 = vld [vmem:[#allocation17 + $0xc4] ss:$8 sps:$4 sm:$0xff]  }
 0x2f1   : > { %2295 = vmatpush1.bf16.msra.mxu0 %v4770_v27  ;;  %1816 = vmatprep.mubr.bf16.mxu0 %v5386_v0  ;;  %v4801_v27 = vld [vmem:[#allocation15 + $0x1cc] ss:$16 sps:$4 sm:$0xff]   ;;  %v4842_v23 = vld [vmem:[#allocation15 + $0x2a4] ss:$16 sps:$4 sm:$0xff]   ;;  %v4846_v34 = vld [vmem:[#allocation15 + $0x2c0] ss:$16 sps:$4 sm:$0xff]  }
 0x2f2   : > { %2296 = vmatprep.subr.bf16.mxu0 %v4778_v48  ;;  %v4802_v48 = vld [vmem:[#allocation17 + $0xa0] ss:$8 sps:$4 sm:$0xff]   ;;  %v4854_v52 = vld [vmem:[#allocation15 + $0x2e4] ss:$16 sps:$4 sm:$0xff]   ;;  %v4857_v40 = vld [vmem:[#allocation15 + $0x28c] ss:$16 sps:$4 sm:$0xff]  }
 0x2f3   : > { %2467 = vmatpush1.bf16.msra.mxu1 %v4773_v25  ;;  %v4805_v25 = vld [vmem:[#allocation15 + $0x1ec] ss:$16 sps:$4 sm:$0xff]   ;;  %v4849_v4 = vld [vmem:[#allocation15 + $0x268] ss:$16 sps:$4 sm:$0xff]  }
 0x2f4   : > { %2468 = vmatprep.subr.bf16.mxu1 %v4781_v47  ;;  %v4806_v47 = vld [vmem:[#allocation17 + $0xb0] ss:$8 sps:$4 sm:$0xff]  }
 0x2f5   : > { %2297 = vmatpush1.bf16.msra.mxu0 %v4776_v50  ;;  %v4803_v50 = vld [vmem:[#allocation15 + $0x1e8] ss:$16 sps:$4 sm:$0xff]  }
 0x2f6   : > { %4288 = vmatmul.mubr.bf16.gmra.mrb[24].mxu1 %v6433_v10  ;;  %2298 = vmatprep.subr.bf16.mxu0 %v4784_v15  ;;  %v4808_v15 = vld [vmem:[#allocation17 + $0xc0] ss:$8 sps:$4 sm:$0xff]  }
 0x2f7   : > { %2469 = vmatpush1.bf16.msra.mxu1 %v4779_v24  ;;  %2496 = vmatprep.mubr.bf16.mxu1 %v5386_v0  ;;  %v4809_v24 = vld [vmem:[#allocation17 + $0x94] ss:$8 sps:$4 sm:$0xff]   ;;  %v4859_v26 = vld [vmem:[#allocation15 + $0x2a8] ss:$16 sps:$4 sm:$0xff]  }
 0x2f8   : > { %1817 = vmatmul.mubr.bf16.gmra.mrb[24].mxu0 %v6398_v8  ;;  %2470 = vmatprep.subr.bf16.mxu1 %v4787_v63  ;;  %v4810_v63 = vld [vmem:[#allocation17 + $0xd0] ss:$8 sps:$4 sm:$0xff]  }
 0x2f9   : > { %2299 = vmatpush1.bf16.msra.mxu0 %v4782_v61  ;;  %2318 = vmatprep.mubr.bf16.mxu0 %v5386_v0  ;;  %v4812_v61 = vld [vmem:[#allocation17 + $0xe0] ss:$8 sps:$4 sm:$0xff]  }
 0x2fa   : > { %2300 = vmatprep.subr.bf16.mxu0 %v4790_v60  ;;  %v4813_v60 = vld [vmem:[#allocation17 + $0xb4] ss:$8 sps:$4 sm:$0xff]  }
 0x2fb   : > { %2471 = vmatpush1.bf16.msra.mxu1 %v4785_v22  ;;  %v6915_v22 = vcombine.low %v6235_v3, %v6248_v13  ;;  %v4823_v3 = vld [vmem:[#allocation17 + $0xe4] ss:$8 sps:$4 sm:$0xff]   ;;  %v6917_v13 = vcombine.low %v6285_v2, %v6310_v9  ;;  %v4828_v9 = vld [vmem:[#allocation15 + $0x260] ss:$16 sps:$4 sm:$0xff]  }
 0x2fc   : > { %2472 = vmatprep.subr.bf16.mxu1 %v4793_v45  ;;  %v4818_v45 = vld [vmem:[#allocation15 + $0x204] ss:$16 sps:$4 sm:$0xff]   ;;  %v4833_v2 = vld [vmem:[#allocation15 + $0x20c] ss:$16 sps:$4 sm:$0xff]  }
 0x2fd   : > { %2301 = vmatpush1.bf16.msra.mxu0 %v4788_v62  ;;  %v4816_v62 = vld [vmem:[#allocation15 + $0x200] ss:$16 sps:$4 sm:$0xff]  }
 0x2fe   : > { %4291 = vmatprep.subr.bf16.mxu0 %v4794_v56 }
 0x2ff   : > { %2473 = vmatpush1.bf16.msra.mxu1 %v4791_v7  ;;  %v4820_v7 = vld [vmem:[#allocation15 + $0x220] ss:$16 sps:$4 sm:$0xff]  }
 0x300   : > { %2319 = vmatmul.mubr.bf16.vlgmr.msra.gmra.mrb[28].mxu0 %v6911_v59  ;;  %2474 = vmatprep.subr.bf16.mxu1 %v4797_v14  ;;  %v4826_v14 = vld [vmem:[#allocation15 + $0x244] ss:$16 sps:$4 sm:$0xff]   ;;  %v4839_v59 = vld [vmem:[#allocation15 + $0x22c] ss:$16 sps:$4 sm:$0xff]  }
 0x301   : > { %4292 = vmatpush3.bf16.msra.mxu0 %v4794_v56  ;;  %2328 = vmatprep.mubr.bf16.mxu0 %v5386_v0  ;;  %v4822_v56 = vld [vmem:[#allocation15 + $0x224] ss:$16 sps:$4 sm:$0xff]  }
 0x302   : > { %4293 = vmatprep.subr.bf16.mxu0 %v4798_v49 }
 0x303   : > { %2475 = vmatpush1.bf16.msra.mxu1 %v4795_v5  ;;  %v4836_v5 = vld [vmem:[#allocation15 + $0x284] ss:$16 sps:$4 sm:$0xff]  }
 0x304   : > { %2476 = vmatprep.subr.bf16.mxu1 %v4801_v27  ;;  %v4834_v27 = vld [vmem:[#allocation15 + $0x280] ss:$16 sps:$4 sm:$0xff]  }
 0x305   : > { %4294 = vmatpush3.bf16.msra.mxu0 %v4798_v49  ;;  %v4824_v49 = vld [vmem:[#allocation15 + $0x240] ss:$16 sps:$4 sm:$0xff]  }
 0x306   : > { %4295 = vmatprep.subr.bf16.mxu0 %v4802_v48 }
 0x307   : > { %2477 = vmatpush1.bf16.msra.mxu1 %v4799_v31  ;;  %v4848_v31 = vld [vmem:[#allocation15 + $0x2c4] ss:$16 sps:$4 sm:$0xff]  }
 0x308   : > { %2329 = vmatmul.mubr.bf16.gmra.mrb[32].mxu0 %v6912_v37  ;;  %2478 = vmatprep.subr.bf16.mxu1 %v4805_v25  ;;  %v4843_v25 = vld [vmem:[#allocation15 + $0x248] ss:$16 sps:$4 sm:$0xff]  }
 0x309   : > { %4296 = vmatpush3.bf16.msra.mxu0 %v4802_v48  ;;  %2338 = vmatprep.mubr.bf16.mxu0 %v5386_v0  ;;  %v4840_v48 = vld [vmem:[#allocation15 + $0x2a0] ss:$16 sps:$4 sm:$0xff]  }
 0x30a   : > { %4297 = vmatprep.subr.bf16.mxu0 %v4806_v47  ;;  %v4858_v37 = vld [vmem:[#allocation17 + $0x100] ss:$8 sps:$4 sm:$0xff]  }
 0x30b   : > { %2479 = vmatpush1.bf16.msra.mxu1 %v4803_v50  ;;  %v4852_v50 = vld [vmem:[#allocation15 + $0x2e0] ss:$16 sps:$4 sm:$0xff]  }
 0x30c   : > { %4315 = vmatprep.subr.bf16.mxu1 %v4807_v38 }
 0x30d   : > { %4298 = vmatpush3.bf16.msra.mxu0 %v4806_v47  ;;  %v4851_v47 = vld [vmem:[#allocation15 + $0x26c] ss:$16 sps:$4 sm:$0xff]  }
 0x30e   : > { %2497 = vmatmul.mubr.bf16.vlgmr.msra.gmra.mrb[28].mxu1 %v6332_v36  ;;  %4299 = vmatprep.subr.bf16.mxu0 %v4808_v15  ;;  %v4814_v36 = vld [vmem:[#allocation17 + $0xf0] ss:$8 sps:$4 sm:$0xff]  }
 0x30f   : > { %4316 = vmatpush3.bf16.msra.mxu1 %v4807_v38  ;;  %2506 = vmatprep.mubr.bf16.mxu1 %v5386_v0  ;;  %v4855_v38 = vld [vmem:[#allocation15 + $0x288] ss:$16 sps:$4 sm:$0xff]  }
 0x310   : > { %2339 = vmatmul.mubr.bf16.gmra.mrb[36].mxu0 %v6913_v16  ;;  %4317 = vmatprep.subr.bf16.mxu1 %v4809_v24  ;;  %v4869_v16 = vld [vmem:[#allocation15 + $0x2ec] ss:$16 sps:$4 sm:$0xff]  }
 0x311   : > { %4300 = vmatpush3.bf16.msra.mxu0 %v4808_v15  ;;  %2348 = vmatprep.mubr.bf16.mxu0 %v5386_v0  ;;  %v4861_v15 = vld [vmem:[#allocation15 + $0x2ac] ss:$16 sps:$4 sm:$0xff]  }
 0x312   : > { %4301 = vmatprep.subr.bf16.mxu0 %v4810_v63 }
 0x313   : > { %4318 = vmatpush3.bf16.msra.mxu1 %v4809_v24  ;;  %v4866_v24 = vld [vmem:[#allocation17 + $0x120] ss:$8 sps:$4 sm:$0xff]  }
 0x314   : > { %4319 = vmatprep.subr.bf16.mxu1 %v4811_v21 }
 0x315   : > { %4302 = vmatpush3.bf16.msra.mxu0 %v4810_v63  ;;  %v4863_v63 = vld [vmem:[#allocation15 + $0x2c8] ss:$16 sps:$4 sm:$0xff]  }
 0x316   : > { %2507 = vmatmul.mubr.bf16.gmra.mrb[32].mxu1 %v6409_v35  ;;  %4303 = vmatprep.subr.bf16.mxu0 %v4812_v61  ;;  %v4819_v35 = vld [vmem:[#allocation17 + $0xd4] ss:$8 sps:$4 sm:$0xff]  }
 0x317   : > { %4320 = vmatpush3.bf16.msra.mxu1 %v4811_v21  ;;  %2516 = vmatprep.mubr.bf16.mxu1 %v5386_v0  ;;  %v4870_v21 = vld [vmem:[#allocation17 + $0x130] ss:$8 sps:$4 sm:$0xff]  }
 0x318   : > { %2349 = vmatmul.mubr.bf16.gmra.mrb[40].mxu0 %v6914_v28  ;;  %4321 = vmatprep.subr.bf16.mxu1 %v4813_v60  ;;  %v4874_v28 = vld [vmem:[#allocation17 + $0x150] ss:$8 sps:$4 sm:$0xff]  }
 0x319   : > { %4304 = vmatpush3.bf16.msra.mxu0 %v4812_v61  ;;  %4307 = vmatprep.mubr.bf16.mxu0 %v6915_v22  ;;  %v4867_v61 = vld [vmem:[#allocation15 + $0x2e8] ss:$16 sps:$4 sm:$0xff]   ;;  %v4877_v22 = vld [vmem:[#allocation17 + $0x134] ss:$8 sps:$4 sm:$0xff]  }
 0x31a   : > { %4305 = vmatprep.subr.bf16.mxu0 %v4814_v36 }
 0x31b   : > { %4322 = vmatpush3.bf16.msra.mxu1 %v4813_v60  ;;  %v4872_v60 = vld [vmem:[#allocation17 + $0x140] ss:$8 sps:$4 sm:$0xff]  }
 0x31c   : > { %4323 = vmatprep.subr.bf16.mxu1 %v4815_v29 }
 0x31d   : > { %4306 = vmatpush3.bf16.msra.mxu0 %v4814_v36  ;;  %v4873_v36 = vld [vmem:[#allocation17 + $0x114] ss:$8 sps:$4 sm:$0xff]  }
 0x31e   : > { %2517 = vmatmul.mubr.bf16.gmra.mrb[36].mxu1 %v6419_v46  ;;  %2963 = vmatprep.subr.bf16.mxu0 %v4818_v45  ;;  %v4827_v46 = vld [vmem:[#allocation17 + $0xf4] ss:$8 sps:$4 sm:$0xff]   ;;  %v4879_v45 = vld [vmem:[#allocation17 + $0x144] ss:$8 sps:$4 sm:$0xff]  }
 0x31f   : > { %4324 = vmatpush3.bf16.msra.mxu1 %v4815_v29  ;;  %2526 = vmatprep.mubr.bf16.mxu1 %v5386_v0  ;;  %v4876_v29 = vld [vmem:[#allocation17 + $0x160] ss:$8 sps:$4 sm:$0xff]  }
 0x320   : > { %4308 = vmatmul.mubr.bf16.vlgmr.msra.gmra.mrb[44].mxu0 %v6916_v6  ;;  %4325 = vmatprep.subr.bf16.mxu1 %v4819_v35 }
 0x321   : > { %2964 = vmatpush1.bf16.msra.mxu0 %v4816_v62  ;;  %4311 = vmatprep.mubr.bf16.mxu0 %v6917_v13  ;;  %v4880_v62 = vld [vmem:[#allocation17 + $0x154] ss:$8 sps:$4 sm:$0xff]  }
 0x322   : > { %2965 = vmatprep.subr.bf16.mxu0 %v4822_v56  ;;  %v4882_v56 = vld [vmem:[#allocation17 + $0x174] ss:$8 sps:$4 sm:$0xff]  }
 0x323   : > { %4326 = vmatpush3.bf16.msra.mxu1 %v4819_v35  ;;  %v6922_v35 = vld [vmem:[#allocation53_spill] sm:$0xff] }
 0x324   : > { %4327 = vmatprep.subr.bf16.mxu1 %v4823_v3 }
 0x325   : > { %2966 = vmatpush1.bf16.msra.mxu0 %v4820_v7 }
 0x326   : > { %2527 = vmatmul.mubr.bf16.gmra.mrb[40].mxu1 %v6427_v53  ;;  %2967 = vmatprep.subr.bf16.mxu0 %v4826_v14  ;;  %v4831_v53 = vld [vmem:[#allocation15 + $0x208] ss:$16 sps:$4 sm:$0xff]  }
 0x327   : > { %4328 = vmatpush3.bf16.msra.mxu1 %v4823_v3  ;;  %4331 = vmatprep.mubr.bf16.mxu1 %v6918_v41 }
 0x328   : > { %4312 = vmatmul.mubr.bf16.gmra.mrb[48].mxu0 %v4066_v33  ;;  %4329 = vmatprep.subr.bf16.mxu1 %v4827_v46  ;;  %v4845_v33 = vld [vmem:[#allocation15 + $0x24c] ss:$16 sps:$4 sm:$0xff]  }
 0x329   : > { %2968 = vmatpush1.bf16.msra.mxu0 %v4824_v49  ;;  %2995 = vmatprep.mubr.bf16.mxu0 %v5386_v0 }
 0x32a   : > { %2969 = vmatprep.subr.bf16.mxu0 %v4830_v20 }
 0x32b   : > { %4330 = vmatpush3.bf16.msra.mxu1 %v4827_v46 }
 0x32c   : > { %3135 = vmatprep.subr.bf16.mxu1 %v4833_v2 }
 0x32d   : > { %2970 = vmatpush1.bf16.msra.mxu0 %v4828_v9 }
 0x32e   : > { %4332 = vmatmul.mubr.bf16.vlgmr.msra.gmra.mrb[44].mxu1 %v6919_v1  ;;  %2971 = vmatprep.subr.bf16.mxu0 %v4836_v5 }
 0x32f   : > { %4335 = vmatprep.mubr.bf16.mxu1 %v6920_v19  ;;  %3136 = vmatpush1.bf16.msra.mxu1 %v4831_v53 }
 0x330   : > { %3137 = vmatprep.subr.bf16.mxu1 %v4839_v59 }
 0x331   : > { %2972 = vmatpush1.bf16.msra.mxu0 %v4834_v27 }
 0x332   : > { %2973 = vmatprep.subr.bf16.mxu0 %v4842_v23 }
 0x333   : > { %3138 = vmatpush1.bf16.msra.mxu1 %v4837_v17 }
 0x334   : > { %3139 = vmatprep.subr.bf16.mxu1 %v4845_v33 }
 0x335   : > { %2974 = vmatpush1.bf16.msra.mxu0 %v4840_v48 }
 0x336   : > { %4336 = vmatmul.mubr.bf16.gmra.mrb[48].mxu1 %v4078_v32  ;;  %2975 = vmatprep.subr.bf16.mxu0 %v4848_v31  ;;  %v4865_v32 = vld [vmem:[#allocation15 + $0x2cc] ss:$16 sps:$4 sm:$0xff]  }
 0x337   : > { %3140 = vmatpush1.bf16.msra.mxu1 %v4843_v25  ;;  %3167 = vmatprep.mubr.bf16.mxu1 %v5386_v0 }
 0x338   : > { %3141 = vmatprep.subr.bf16.mxu1 %v4851_v47 }
 0x339   : > { %2976 = vmatpush1.bf16.msra.mxu0 %v4846_v34 }
 0x33a   : > { %2977 = vmatprep.subr.bf16.mxu0 %v4854_v52 }
 0x33b   : > { %3142 = vmatpush1.bf16.msra.mxu1 %v4849_v4 }
 0x33c   : > { %3143 = vmatprep.subr.bf16.mxu1 %v4857_v40 }
 0x33d   : > { %2978 = vmatpush1.bf16.msra.mxu0 %v4852_v50 }
 0x33e   : > { %4339 = vmatprep.subr.bf16.mxu0 %v4858_v37 }
 0x33f   : > { %3144 = vmatpush1.bf16.msra.mxu1 %v4855_v38 }
 0x340   : > { %2996 = vmatmul.mubr.bf16.vlgmr.msra.gmra.mrb[52].mxu0 %v6215_v39  ;;  %3145 = vmatprep.subr.bf16.mxu1 %v4861_v15  ;;  %v4871_v39 = vld [vmem:[#allocation17 + $0x104] ss:$8 sps:$4 sm:$0xff]  }
 0x341   : > { %4340 = vmatpush3.bf16.msra.mxu0 %v4858_v37  ;;  %3005 = vmatprep.mubr.bf16.mxu0 %v5386_v0 }
 0x342   : > { %4341 = vmatprep.subr.bf16.mxu0 %v4862_v51 }
 0x343   : > { %3146 = vmatpush1.bf16.msra.mxu1 %v4859_v26 }
 0x344   : > { %3147 = vmatprep.subr.bf16.mxu1 %v4865_v32 }
 0x345   : > { %4342 = vmatpush3.bf16.msra.mxu0 %v4862_v51 }
 0x346   : > { %4343 = vmatprep.subr.bf16.mxu0 %v4866_v24 }
 0x347   : > { %3148 = vmatpush1.bf16.msra.mxu1 %v4863_v63 }
 0x348   : > { %3006 = vmatmul.mubr.bf16.gmra.mrb[56].mxu0 %v6228_v58  ;;  %3149 = vmatprep.subr.bf16.mxu1 %v4869_v16  ;;  %v4875_v58 = vld [vmem:[#allocation17 + $0x124] ss:$8 sps:$4 sm:$0xff]  }
 0x349   : > { %4344 = vmatpush3.bf16.msra.mxu0 %v4866_v24  ;;  %3015 = vmatprep.mubr.bf16.mxu0 %v5386_v0 }
 0x34a   : > { %4345 = vmatprep.subr.bf16.mxu0 %v4870_v21 }
 0x34b   : > { %3150 = vmatpush1.bf16.msra.mxu1 %v4867_v61 }
 0x34c   : > { %4363 = vmatprep.subr.bf16.mxu1 %v4871_v39 }
 0x34d   : > { %4346 = vmatpush3.bf16.msra.mxu0 %v4870_v21 }
 0x34e   : > { %3168 = vmatmul.mubr.bf16.vlgmr.msra.gmra.mrb[52].mxu1 %v6330_v30  ;;  %4347 = vmatprep.subr.bf16.mxu0 %v4872_v60  ;;  %v4878_v30 = vld [vmem:[#allocation17 + $0x170] ss:$8 sps:$4 sm:$0xff]  }
 0x34f   : > { %4364 = vmatpush3.bf16.msra.mxu1 %v4871_v39  ;;  %3177 = vmatprep.mubr.bf16.mxu1 %v5386_v0 }
 0x350   : > { %3016 = vmatmul.mubr.bf16.gmra.mrb[60].mxu0 %v6276_v57  ;;  %4365 = vmatprep.subr.bf16.mxu1 %v4873_v36  ;;  %v6921_v57 = vcombine.low %v6272_v55, %v6270_v54  ;;  %v4881_v54 = vld [vmem:[#allocation17 + $0x164] ss:$8 sps:$4 sm:$0xff]   ;;  %v6924_v55 = vld [vmem:[#allocation55_spill] sm:$0xff] }
 0x351   : > { %4348 = vmatpush3.bf16.msra.mxu0 %v4872_v60  ;;  %3025 = vmatprep.mubr.bf16.mxu0 %v5386_v0 }
 0x352   : > { %4349 = vmatprep.subr.bf16.mxu0 %v4874_v28 }
 0x353   : > { %4366 = vmatpush3.bf16.msra.mxu1 %v4873_v36 }
 0x354   : > { %4367 = vmatprep.subr.bf16.mxu1 %v4875_v58 }
 0x355   : > { %4350 = vmatpush3.bf16.msra.mxu0 %v4874_v28 }
 0x356   : > { %3178 = vmatmul.mubr.bf16.gmra.mrb[56].mxu1 %v6366_v42  ;;  %4351 = vmatprep.subr.bf16.mxu0 %v4876_v29  ;;  %v6923_v42 = vld [vmem:[#allocation54_spill] sm:$0xff] }
 0x357   : > { %4368 = vmatpush3.bf16.msra.mxu1 %v4875_v58  ;;  %3187 = vmatprep.mubr.bf16.mxu1 %v5386_v0 }
 0x358   : > { %3026 = vmatmul.mubr.bf16.gmra.mrb[64].mxu0 %v6921_v57  ;;  %4369 = vmatprep.subr.bf16.mxu1 %v4877_v22 }
 0x359   : > { %4352 = vmatpush3.bf16.msra.mxu0 %v4876_v29  ;;  %4355 = vmatprep.mubr.bf16.mxu0 %v6922_v35 }
 0x35a   : > { %4353 = vmatprep.subr.bf16.mxu0 %v4878_v30 }
 0x35b   : > { %4370 = vmatpush3.bf16.msra.mxu1 %v4877_v22 }
 0x35c   : > { %4371 = vmatprep.subr.bf16.mxu1 %v4879_v45 }
 0x35d   : > { %4354 = vmatpush3.bf16.msra.mxu0 %v4878_v30 }
 0x35e   : > { %3188 = vmatmul.mubr.bf16.gmra.mrb[60].mxu1 %v6398_v8 }
 0x35f   : > { %4372 = vmatpush3.bf16.msra.mxu1 %v4879_v45  ;;  %3197 = vmatprep.mubr.bf16.mxu1 %v5386_v0 }
 0x360   : > { %4356 = vmatmul.mubr.bf16.vlgmr.msra.gmra.mrb[68].mxu0 %v6923_v42  ;;  %4373 = vmatprep.subr.bf16.mxu1 %v4880_v62 }
 0x361   : > { %4359 = vmatprep.mubr.bf16.mxu0 %v6924_v55 }
 0x363   : > { %4374 = vmatpush3.bf16.msra.mxu1 %v4880_v62 }
 0x364   : > { %4375 = vmatprep.subr.bf16.mxu1 %v4881_v54 }
 0x366   : > { %3198 = vmatmul.mubr.bf16.gmra.mrb[64].mxu1 %v6447_v18 }
 0x367   : > { %4376 = vmatpush3.bf16.msra.mxu1 %v4881_v54  ;;  %4379 = vmatprep.mubr.bf16.mxu1 %v6376_v11 }
 0x368   : > { %4360 = vmatmul.mubr.bf16.gmra.mrb[72].mxu0 %v6468_v12  ;;  %4377 = vmatprep.subr.bf16.mxu1 %v4882_v56 }
 0x36b   : > { %4378 = vmatpush3.bf16.msra.mxu1 %v4882_v56 }
 0x36e   : > { %4380 = vmatmul.mubr.bf16.vlgmr.msra.gmra.mrb[68].mxu1 %v6396_v44 }
 0x36f   : > { %4383 = vmatprep.mubr.bf16.mxu1 %v6433_v10 }
 0x376   : > { %4384 = vmatmul.mubr.bf16.gmra.mrb[72].mxu1 %v6474_v43 }
 0x3a1   : > { %v4261_v0 = vpop.f32.mrb[12].mxu1 }
 0x3a2   : > { %v1965_v8 = vpop.f32.mrb[13].mxu1 }
 0x3a3   : > { %v4262_v6 = vpop.f32.mrb[14].mxu1 }
 0x3a4   : > { %v1968_v3 = vpop.f32.mrb[15].mxu1 }
 0x3ab   : > { %v4265_v13 = vpop.f32.mrb[16].mxu1 }
 0x3ac   : > { %v1981_v7 = vpop.f32.mrb[17].mxu1 }
 0x3ad   : > { %v4266_v18 = vpop.f32.mrb[18].mxu1 }
 0x3ae   : > { %v1984_v14 = vpop.f32.mrb[19].mxu1 }
 0x3b3   : > { %v1788_v46 = vpop.f32.mrb[12].mxu0 }
 0x3b4   : > { %v1996_v11 = vadd.f32 %v1965_v8, %v1788_v46  ;;  %v1790_v49 = vpop.f32.mrb[13].mxu0 }
 0x3b5   : > { %v1792_v12 = vpop.f32.mrb[14].mxu0 }
 0x3b6   : > { %v1997_v20 = vadd.f32 %v1968_v3, %v1792_v12  ;;  %v1794_v41 = vpop.f32.mrb[15].mxu0 }
 0x3bb   : > { %v1798_v2 = vpop.f32.mrb[16].mxu0 }
 0x3bc   : > { %v1998_v44 = vadd.f32 %v4261_v0, %v1798_v2  ;;  %v1800_v9 = vpop.f32.mrb[17].mxu0 }
 0x3bd   : > { %v1802_v10 = vpop.f32.mrb[18].mxu0 }
 0x3be   : > { %v1999_v5 = vadd.f32 %v4262_v6, %v1802_v10  ;;  %v1804_v43 = vpop.f32.mrb[19].mxu0 }
 0x3c1   : > { %v4285_v53 = vpop.f32.mrb[20].mxu1 }
 0x3c2   : > { %v2175_v59 = vadd.f32 %v4285_v53, %v1800_v9  ;;  %v2142_v27 = vpop.f32.mrb[21].mxu1 }
 0x3c3   : > { %v2173_v1 = vadd.f32 %v2142_v27, %v1790_v49  ;;  %v1808_v23 = vpop.f32.mrb[20].mxu0  ;;  %v4286_v19 = vpop.f32.mrb[22].mxu1 }
 0x3c4   : > { %v2000_v17 = vadd.f32 %v1981_v7, %v1808_v23  ;;  %v2176_v33 = vadd.f32 %v4286_v19, %v1804_v43  ;;  %v1810_v48 = vpop.f32.mrb[21].mxu0  ;;  %v2145_v31 = vpop.f32.mrb[23].mxu1 }
 0x3c5   : > { %v2174_v25 = vadd.f32 %v2145_v31, %v1794_v41  ;;  %v1812_v47 = vpop.f32.mrb[22].mxu0 }
 0x3c6   : > { %v2001_v34 = vadd.f32 %v1984_v14, %v1812_v47  ;;  %v1814_v52 = vpop.f32.mrb[23].mxu0 }
 0x3c9   : > { %v4289_v4 = vpop.f32.mrb[24].mxu1 }
 0x3ca   : > { %v2158_v40 = vpop.f32.mrb[25].mxu1 }
 0x3cb   : > { %v2177_v50 = vadd.f32 %v2158_v40, %v1810_v48  ;;  %v1818_v37 = vpop.f32.mrb[24].mxu0  ;;  %v4290_v38 = vpop.f32.mrb[26].mxu1 }
 0x3cc   : > { %v2002_v15 = vadd.f32 %v4265_v13, %v1818_v37  ;;  %v1820_v51 = vpop.f32.mrb[25].mxu0  ;;  %v2161_v26 = vpop.f32.mrb[27].mxu1 }
 0x3cd   : > { %v2179_v32 = vadd.f32 %v4289_v4, %v1820_v51  ;;  %v2178_v24 = vadd.f32 %v2161_v26, %v1814_v52  ;;  %v1822_v63 = vpop.f32.mrb[26].mxu0 }
 0x3ce   : > { %v2003_v16 = vadd.f32 %v4266_v18, %v1822_v63  ;;  %v1824_v21 = vpop.f32.mrb[27].mxu0 }
 0x3cf   : > { %v2180_v61 = vadd.f32 %v4290_v38, %v1824_v21 }
 0x3d3   : > { %v2320_v39 = vpop.f32.mrb[28].mxu0 }
 0x3d4   : > { %v2537_v60 = vadd.f32 %v2320_v39, %v1996_v11  ;;  %v2322_v36 = vpop.f32.mrb[29].mxu0 }
 0x3d5   : > { %v2701_v28 = vadd.f32 %v2322_v36, %v2173_v1  ;;  %v2324_v58 = vpop.f32.mrb[30].mxu0 }
 0x3d6   : > { %v2538_v29 = vadd.f32 %v2324_v58, %v1997_v20  ;;  %v2326_v22 = vpop.f32.mrb[31].mxu0 }
 0x3d7   : > { %v2702_v30 = vadd.f32 %v2326_v22, %v2174_v25 }
 0x3db   : > { %v2330_v57 = vpop.f32.mrb[32].mxu0 }
 0x3dc   : > { %v2539_v45 = vadd.f32 %v2330_v57, %v1998_v44  ;;  %v2332_v35 = vpop.f32.mrb[33].mxu0 }
 0x3dd   : > { %v2703_v62 = vadd.f32 %v2332_v35, %v2175_v59  ;;  %v2334_v42 = vpop.f32.mrb[34].mxu0 }
 0x3de   : > { %v2540_v54 = vadd.f32 %v2334_v42, %v1999_v5  ;;  %v2336_v55 = vpop.f32.mrb[35].mxu0 }
 0x3df   : > { %v2704_v56 = vadd.f32 %v2336_v55, %v2176_v33 }
 0x3e1   : > { %v2498_v0 = vpop.f32.mrb[28].mxu1 }
 0x3e2   : > { %v2545_v8 = vadd.f32 %v2537_v60, %v2498_v0  ;;  %v2500_v6 = vpop.f32.mrb[29].mxu1 }
 0x3e3   : > { %v6554_v3 = vadd.f32 %v2701_v28, %v2500_v6  ;;  %v2340_v13 = vpop.f32.mrb[36].mxu0  ;;  %v2502_v7 = vpop.f32.mrb[30].mxu1 }
 0x3e4   : > { %v2541_v18 = vadd.f32 %v2340_v13, %v2000_v17  ;;  %v2546_v14 = vadd.f32 %v2538_v29, %v2502_v7  ;;  %v2342_v46 = vpop.f32.mrb[37].mxu0  ;;  %v2504_v11 = vpop.f32.mrb[31].mxu1 }
 0x3e5   : > { %v2705_v49 = vadd.f32 %v2342_v46, %v2177_v50  ;;  %v2710_v12 = vadd.f32 %v2702_v30, %v2504_v11  ;;  %v2344_v20 = vpop.f32.mrb[38].mxu0 }
 0x3e6   : > { %v2542_v41 = vadd.f32 %v2344_v20, %v2001_v34  ;;  %v2346_v2 = vpop.f32.mrb[39].mxu0 }
 0x3e7   : > { %v2706_v44 = vadd.f32 %v2346_v2, %v2178_v24 }
 0x3e9   : > { %v2508_v9 = vpop.f32.mrb[32].mxu1 }
 0x3ea   : > { %v2547_v10 = vadd.f32 %v2539_v45, %v2508_v9  ;;  %v2510_v5 = vpop.f32.mrb[33].mxu1 }
 0x3eb   : > { %v2711_v43 = vadd.f32 %v2703_v62, %v2510_v5  ;;  %v2350_v53 = vpop.f32.mrb[40].mxu0  ;;  %v2512_v59 = vpop.f32.mrb[34].mxu1 }
 0x3ec   : > { %v2543_v27 = vadd.f32 %v2350_v53, %v2002_v15  ;;  %v2548_v1 = vadd.f32 %v2540_v54, %v2512_v59  ;;  %v2352_v23 = vpop.f32.mrb[41].mxu0  ;;  %v2514_v19 = vpop.f32.mrb[35].mxu1 }
 0x3ed   : > { %v2707_v17 = vadd.f32 %v2352_v23, %v2179_v32  ;;  %v2712_v33 = vadd.f32 %v2704_v56, %v2514_v19  ;;  %v2354_v48 = vpop.f32.mrb[42].mxu0 }
 0x3ee   : > { %v2544_v31 = vadd.f32 %v2354_v48, %v2003_v16  ;;  %v2356_v25 = vpop.f32.mrb[43].mxu0 }
 0x3ef   : > { %v2708_v47 = vadd.f32 %v2356_v25, %v2180_v61 }
 0x3f1   : > { %v2518_v52 = vpop.f32.mrb[36].mxu1 }
 0x3f2   : > { %v2549_v34 = vadd.f32 %v2541_v18, %v2518_v52  ;;  %v2520_v4 = vpop.f32.mrb[37].mxu1 }
 0x3f3   : > { %v2713_v40 = vadd.f32 %v2705_v49, %v2520_v4  ;;  %v2522_v50 = vpop.f32.mrb[38].mxu1  ;;  %v4309_v37 = vpop.f32.mrb[44].mxu0 }
 0x3f4   : > { %v2550_v38 = vadd.f32 %v2542_v41, %v2522_v50  ;;  %v2695_v51 = vadd.f32 %v4309_v37, %v2547_v10  ;;  %v2524_v26 = vpop.f32.mrb[39].mxu1  ;;  %v2662_v24 = vpop.f32.mrb[45].mxu0 }
 0x3f5   : > { %v2714_v15 = vadd.f32 %v2706_v44, %v2524_v26  ;;  %v2693_v63 = vadd.f32 %v2662_v24, %v2545_v8  ;;  %v4310_v21 = vpop.f32.mrb[46].mxu0 }
 0x3f6   : > { %v2696_v39 = vadd.f32 %v4310_v21, %v2548_v1  ;;  %v2665_v32 = vpop.f32.mrb[47].mxu0 }
 0x3f7   : > { %v2694_v60 = vadd.f32 %v2665_v32, %v2546_v14 }
 0x3f9   : > { %v2528_v36 = vpop.f32.mrb[40].mxu1 }
 0x3fa   : > { %v2551_v16 = vadd.f32 %v2543_v27, %v2528_v36  ;;  %v2530_v28 = vpop.f32.mrb[41].mxu1 }
 0x3fb   : > { %v2715_v61 = vadd.f32 %v2707_v17, %v2530_v28  ;;  %v2532_v58 = vpop.f32.mrb[42].mxu1  ;;  %v4313_v29 = vpop.f32.mrb[48].mxu0 }
 0x3fc   : > { %v2552_v22 = vadd.f32 %v2544_v31, %v2532_v58  ;;  %v6556_v30 = vadd.f32 %v4313_v29, %v2551_v16  ;;  %v2534_v57 = vpop.f32.mrb[43].mxu1  ;;  %v2678_v45 = vpop.f32.mrb[49].mxu0 }
 0x3fd   : > { %v2716_v35 = vadd.f32 %v2708_v47, %v2534_v57  ;;  %v2697_v62 = vadd.f32 %v2678_v45, %v2549_v34  ;;  %v4314_v42 = vpop.f32.mrb[50].mxu0 }
 0x3fe   : > { %v6558_v54 = vadd.f32 %v4314_v42, %v2552_v22  ;;  %v2681_v55 = vpop.f32.mrb[51].mxu0 }
 0x3ff   : > { %v2698_v56 = vadd.f32 %v2681_v55, %v2550_v38 }
 0x401   : > { %v4333_v0 = vpop.f32.mrb[44].mxu1 }
 0x402   : > { %v2858_v8 = vadd.f32 %v4333_v0, %v2711_v43  ;;  %v2825_v6 = vpop.f32.mrb[45].mxu1 }
 0x403   : > { %v2856_v13 = vadd.f32 %v2825_v6, %v6554_v3  ;;  %v4334_v7 = vpop.f32.mrb[46].mxu1 }
 0x404   : > { %v2859_v18 = vadd.f32 %v4334_v7, %v2712_v33  ;;  %v2828_v14 = vpop.f32.mrb[47].mxu1 }
 0x405   : > { %v2857_v46 = vadd.f32 %v2828_v14, %v2710_v12 }
 0x409   : > { %v4337_v11 = vpop.f32.mrb[48].mxu1 }
 0x40a   : > { %v2862_v49 = vadd.f32 %v4337_v11, %v2715_v61  ;;  %v2841_v20 = vpop.f32.mrb[49].mxu1 }
 0x40b   : > { %v2860_v41 = vadd.f32 %v2841_v20, %v2713_v40  ;;  %v4338_v2 = vpop.f32.mrb[50].mxu1 }
 0x40c   : > { %v2863_v44 = vadd.f32 %v4338_v2, %v2716_v35  ;;  %v2844_v9 = vpop.f32.mrb[51].mxu1 }
 0x40d   : > { %v2861_v10 = vadd.f32 %v2844_v9, %v2714_v15 }
 0x413   : > { %v2997_v5 = vpop.f32.mrb[52].mxu0 }
 0x414   : > { %v3208_v53 = vadd.f32 %v2997_v5, %v2693_v63  ;;  %v2999_v59 = vpop.f32.mrb[53].mxu0 }
 0x415   : > { %v3366_v27 = vadd.f32 %v2999_v59, %v2856_v13  ;;  %v3001_v43 = vpop.f32.mrb[54].mxu0 }
 0x416   : > { %v3209_v1 = vadd.f32 %v3001_v43, %v2694_v60  ;;  %v3003_v23 = vpop.f32.mrb[55].mxu0 }
 0x417   : > { %v3367_v3 = vadd.f32 %v3003_v23, %v2857_v46 }
 0x41b   : > { %v3007_v19 = vpop.f32.mrb[56].mxu0 }
 0x41c   : > { %v3210_v17 = vadd.f32 %v3007_v19, %v2695_v51  ;;  %v3009_v33 = vpop.f32.mrb[57].mxu0 }
 0x41d   : > { %v3368_v12 = vadd.f32 %v3009_v33, %v2858_v8  ;;  %v3011_v48 = vpop.f32.mrb[58].mxu0 }
 0x41e   : > { %v3211_v31 = vadd.f32 %v3011_v48, %v2696_v39  ;;  %v3013_v25 = vpop.f32.mrb[59].mxu0 }
 0x41f   : > { %v3369_v47 = vadd.f32 %v3013_v25, %v2859_v18 }
 0x421   : > { %v3169_v52 = vpop.f32.mrb[52].mxu1 }
 0x422   : > { %v3216_v34 = vadd.f32 %v3208_v53, %v3169_v52  ;;  %v3171_v4 = vpop.f32.mrb[53].mxu1 }
 0x423   : > { %v3017_v40 = vpop.f32.mrb[60].mxu0  ;;  %v6561_v50 = vadd.f32 %v3366_v27, %v3171_v4  ;;  %v3173_v37 = vpop.f32.mrb[54].mxu1 }
 0x424   : > { %v3212_v38 = vadd.f32 %v3017_v40, %v2697_v62  ;;  %v3019_v26 = vpop.f32.mrb[61].mxu0  ;;  %v3217_v24 = vadd.f32 %v3209_v1, %v3173_v37  ;;  %v3175_v15 = vpop.f32.mrb[55].mxu1 }
 0x425   : > { %v3370_v63 = vadd.f32 %v3019_v26, %v2860_v41  ;;  %v3021_v21 = vpop.f32.mrb[62].mxu0  ;;  %v6563_v51 = vadd.f32 %v3367_v3, %v3175_v15 }
 0x426   : > { %v3213_v32 = vadd.f32 %v3021_v21, %v2698_v56  ;;  %v3023_v60 = vpop.f32.mrb[63].mxu0 }
 0x427   : > { %v3371_v39 = vadd.f32 %v3023_v60, %v2861_v10 }
 0x429   : > { %v3179_v36 = vpop.f32.mrb[56].mxu1 }
 0x42a   : > { %v3218_v16 = vadd.f32 %v3210_v17, %v3179_v36  ;;  %v3181_v28 = vpop.f32.mrb[57].mxu1 }
 0x42b   : > { %v3027_v61 = vpop.f32.mrb[64].mxu0  ;;  %v6565_v58 = vadd.f32 %v3368_v12, %v3181_v28  ;;  %v3183_v29 = vpop.f32.mrb[58].mxu1 }
 0x42c   : > { %v3214_v22 = vadd.f32 %v3027_v61, %v6556_v30  ;;  %v3029_v57 = vpop.f32.mrb[65].mxu0  ;;  %v3219_v45 = vadd.f32 %v3211_v31, %v3183_v29  ;;  %v3185_v35 = vpop.f32.mrb[59].mxu1  ;;  %v6576_v30 = vld [vmem:[%s6925_s26] ss:$0 sm:$0xff] }
 0x42d   : > { %v3372_v62 = vadd.f32 %v3029_v57, %v2862_v49  ;;  %v3031_v42 = vpop.f32.mrb[66].mxu0  ;;  %v6568_v55 = vadd.f32 %v3369_v47, %v3185_v35 }
 0x42e   : > { %v3215_v56 = vadd.f32 %v3031_v42, %v6558_v54  ;;  %v3033_v0 = vpop.f32.mrb[67].mxu0 }
 0x42f   : > { %v3373_v8 = vadd.f32 %v3033_v0, %v2863_v44 }
 0x431   : > { %v3189_v6 = vpop.f32.mrb[60].mxu1 }
 0x432   : > { %v3220_v13 = vadd.f32 %v3212_v38, %v3189_v6  ;;  %v3191_v7 = vpop.f32.mrb[61].mxu1 }
 0x433   : > { %v6571_v18 = vadd.f32 %v3370_v63, %v3191_v7  ;;  %v4357_v14 = vpop.f32.mrb[68].mxu0  ;;  %v3193_v46 = vpop.f32.mrb[62].mxu1 }
 0x434   : > { %v3360_v11 = vadd.f32 %v4357_v14, %v3218_v16  ;;  %v3221_v49 = vadd.f32 %v3213_v32, %v3193_v46  ;;  %v3327_v20 = vpop.f32.mrb[69].mxu0  ;;  %v3195_v41 = vpop.f32.mrb[63].mxu1 }
 0x435   : > { %v3358_v54 = vadd.f32 %v3327_v20, %v3216_v34  ;;  %v6579_v2 = vadd.f32 %v3371_v39, %v3195_v41  ;;  %v4358_v44 = vpop.f32.mrb[70].mxu0 }
 0x436   : > { %v3532_v9 = vadd.f32 %v6576_v30, %v3360_v11  ;;  %v3361_v10 = vadd.f32 %v4358_v44, %v3219_v45  ;;  %v3330_v5 = vpop.f32.mrb[71].mxu0 }
 0x437   : > { %v3530_v53 = vadd.f32 %v6576_v30, %v3358_v54  ;;  %v3359_v59 = vadd.f32 %v3330_v5, %v3217_v24 }
 0x438   : > { %v3540_v27 = vmax.f32 %v3532_v9, 0.0  ;;  %v3533_v43 = vadd.f32 %v6576_v30, %v3361_v10 }
 0x439   : > { %v3538_v1 = vmax.f32 %v3530_v53, 0.0  ;;  %v3531_v23 = vadd.f32 %v6576_v30, %v3359_v59  ;;  %v3199_v3 = vpop.f32.mrb[64].mxu1 }
 0x43a   : > { %3564 = vst [vmem:[%s6585_s23 + $0x20] sm:$0xff] %v3540_v27  ;;  %v3541_v19 = vmax.f32 %v3533_v43, 0.0  ;;  %v3222_v17 = vadd.f32 %v3214_v22, %v3199_v3  ;;  %v3201_v33 = vpop.f32.mrb[65].mxu1 }
 0x43b   : > { %3562 = vst [vmem:[%s6585_s23] sm:$0xff] %v3538_v1  ;;  %v3539_v12 = vmax.f32 %v3531_v23, 0.0  ;;  %v3380_v48 = vadd.f32 %v3372_v62, %v3201_v33  ;;  %v4361_v31 = vpop.f32.mrb[72].mxu0  ;;  %v3203_v25 = vpop.f32.mrb[66].mxu1 }
 0x43c   : > { %3565 = vst [vmem:[%s6585_s23 + $0x30] sm:$0xff] %v3541_v19  ;;  %v3364_v47 = vadd.f32 %v4361_v31, %v3222_v17  ;;  %v3223_v52 = vadd.f32 %v3215_v56, %v3203_v25  ;;  %v3343_v34 = vpop.f32.mrb[73].mxu0  ;;  %v3205_v4 = vpop.f32.mrb[67].mxu1 }
 0x43d   : > { %3563 = vst [vmem:[%s6585_s23 + $0x10] sm:$0xff] %v3539_v12  ;;  %v3362_v40 = vadd.f32 %v3343_v34, %v3220_v13  ;;  %v3381_v37 = vadd.f32 %v3373_v8, %v3205_v4  ;;  %v4362_v38 = vpop.f32.mrb[74].mxu0 }
 0x43e   : > { %v3536_v26 = vadd.f32 %v6576_v30, %v3364_v47  ;;  %v3365_v24 = vadd.f32 %v4362_v38, %v3223_v52  ;;  %v3346_v15 = vpop.f32.mrb[75].mxu0 }
 0x43f   : > { %v3534_v63 = vadd.f32 %v6576_v30, %v3362_v40  ;;  %v3363_v21 = vadd.f32 %v3346_v15, %v3221_v49 }
 0x440   : > { %v3544_v32 = vmax.f32 %v3536_v26, 0.0  ;;  %v3537_v60 = vadd.f32 %v6576_v30, %v3365_v24 }
 0x441   : > { %v3542_v39 = vmax.f32 %v3534_v63, 0.0  ;;  %v3535_v36 = vadd.f32 %v6576_v30, %v3363_v21  ;;  %v4381_v16 = vpop.f32.mrb[68].mxu1 }
 0x442   : > { %3568 = vst [vmem:[%s6585_s23 + $0x60] sm:$0xff] %v3544_v32  ;;  %v3545_v28 = vmax.f32 %v3537_v60, 0.0  ;;  %v3517_v61 = vadd.f32 %v4381_v16, %v6565_v58  ;;  %v3484_v29 = vpop.f32.mrb[69].mxu1 }
 0x443   : > { %3566 = vst [vmem:[%s6585_s23 + $0x40] sm:$0xff] %v3542_v39  ;;  %v3543_v22 = vmax.f32 %v3535_v36, 0.0  ;;  %v3515_v57 = vadd.f32 %v3484_v29, %v6561_v50  ;;  %v4382_v45 = vpop.f32.mrb[70].mxu1 }
 0x444   : > { %3569 = vst [vmem:[%s6585_s23 + $0x70] sm:$0xff] %v3545_v28  ;;  %v3548_v35 = vadd.f32 %v6576_v30, %v3517_v61  ;;  %v3518_v62 = vadd.f32 %v4382_v45, %v6568_v55  ;;  %v3487_v42 = vpop.f32.mrb[71].mxu1 }
 0x445   : > { %3567 = vst [vmem:[%s6585_s23 + $0x50] sm:$0xff] %v3543_v22  ;;  %v3546_v58 = vadd.f32 %v6576_v30, %v3515_v57  ;;  %v3516_v56 = vadd.f32 %v3487_v42, %v6563_v51 }
 0x446   : > { %v3556_v0 = vmax.f32 %v3548_v35, 0.0  ;;  %v3549_v8 = vadd.f32 %v6576_v30, %v3518_v62 }
 0x447   : > { %v3554_v50 = vmax.f32 %v3546_v58, 0.0  ;;  %v3547_v6 = vadd.f32 %v6576_v30, %v3516_v56 }
 0x448   : > { %3572 = vst [vmem:[%s6585_s23 + $0x28] sm:$0xff] %v3556_v0  ;;  %v3557_v13 = vmax.f32 %v3549_v8, 0.0 }
 0x449   : > { %3570 = vst [vmem:[%s6585_s23 + $0x8] sm:$0xff] %v3554_v50  ;;  %v3555_v55 = vmax.f32 %v3547_v6, 0.0  ;;  %v4385_v7 = vpop.f32.mrb[72].mxu1 }
 0x44a   : > { %3573 = vst [vmem:[%s6585_s23 + $0x38] sm:$0xff] %v3557_v13  ;;  %v3521_v14 = vadd.f32 %v4385_v7, %v3380_v48  ;;  %v3500_v46 = vpop.f32.mrb[73].mxu1 }
 0x44b   : > { %3571 = vst [vmem:[%s6585_s23 + $0x18] sm:$0xff] %v3555_v55  ;;  %v3519_v51 = vadd.f32 %v3500_v46, %v6571_v18  ;;  %v4386_v11 = vpop.f32.mrb[74].mxu1 }
 0x44c   : > { %v3552_v49 = vadd.f32 %v6576_v30, %v3521_v14  ;;  %v3522_v20 = vadd.f32 %v4386_v11, %v3381_v37  ;;  %v3503_v41 = vpop.f32.mrb[75].mxu1 }
 0x44d   : > { %v3550_v54 = vadd.f32 %v6576_v30, %v3519_v51  ;;  %v3520_v44 = vadd.f32 %v3503_v41, %v6579_v2 }
 0x44e   : > { %v3560_v9 = vmax.f32 %v3552_v49, 0.0  ;;  %v3553_v10 = vadd.f32 %v6576_v30, %v3522_v20 }
 0x44f   : > { %v3558_v18 = vmax.f32 %v3550_v54, 0.0  ;;  %v3551_v5 = vadd.f32 %v6576_v30, %v3520_v44 }
 0x450   : > { %3576 = vst [vmem:[%s6585_s23 + $0x68] sm:$0xff] %v3560_v9  ;;  %v3561_v53 = vmax.f32 %v3553_v10, 0.0 }
 0x451   : > { %3574 = vst [vmem:[%s6585_s23 + $0x48] sm:$0xff] %v3558_v18  ;;  %v3559_v59 = vmax.f32 %v3551_v5, 0.0 }
 0x452   : > { %3577 = vst [vmem:[%s6585_s23 + $0x78] sm:$0xff] %v3561_v53 }
 0x453   : > { %3575 = vst [vmem:[%s6585_s23 + $0x58] sm:$0xff] %v3559_v59 }
 0x454   : > { %5160 = shalt.err (!%p5157_p7)
}
 0x455   : > { %s5161_s21 = scalar_lea.hbm %s6627_s13, 2048  ;;  %s5165_s7 = scalar_lea.hbm %s6927_s3, 8192 }
 0x456   : > { %p5162_p0 = scmp.ne.s32.totalorder %s6627_s13, %s5161_s21  ;;  %p5166_p4 = scmp.lt.u32.totalorder %s6627_s13, %s6927_s3 }
 0x457   : > { %p5167_p10 = scmp.lt.u32.totalorder %s5165_s7, %s5161_s21  ;;  %p5169_p8 = scmp.lt.u32.totalorder %s5161_s21, %s6627_s13 }
 0x458   : > { %p5163_p6 = pnand %p5162_p0, %p6928_p2 }
 0x459   : > { %p5168_p12 = por %p5167_p10, %p5166_p4 }
 0x45a   : > { %p5164_p5 = pneg %p5163_p6 }
 0x45b   : > { %p5170_p13 = por %p5169_p8, %p5168_p12 }
 0x45d   : > { %p5171_p11 = pnand %p5170_p13, %p5164_p5 }
 0x45f   : > { %5174 = shalt.err (!%p5171_p11)
}
 0x460   : > { %s5388_s23 = smov 256   ;;  %s5389_s14 = smov 16  }
 0x461   : > { %4427 = dma.vmem_to_hbm [thread:$0]  (%p6928_p2), %s6621_s15, 2048, %s6627_s13, %s3579_s20, %s5388_s23, %s5388_s23, %s5389_s14  }
 0x462 PF: > { %s6929_s27 = sld [smem:[#allocation52_spill]]  ;;  %p4469_p9 = scmp.ge.s32.totalorder %s5369_s11, 2 }
 0x463   : > { %s3610_s2 = sand.u32 1, %s5341_s29  }
 0x464   : > { %s3611_s22 = scalar_lea.sflag [#allocation5], %s3610_s2 }
 0x468   : > { %p6930_p3 = scmp.ne.s32.totalorder %s6929_s27, 0 }
 0x46a   : > { %p4459_p1 = pnand %p4469_p9, %p6930_p3 }
 0x46c   : > { %5288 = dma.done.wait (!%p4459_p1), %s3611_s22, 2048  }
 0x46d   : > { %5290 = vsyncadd (!%p4459_p1), %s3611_s22, 4294965248  ;;  %s37_s11 = sadd.s32 1, %s5369_s11   ;;  %s6932_s17 = sld [smem:[#allocation29_spill]] }
 0x46e   : > { %p6660_p7 = scmp.ge.s32.totalorder %s37_s11, 6   ;;  %s6933_s18 = sld [smem:[#allocation30_spill]] }
 0x46f   : > { %s6934_s20 = sld [smem:[#allocation32_spill]]  ;;  %s6935_s21 = sld [smem:[#allocation33_spill]] }
 0x470   : > { %s6936_s23 = sld [smem:[#allocation35_spill]]  ;;  %s6937_s24 = sld [smem:[#allocation36_spill]] }
 0x471   : > { %s6938_s26 = sld [smem:[#allocation37_spill]]  ;;  %s6939_s27 = sld [smem:[#allocation38_spill]] }
 0x472   : > { %s6940_s29 = sld [smem:[#allocation50_spill]]  ;;  %s6941_s0 = sld [smem:[#allocation39_spill]] }
 0x473   : > { %s6942_s12 = sld [smem:[#allocation51_spill]]  ;;  %s6943_s13 = sld [smem:[#allocation42_spill]] }
 0x474   : > { %s6944_s14 = sld [smem:[#allocation43_spill]]  ;;  %s6945_s15 = sld [smem:[#allocation45_spill]] }
 0x475   : > { %s6946_s19 = smov %s6981_s6  ;;  %s6947_s16 = sld [smem:[#allocation46_spill]] }
 0x476   : > { %s6949_s22 = smov %s6975_s8  ;;  %s6950_s25 = smov %s6969_s5 }
 0x477   :  { %36 = sbr.rel (!%p6660_p7) target bundleno = 33 (0x21), region = 188 }
 0x478   : > { %s6951_s28 = smov %s6940_s29  ;;  %s6952_s29 = smov %s5345_s30 }
 0x479   : > { %s6953_s30 = smov %s6941_s0 }
 0x47e   :  { %3616 = vsyncpa [#allocation4], 1 }
 0x47f   :  { %3618 = vsyncpa [#allocation4 + $0x1], 1 }
 0x480   :  { %3619 = vsyncpa [#allocation7], 1 }
 0x481   :  { %3621 = vsyncpa [#allocation7 + $0x1], 1 }
 0x482   :  { %3622 = vsyncpa [#allocation10], 1 }
 0x483   :  { %3624 = vsyncpa [#allocation10 + $0x1], 1 }
 0x484   :  { %3625 = vsyncpa [#allocation13], 1 }
 0x485   :  { %3627 = vsyncpa [#allocation13 + $0x1], 1 }
 0x486   :  { %3628 = vsyncpa [#allocation16], 1 }
 0x487   :  { %3629 = vsyncpa [#allocation5], 1 }
 0x488   :  { %3631 = vsyncpa [#allocation5 + $0x1], 1 }

</bundles_post_ra>
